<compile_context>
chip_gen: v6e
topology: v6e:2x2x1
jax: 0.10.0
libtpu: 0.0.40
codegen_flags: <defaults>
</compile_context>

<pallas_src>
import functools
import numpy as np
import jax
import jax.numpy as jnp
from jax.experimental import pallas as pl
from jax.experimental.pallas import tpu as pltpu

_VMEM_LIMIT_BYTES = 64 * 1024 * 1024


def _round_up(x, m):
    return ((x + m - 1) // m) * m


# ----------------------------- Pallas kernels -------------------------------

def _layernorm(x, gamma, beta, eps=1e-5):
    # Single pass: var = E[x^2] - mean^2 (halves XLU cross-lane reductions).
    mean = jnp.mean(x, axis=-1, keepdims=True)
    meansq = jnp.mean(x * x, axis=-1, keepdims=True)
    var = meansq - mean * mean
    return (x - mean) * jax.lax.rsqrt(var + eps) * gamma + beta


def _proj_kernel(src_ref, pos_ref, ref_ref,
                 wso_ref, bso_ref, refmap_ref, invnorm_ref,
                 waw_ref, baw_ref, wv_ref, bv_ref,
                 loc_ref, aw_ref, val_ref, *, n_heads, lp):
    """Per (batch, Lq-tile): MSDeformAttn projections.

    Emits sampling locations directly (fused reference-point broadcast via a tiny
    matmul + offset normalisation), per-head softmaxed attention weights and the
    value projection. MXU matmuls run bf16 with f32 accumulation; softmax / LN
    arithmetic stays f32 (v5e has no bf16 VPU/EUP).
    """
    src = src_ref[0]                                   # (T, D) f32
    pos = pos_ref[0]                                   # (T, D) f32
    q = (src + pos).astype(jnp.bfloat16)

    # sampling offsets -> sampling locations, fused (no raw-offset HBM round trip)
    so = jnp.dot(q, wso_ref[...], preferred_element_type=jnp.float32) + bso_ref[...]
    refb = jnp.dot(ref_ref[0], refmap_ref[...], preferred_element_type=jnp.float32)
    loc_ref[0] = refb + so * invnorm_ref[...]

    # attention weights: per-head softmax over (levels*points), per-group max so one
    # head's small logits can never underflow against another head's max (no NaNs);
    # approx reciprocal rides the otherwise-idle EUP slot.
    logits = jnp.dot(q, waw_ref[...], preferred_element_type=jnp.float32) + baw_ref[...]
    parts = []
    for h in range(n_heads):
        g = logits[:, h * lp:(h + 1) * lp]
        m = jnp.max(g, axis=-1, keepdims=True)
        e = jnp.exp(g - m)
        s = jnp.sum(e, axis=-1, keepdims=True)
        parts.append(e * pl.reciprocal(s, approx=True))
    aw_ref[0] = jnp.concatenate(parts, axis=-1)

    # value projection (padding_mask is None); bf16 output halves HBM traffic into
    # the gather stage.
    val = jnp.dot(src.astype(jnp.bfloat16), wv_ref[...],
                  preferred_element_type=jnp.float32) + bv_ref[...]
    val_ref[0] = val.astype(jnp.bfloat16)


def _ffn_kernel(src_ref, attn_ref, wout_ref, bout_ref, g1_ref, be1_ref,
                w1_ref, b1_ref, w2_ref, b2_ref, g2_ref, be2_ref, out_ref):
    """Per (batch, Lq-tile): output_proj + residual + LN1 + FFN + residual + LN2."""
    src = src_ref[0]                                   # (T, D) f32
    attn = attn_ref[0]                                 # (T, D) bf16
    x = src + jnp.dot(attn, wout_ref[...], preferred_element_type=jnp.float32) + bout_ref[...]
    x = _layernorm(x, g1_ref[...], be1_ref[...])
    h = jnp.maximum(
        jnp.dot(x.astype(jnp.bfloat16), w1_ref[...],
                preferred_element_type=jnp.float32) + b1_ref[...], 0.0)
    y = jnp.dot(h.astype(jnp.bfloat16), w2_ref[...],
                preferred_element_type=jnp.float32) + b2_ref[...]
    out_ref[0] = _layernorm(x + y, g2_ref[...], be2_ref[...])


def _bcast_spec(shape):
    """Full-array block, constant index map (weights resident across the grid)."""
    nd = len(shape)
    return pl.BlockSpec(shape, lambda *_, _nd=nd: (0,) * _nd)


def proj_pallas(src, pos, ref_flat, p, refmap, invnorm, n_heads, lp, tile):
    N, Lq, D = src.shape
    HLP2 = p["Wso"].shape[1]
    HLP = p["Waw"].shape[1]
    RK = ref_flat.shape[-1]
    grid = (N, Lq // tile)
    kernel = functools.partial(_proj_kernel, n_heads=n_heads, lp=lp)
    flops = int(2 * N * Lq * (D * (HLP2 + HLP + D) + RK * HLP2))
    bytes_accessed = int(4 * N * Lq * (2 * D + RK + HLP2 + HLP) + 2 * N * Lq * D)
    return pl.pallas_call(
        kernel,
        out_shape=(
            jax.ShapeDtypeStruct((N, Lq, HLP2), jnp.float32),   # sampling locations
            jax.ShapeDtypeStruct((N, Lq, HLP), jnp.float32),    # attention weights
            jax.ShapeDtypeStruct((N, Lq, D), jnp.bfloat16),     # value projection
        ),
        grid=grid,
        in_specs=[
            pl.BlockSpec((1, tile, D), lambda b, t: (b, t, 0)),
            pl.BlockSpec((1, tile, D), lambda b, t: (b, t, 0)),
            pl.BlockSpec((1, tile, RK), lambda b, t: (b, t, 0)),
            _bcast_spec(p["Wso"].shape), _bcast_spec(p["bso"].shape),
            _bcast_spec(refmap.shape), _bcast_spec(invnorm.shape),
            _bcast_spec(p["Waw"].shape), _bcast_spec(p["baw"].shape),
            _bcast_spec(p["Wv"].shape), _bcast_spec(p["bv"].shape),
        ],
        out_specs=(
            pl.BlockSpec((1, tile, HLP2), lambda b, t: (b, t, 0)),
            pl.BlockSpec((1, tile, HLP), lambda b, t: (b, t, 0)),
            pl.BlockSpec((1, tile, D), lambda b, t: (b, t, 0)),
        ),
        compiler_params=pltpu.CompilerParams(
            dimension_semantics=("parallel", "parallel"),
            vmem_limit_bytes=_VMEM_LIMIT_BYTES),
        cost_estimate=pl.CostEstimate(
            flops=flops, transcendentals=int(N * Lq * (HLP + n_heads)),
            bytes_accessed=bytes_accessed),
    )(src, pos, ref_flat, p["Wso"], p["bso"], refmap, invnorm,
      p["Waw"], p["baw"], p["Wv"], p["bv"])


def ffn_pallas(src, attn_out, p, tile):
    N, Lq, D = src.shape
    F = p["W1"].shape[1]
    grid = (N, Lq // tile)
    flops = int(2 * N * Lq * D * (D + 2 * F))
    bytes_accessed = int(4 * N * Lq * D + 2 * N * Lq * D + 4 * N * Lq * D)
    return pl.pallas_call(
        _ffn_kernel,
        out_shape=jax.ShapeDtypeStruct((N, Lq, D), jnp.float32),
        grid=grid,
        in_specs=[
            pl.BlockSpec((1, tile, D), lambda b, t: (b, t, 0)),
            pl.BlockSpec((1, tile, D), lambda b, t: (b, t, 0)),
            _bcast_spec(p["Wout"].shape), _bcast_spec(p["bout"].shape),
            _bcast_spec(p["g1"].shape), _bcast_spec(p["be1"].shape),
            _bcast_spec(p["W1"].shape), _bcast_spec(p["b1"].shape),
            _bcast_spec(p["W2"].shape), _bcast_spec(p["b2"].shape),
            _bcast_spec(p["g2"].shape), _bcast_spec(p["be2"].shape),
        ],
        out_specs=pl.BlockSpec((1, tile, D), lambda b, t: (b, t, 0)),
        input_output_aliases={0: 0},   # layer output overwrites the residual-stream buffer
        compiler_params=pltpu.CompilerParams(
            dimension_semantics=("parallel", "parallel"),
            vmem_limit_bytes=_VMEM_LIMIT_BYTES),
        cost_estimate=pl.CostEstimate(
            flops=flops, transcendentals=int(2 * N * Lq),
            bytes_accessed=bytes_accessed),
    )(src, attn_out, p["Wout"], p["bout"], p["g1"], p["be1"],
      p["W1"], p["b1"], p["W2"], p["b2"], p["g2"], p["be2"])


# ----------------------------- JAX glue --------------------------------------

def get_reference_points(spatial_shapes, valid_ratios):
    """Port of DeformableTransformerEncoder.get_reference_points."""
    ref_list = []
    for lvl, (H_, W_) in enumerate(spatial_shapes):
        ref_y, ref_x = jnp.meshgrid(
            jnp.linspace(0.5, H_ - 0.5, H_, dtype=jnp.float32),
            jnp.linspace(0.5, W_ - 0.5, W_, dtype=jnp.float32),
            indexing="ij")
        ref_y = ref_y.reshape(-1)[None] / (valid_ratios[:, None, lvl, 1] * H_)
        ref_x = ref_x.reshape(-1)[None] / (valid_ratios[:, None, lvl, 0] * W_)
        ref = jnp.stack((ref_x, ref_y), -1)
        ref_list.append(ref)
    reference_points = jnp.concatenate(ref_list, 1)
    reference_points = reference_points[:, :, None] * valid_ratios[:, None]
    return reference_points  # (N, Len, L, 2)


def make_sampling_constants(spatial_shapes, n_heads, n_levels, n_points):
    """Constant matrices that let the proj kernel emit sampling locations directly."""
    L, P, H = n_levels, n_points, n_heads
    HLP2 = H * L * P * 2
    ref_cols = _round_up(L * 2, 8)                      # keep the broadcast matmul K aligned
    refmap = np.zeros((ref_cols, HLP2), np.float32)
    invnorm = np.zeros((1, HLP2), np.float32)
    for h in range(H):
        for l, (Hl, Wl) in enumerate(spatial_shapes):
            for p_ in range(P):
                base = ((h * L + l) * P + p_) * 2
                refmap[l * 2 + 0, base + 0] = 1.0       # x ref
                refmap[l * 2 + 1, base + 1] = 1.0       # y ref
                invnorm[0, base + 0] = 1.0 / Wl         # offsets[...,0] / W_l
                invnorm[0, base + 1] = 1.0 / Hl         # offsets[...,1] / H_l
    return jnp.asarray(refmap), jnp.asarray(invnorm), ref_cols


def ms_deform_attn_sample(value, spatial_shapes, sampling_locations, attention_weights):
    """Bilinear multi-scale sampling (grid_sample align_corners=False, zero padding).

    value: (N, S, H, hd) bf16; sampling_locations: (N, Lq, H, L, P, 2) f32;
    attention_weights: (N, Lq, H, L, P) f32. Returns (N, Lq, H*hd) f32.
    """
    # TODO(synk): data-dependent gather kept in XLA (one batched row-gather per level);
    # a dedicated Pallas VMEM-gather kernel is the next step if this dominates wall-clock.
    N, S, H, hd = value.shape
    _, Lq, _, L, P, _ = sampling_locations.shape
    sizes = [h * w for (h, w) in spatial_shapes]
    offs = np.concatenate([[0], np.cumsum(sizes)]).astype(np.int64)

    value_t = jnp.transpose(value, (0, 2, 1, 3))                    # (N, H, S, hd)
    loc_t = jnp.transpose(sampling_locations, (0, 2, 1, 3, 4, 5))   # (N, H, Lq, L, P, 2)
    aw_t = jnp.transpose(attention_weights, (0, 2, 1, 3, 4))        # (N, H, Lq, L, P)

    out = jnp.zeros((N, H, Lq, hd), jnp.float32)
    for lvl, (Hl, Wl) in enumerate(spatial_shapes):
        v = value_t[:, :, int(offs[lvl]):int(offs[lvl + 1])]        # (N, H, S_l, hd)
        loc = loc_t[:, :, :, lvl]                                   # (N, H, Lq, P, 2)
        ix = loc[..., 0] * Wl - 0.5
        iy = loc[..., 1] * Hl - 0.5
        x0 = jnp.floor(ix); y0 = jnp.floor(iy)
        wx1 = ix - x0; wx0 = 1.0 - wx1
        wy1 = iy - y0; wy0 = 1.0 - wy1

        idx_parts, w_parts = [], []
        for xc, yc, w in ((x0, y0, wx0 * wy0), (x0 + 1.0, y0, wx1 * wy0),
                          (x0, y0 + 1.0, wx0 * wy1), (x0 + 1.0, y0 + 1.0, wx1 * wy1)):
            valid = ((xc >= 0) & (xc <= Wl - 1) & (yc >= 0) & (yc <= Hl - 1))
            xi = jnp.clip(xc, 0, Wl - 1).astype(jnp.int32)
            yi = jnp.clip(yc, 0, Hl - 1).astype(jnp.int32)
            idx_parts.append(yi * Wl + xi)                          # (N, H, Lq, P)
            w_parts.append(w * valid.astype(jnp.float32))

        idx = jnp.concatenate(idx_parts, axis=-1)                   # (N, H, Lq, 4P)
        wgt = jnp.concatenate(w_parts, axis=-1)
        wgt = wgt * jnp.tile(aw_t[:, :, :, lvl], (1, 1, 1, 4))      # fold attention weight in
        g = jnp.take_along_axis(v, idx.reshape(N, H, Lq * 4 * P)[..., None], axis=2)
        g = g.reshape(N, H, Lq, 4 * P, hd).astype(jnp.float32)
        out = out + jnp.einsum('nhqk,nhqkd->nhqd', wgt, g)

    return jnp.transpose(out, (0, 2, 1, 3)).reshape(N, Lq, H * hd)


def encoder_layer_forward(src_p, pos_p, ref_p, spatial_shapes, params, refmap, invnorm,
                          n_heads, n_levels, n_points, len_real, tile):
    N, Lq_pad, D = src_p.shape
    hd = D // n_heads
    loc_flat, aw_flat, value = proj_pallas(
        src_p, pos_p, ref_p, params, refmap, invnorm, n_heads, n_levels * n_points, tile)

    loc = loc_flat[:, :len_real].reshape(N, len_real, n_heads, n_levels, n_points, 2)
    aw = aw_flat[:, :len_real].reshape(N, len_real, n_heads, n_levels, n_points)
    value_h = value[:, :len_real].reshape(N, len_real, n_heads, hd)

    attn_out = ms_deform_attn_sample(value_h, spatial_shapes, loc, aw)   # (N, len_real, D) f32
    attn_out = attn_out.astype(jnp.bfloat16)
    pad = Lq_pad - len_real
    if pad:
        attn_out = jnp.pad(attn_out, ((0, 0), (0, pad), (0, 0)))

    new_src = ffn_pallas(src_p, attn_out, params, tile)
    return new_src, loc, aw


def deformable_transformer_encoder_forward(src, spatial_shapes, level_start_index,
                                           valid_ratios, pos, layer_params,
                                           refmap, invnorm, ref_cols,
                                           n_heads, n_levels, n_points, tile_lq=512):
    del level_start_index  # implicit in spatial_shapes (python-level split)
    N, Len_in, D = src.shape
    reference_points = get_reference_points(spatial_shapes, valid_ratios)   # (N, Len, L, 2)
    ref_flat = reference_points.reshape(N, Len_in, n_levels * 2)
    if ref_cols > n_levels * 2:
        ref_flat = jnp.pad(ref_flat, ((0, 0), (0, 0), (0, ref_cols - n_levels * 2)))

    # tile the query dimension; pad Lq so every tile is full (padded rows are sliced off).
    tile = min(tile_lq, _round_up(Len_in, 16))
    Lq_pad = _round_up(Len_in, tile)
    pad = Lq_pad - Len_in

    def _pad_q(x):
        return jnp.pad(x, ((0, 0), (0, pad), (0, 0))) if pad else x

    output = _pad_q(src)
    pos_p = _pad_q(pos)
    ref_p = _pad_q(ref_flat)

    sampling_locations_all = []
    attn_weights_all = []
    for params in layer_params:
        output, sl, aw = encoder_layer_forward(
            output, pos_p, ref_p, spatial_shapes, params, refmap, invnorm,
            n_heads, n_levels, n_points, Len_in, tile)
        sampling_locations_all.append(sl)
        attn_weights_all.append(aw)
    sampling_locations_all = jnp.stack(sampling_locations_all, axis=1)
    attn_weights_all = jnp.stack(attn_weights_all, axis=1)
    return output[:, :Len_in], sampling_locations_all, attn_weights_all


# ----------------------------- setup & run ------------------------------------

def make_layer_params(key, d_model, d_ffn, n_heads, n_levels, n_points):
    ks = jax.random.split(key, 8)
    HLP = n_heads * n_levels * n_points
    s = 0.1
    f32, bf16 = jnp.float32, jnp.bfloat16
    return {
        # matmul weights stored bf16 (MXU operands); biases / LN params in f32.
        "Wso": (s * jax.random.normal(ks[0], (d_model, HLP * 2), f32)).astype(bf16),
        "bso": s * jax.random.normal(ks[1], (1, HLP * 2), f32),
        "Waw": (s * jax.random.normal(ks[2], (d_model, HLP), f32)).astype(bf16),
        "baw": jnp.zeros((1, HLP), f32),
        "Wv": (s * jax.random.normal(ks[3], (d_model, d_model), f32)).astype(bf16),
        "bv": jnp.zeros((1, d_model), f32),
        "Wout": (s * jax.random.normal(ks[4], (d_model, d_model), f32)).astype(bf16),
        "bout": jnp.zeros((1, d_model), f32),
        "g1": jnp.ones((1, d_model), f32),
        "be1": jnp.zeros((1, d_model), f32),
        "W1": (s * jax.random.normal(ks[5], (d_model, d_ffn), f32)).astype(bf16),
        "b1": jnp.zeros((1, d_ffn), f32),
        "W2": (s * jax.random.normal(ks[6], (d_ffn, d_model), f32)).astype(bf16),
        "b2": jnp.zeros((1, d_model), f32),
        "g2": jnp.ones((1, d_model), f32),
        "be2": jnp.zeros((1, d_model), f32),
    }


if __name__ == "__main__":
    # small config
    N = 2
    d_model = 32
    d_ffn = 64
    n_heads = 4
    n_levels = 2
    n_points = 2
    num_layers = 2
    spatial_shapes = [(8, 8), (4, 4)]                       # per-level (H, W)
    Len_in = sum(h * w for h, w in spatial_shapes)          # 80
    level_start_index = np.concatenate(
        [[0], np.cumsum([h * w for h, w in spatial_shapes])[:-1]])

    key = jax.random.PRNGKey(0)
    k_src, k_pos, k_vr, k_par = jax.random.split(key, 4)
    src = jax.random.normal(k_src, (N, Len_in, d_model), jnp.float32)
    pos = jax.random.normal(k_pos, (N, Len_in, d_model), jnp.float32)
    valid_ratios = jax.random.uniform(k_vr, (N, n_levels, 2), jnp.float32,
                                      minval=0.6, maxval=1.0)

    # _get_clones uses deepcopy of one initialized layer -> identical params per layer.
    base_params = make_layer_params(k_par, d_model, d_ffn, n_heads, n_levels, n_points)
    layer_params = [base_params for _ in range(num_layers)]

    refmap, invnorm, ref_cols = make_sampling_constants(
        spatial_shapes, n_heads, n_levels, n_points)

    fwd = jax.jit(functools.partial(
        deformable_transformer_encoder_forward,
        spatial_shapes=spatial_shapes,
        level_start_index=level_start_index,
        layer_params=layer_params,
        refmap=refmap, invnorm=invnorm, ref_cols=ref_cols,
        n_heads=n_heads, n_levels=n_levels, n_points=n_points,
        tile_lq=64))   # small tile so the toy run exercises multi-tile + Lq padding

    output, sampling_locations_all, attn_weights_all = fwd(
        src, valid_ratios=valid_ratios, pos=pos)
    jax.block_until_ready((output, sampling_locations_all, attn_weights_all))

    assert output.shape == (N, Len_in, d_model)
    assert sampling_locations_all.shape == (N, num_layers, Len_in, n_heads, n_levels, n_points, 2)
    assert attn_weights_all.shape == (N, num_layers, Len_in, n_heads, n_levels, n_points)
    assert bool(jnp.isfinite(output).all())
    print("KERNEL_OK")
</pallas_src>

<mosaic_0001>
module attributes {stable_mosaic.version = 11 : i64} {
  func.func @_proj_kernel(%arg0: i32, %arg1: i32, %arg2: memref<1x64x32xf32, #tpu.memory_space<vmem>>, %arg3: memref<1x64x32xf32, #tpu.memory_space<vmem>>, %arg4: memref<1x64x8xf32, #tpu.memory_space<vmem>>, %arg5: memref<32x32xbf16, #tpu.memory_space<vmem>>, %arg6: memref<1x32xf32, #tpu.memory_space<vmem>>, %arg7: memref<8x32xf32, #tpu.memory_space<vmem>>, %arg8: memref<1x32xf32, #tpu.memory_space<vmem>>, %arg9: memref<32x16xbf16, #tpu.memory_space<vmem>>, %arg10: memref<1x16xf32, #tpu.memory_space<vmem>>, %arg11: memref<32x32xbf16, #tpu.memory_space<vmem>>, %arg12: memref<1x32xf32, #tpu.memory_space<vmem>>, %arg13: memref<1x64x32xf32, #tpu.memory_space<vmem>>, %arg14: memref<1x64x16xf32, #tpu.memory_space<vmem>>, %arg15: memref<1x64x32xbf16, #tpu.memory_space<vmem>>) attributes {dimension_semantics = [#tpu.dimension_semantics<parallel>, #tpu.dimension_semantics<parallel>], iteration_bounds = array<i64: 2, 2>, scalar_prefetch = 0 : i64, scratch_operands = 0 : i64, tpu.core_type = #tpu.core_type<tc>, window_params = [{transform_indices = @transform_0, window_bounds = array<i64: 1, 64, 32>}, {transform_indices = @transform_1, window_bounds = array<i64: 1, 64, 32>}, {transform_indices = @transform_2, window_bounds = array<i64: 1, 64, 8>}, {pipeline_mode = #tpu.pipeline_mode<synchronous>, transform_indices = @transform_3, window_bounds = array<i64: 32, 32>}, {pipeline_mode = #tpu.pipeline_mode<synchronous>, transform_indices = @transform_4, window_bounds = array<i64: 1, 32>}, {pipeline_mode = #tpu.pipeline_mode<synchronous>, transform_indices = @transform_5, window_bounds = array<i64: 8, 32>}, {pipeline_mode = #tpu.pipeline_mode<synchronous>, transform_indices = @transform_6, window_bounds = array<i64: 1, 32>}, {pipeline_mode = #tpu.pipeline_mode<synchronous>, transform_indices = @transform_7, window_bounds = array<i64: 32, 16>}, {pipeline_mode = #tpu.pipeline_mode<synchronous>, transform_indices = @transform_8, window_bounds = array<i64: 1, 16>}, {pipeline_mode = #tpu.pipeline_mode<synchronous>, transform_indices = @transform_9, window_bounds = array<i64: 32, 32>}, {pipeline_mode = #tpu.pipeline_mode<synchronous>, transform_indices = @transform_10, window_bounds = array<i64: 1, 32>}, {transform_indices = @transform_11, window_bounds = array<i64: 1, 64, 32>}, {transform_indices = @transform_12, window_bounds = array<i64: 1, 64, 16>}, {transform_indices = @transform_13, window_bounds = array<i64: 1, 64, 32>}]} {
    %c0 = arith.constant 0 : index
    %c0_0 = arith.constant 0 : index
    %c0_1 = arith.constant 0 : index
    %0 = vector.load %arg2[%c0, %c0_0, %c0_1] : memref<1x64x32xf32, #tpu.memory_space<vmem>>, vector<1x64x32xf32>
    %1 = vector.shape_cast %0 : vector<1x64x32xf32> to vector<64x32xf32>
    %c0_2 = arith.constant 0 : index
    %c0_3 = arith.constant 0 : index
    %c0_4 = arith.constant 0 : index
    %2 = vector.load %arg3[%c0_2, %c0_3, %c0_4] : memref<1x64x32xf32, #tpu.memory_space<vmem>>, vector<1x64x32xf32>
    %3 = vector.shape_cast %2 : vector<1x64x32xf32> to vector<64x32xf32>
    %4 = arith.addf %1, %3 : vector<64x32xf32>
    %5 = arith.truncf %4 : vector<64x32xf32> to vector<64x32xbf16>
    %c0_5 = arith.constant 0 : index
    %c0_6 = arith.constant 0 : index
    %6 = vector.load %arg5[%c0_5, %c0_6] : memref<32x32xbf16, #tpu.memory_space<vmem>>, vector<32x32xbf16>
    %cst = arith.constant dense<0.000000e+00> : vector<64x32xf32>
    %7 = tpu.matmul %5, %6, %cst {dimension_numbers = #tpu.dot_dimension_numbers<[1], [0], [0], [1], [0, 0, 1, 1], [], []>} : vector<64x32xbf16>, vector<32x32xbf16>, vector<64x32xf32> -> vector<64x32xf32>
    %c0_7 = arith.constant 0 : index
    %c0_8 = arith.constant 0 : index
    %8 = vector.load %arg6[%c0_7, %c0_8] : memref<1x32xf32, #tpu.memory_space<vmem>>, vector<1x32xf32>
    %9 = vector.broadcast %8 : vector<1x32xf32> to vector<64x32xf32>
    %10 = arith.addf %7, %9 : vector<64x32xf32>
    %c0_9 = arith.constant 0 : index
    %c0_10 = arith.constant 0 : index
    %c0_11 = arith.constant 0 : index
    %11 = vector.load %arg4[%c0_9, %c0_10, %c0_11] : memref<1x64x8xf32, #tpu.memory_space<vmem>>, vector<1x64x8xf32>
    %12 = vector.shape_cast %11 : vector<1x64x8xf32> to vector<64x8xf32>
    %c0_12 = arith.constant 0 : index
    %c0_13 = arith.constant 0 : index
    %13 = vector.load %arg7[%c0_12, %c0_13] : memref<8x32xf32, #tpu.memory_space<vmem>>, vector<8x32xf32>
    %cst_14 = arith.constant dense<0.000000e+00> : vector<64x32xf32>
    %14 = tpu.matmul %12, %13, %cst_14 {dimension_numbers = #tpu.dot_dimension_numbers<[1], [0], [0], [1], [0, 0, 1, 1], [], []>} : vector<64x8xf32>, vector<8x32xf32>, vector<64x32xf32> -> vector<64x32xf32>
    %c0_15 = arith.constant 0 : index
    %c0_16 = arith.constant 0 : index
    %15 = vector.load %arg8[%c0_15, %c0_16] : memref<1x32xf32, #tpu.memory_space<vmem>>, vector<1x32xf32>
    %16 = vector.broadcast %15 : vector<1x32xf32> to vector<64x32xf32>
    %17 = arith.mulf %10, %16 : vector<64x32xf32>
    %18 = arith.addf %14, %17 : vector<64x32xf32>
    %c0_17 = arith.constant 0 : index
    %c0_18 = arith.constant 0 : index
    %c0_19 = arith.constant 0 : index
    %19 = vector.load %arg13[%c0_17, %c0_18, %c0_19] : memref<1x64x32xf32, #tpu.memory_space<vmem>>, vector<1x64x32xf32>
    %20 = vector.shape_cast %19 : vector<1x64x32xf32> to vector<64x32xf32>
    %21 = vector.shape_cast %18 : vector<64x32xf32> to vector<1x64x32xf32>
    tpu.vector_store %arg13[%c0_17, %c0_18, %c0_19], %21 {strides = array<i32>} : memref<1x64x32xf32, #tpu.memory_space<vmem>>, vector<1x64x32xf32>,
    %c0_20 = arith.constant 0 : index
    %c0_21 = arith.constant 0 : index
    %22 = vector.load %arg9[%c0_20, %c0_21] : memref<32x16xbf16, #tpu.memory_space<vmem>>, vector<32x16xbf16>
    %cst_22 = arith.constant dense<0.000000e+00> : vector<64x16xf32>
    %23 = tpu.matmul %5, %22, %cst_22 {dimension_numbers = #tpu.dot_dimension_numbers<[1], [0], [0], [1], [0, 0, 1, 1], [], []>} : vector<64x32xbf16>, vector<32x16xbf16>, vector<64x16xf32> -> vector<64x16xf32>
    %c0_23 = arith.constant 0 : index
    %c0_24 = arith.constant 0 : index
    %24 = vector.load %arg10[%c0_23, %c0_24] : memref<1x16xf32, #tpu.memory_space<vmem>>, vector<1x16xf32>
    %25 = vector.broadcast %24 : vector<1x16xf32> to vector<64x16xf32>
    %26 = arith.addf %23, %25 : vector<64x16xf32>
    %27 = vector.extract_strided_slice %26 {offsets = [0, 0], sizes = [64, 4], strides = [1, 1]} : vector<64x16xf32> to vector<64x4xf32>
    %cst_25 = arith.constant dense<0xFF800000> : vector<64xf32>
    %28 = vector.multi_reduction <maximumf>, %27, %cst_25 [1] : vector<64x4xf32> to vector<64xf32>
    %29 = vector.shape_cast %28 : vector<64xf32> to vector<64x1xf32>
    %30 = vector.broadcast %29 : vector<64x1xf32> to vector<64x4xf32>
    %31 = arith.subf %27, %30 : vector<64x4xf32>
    %32 = math.exp %31 : vector<64x4xf32>
    %cst_26 = arith.constant dense<0.000000e+00> : vector<64xf32>
    %33 = vector.multi_reduction <add>, %32, %cst_26 [1] : vector<64x4xf32> to vector<64xf32>
    %34 = vector.shape_cast %33 : vector<64xf32> to vector<64x1xf32>
    %35 = tpu.reciprocal %34 {approx = true} : vector<64x1xf32> -> vector<64x1xf32>
    %36 = vector.broadcast %35 : vector<64x1xf32> to vector<64x4xf32>
    %37 = arith.mulf %32, %36 : vector<64x4xf32>
    %38 = vector.extract_strided_slice %26 {offsets = [0, 4], sizes = [64, 4], strides = [1, 1]} : vector<64x16xf32> to vector<64x4xf32>
    %cst_27 = arith.constant dense<0xFF800000> : vector<64xf32>
    %39 = vector.multi_reduction <maximumf>, %38, %cst_27 [1] : vector<64x4xf32> to vector<64xf32>
    %40 = vector.shape_cast %39 : vector<64xf32> to vector<64x1xf32>
    %41 = vector.broadcast %40 : vector<64x1xf32> to vector<64x4xf32>
    %42 = arith.subf %38, %41 : vector<64x4xf32>
    %43 = math.exp %42 : vector<64x4xf32>
    %cst_28 = arith.constant dense<0.000000e+00> : vector<64xf32>
    %44 = vector.multi_reduction <add>, %43, %cst_28 [1] : vector<64x4xf32> to vector<64xf32>
    %45 = vector.shape_cast %44 : vector<64xf32> to vector<64x1xf32>
    %46 = tpu.reciprocal %45 {approx = true} : vector<64x1xf32> -> vector<64x1xf32>
    %47 = vector.broadcast %46 : vector<64x1xf32> to vector<64x4xf32>
    %48 = arith.mulf %43, %47 : vector<64x4xf32>
    %49 = vector.extract_strided_slice %26 {offsets = [0, 8], sizes = [64, 4], strides = [1, 1]} : vector<64x16xf32> to vector<64x4xf32>
    %cst_29 = arith.constant dense<0xFF800000> : vector<64xf32>
    %50 = vector.multi_reduction <maximumf>, %49, %cst_29 [1] : vector<64x4xf32> to vector<64xf32>
    %51 = vector.shape_cast %50 : vector<64xf32> to vector<64x1xf32>
    %52 = vector.broadcast %51 : vector<64x1xf32> to vector<64x4xf32>
    %53 = arith.subf %49, %52 : vector<64x4xf32>
    %54 = math.exp %53 : vector<64x4xf32>
    %cst_30 = arith.constant dense<0.000000e+00> : vector<64xf32>
    %55 = vector.multi_reduction <add>, %54, %cst_30 [1] : vector<64x4xf32> to vector<64xf32>
    %56 = vector.shape_cast %55 : vector<64xf32> to vector<64x1xf32>
    %57 = tpu.reciprocal %56 {approx = true} : vector<64x1xf32> -> vector<64x1xf32>
    %58 = vector.broadcast %57 : vector<64x1xf32> to vector<64x4xf32>
    %59 = arith.mulf %54, %58 : vector<64x4xf32>
    %60 = vector.extract_strided_slice %26 {offsets = [0, 12], sizes = [64, 4], strides = [1, 1]} : vector<64x16xf32> to vector<64x4xf32>
    %cst_31 = arith.constant dense<0xFF800000> : vector<64xf32>
    %61 = vector.multi_reduction <maximumf>, %60, %cst_31 [1] : vector<64x4xf32> to vector<64xf32>
    %62 = vector.shape_cast %61 : vector<64xf32> to vector<64x1xf32>
    %63 = vector.broadcast %62 : vector<64x1xf32> to vector<64x4xf32>
    %64 = arith.subf %60, %63 : vector<64x4xf32>
    %65 = math.exp %64 : vector<64x4xf32>
    %cst_32 = arith.constant dense<0.000000e+00> : vector<64xf32>
    %66 = vector.multi_reduction <add>, %65, %cst_32 [1] : vector<64x4xf32> to vector<64xf32>
    %67 = vector.shape_cast %66 : vector<64xf32> to vector<64x1xf32>
    %68 = tpu.reciprocal %67 {approx = true} : vector<64x1xf32> -> vector<64x1xf32>
    %69 = vector.broadcast %68 : vector<64x1xf32> to vector<64x4xf32>
    %70 = arith.mulf %65, %69 : vector<64x4xf32>
    %71 = tpu.concatenate %37, %48, %59, %70 in 1 : vector<64x4xf32>, vector<64x4xf32>, vector<64x4xf32>, vector<64x4xf32> -> vector<64x16xf32>
    %c0_33 = arith.constant 0 : index
    %c0_34 = arith.constant 0 : index
    %c0_35 = arith.constant 0 : index
    %72 = vector.load %arg14[%c0_33, %c0_34, %c0_35] : memref<1x64x16xf32, #tpu.memory_space<vmem>>, vector<1x64x16xf32>
    %73 = vector.shape_cast %72 : vector<1x64x16xf32> to vector<64x16xf32>
    %74 = vector.shape_cast %71 : vector<64x16xf32> to vector<1x64x16xf32>
    tpu.vector_store %arg14[%c0_33, %c0_34, %c0_35], %74 {strides = array<i32>} : memref<1x64x16xf32, #tpu.memory_space<vmem>>, vector<1x64x16xf32>,
    %75 = arith.truncf %1 : vector<64x32xf32> to vector<64x32xbf16>
    %c0_36 = arith.constant 0 : index
    %c0_37 = arith.constant 0 : index
    %76 = vector.load %arg11[%c0_36, %c0_37] : memref<32x32xbf16, #tpu.memory_space<vmem>>, vector<32x32xbf16>
    %cst_38 = arith.constant dense<0.000000e+00> : vector<64x32xf32>
    %77 = tpu.matmul %75, %76, %cst_38 {dimension_numbers = #tpu.dot_dimension_numbers<[1], [0], [0], [1], [0, 0, 1, 1], [], []>} : vector<64x32xbf16>, vector<32x32xbf16>, vector<64x32xf32> -> vector<64x32xf32>
    %c0_39 = arith.constant 0 : index
    %c0_40 = arith.constant 0 : index
    %78 = vector.load %arg12[%c0_39, %c0_40] : memref<1x32xf32, #tpu.memory_space<vmem>>, vector<1x32xf32>
    %79 = vector.broadcast %78 : vector<1x32xf32> to vector<64x32xf32>
    %80 = arith.addf %77, %79 : vector<64x32xf32>
    %81 = arith.truncf %80 : vector<64x32xf32> to vector<64x32xbf16>
    %c0_41 = arith.constant 0 : index
    %c0_42 = arith.constant 0 : index
    %c0_43 = arith.constant 0 : index
    %82 = vector.load %arg15[%c0_41, %c0_42, %c0_43] : memref<1x64x32xbf16, #tpu.memory_space<vmem>>, vector<1x64x32xbf16>
    %83 = vector.shape_cast %82 : vector<1x64x32xbf16> to vector<64x32xbf16>
    %84 = vector.shape_cast %81 : vector<64x32xbf16> to vector<1x64x32xbf16>
    tpu.vector_store %arg15[%c0_41, %c0_42, %c0_43], %84 {strides = array<i32>} : memref<1x64x32xbf16, #tpu.memory_space<vmem>>, vector<1x64x32xbf16>,
    return
  }
  func.func @transform_0(%arg0: i32, %arg1: i32) -> (i32, i32, i32) {
    %c0_i32 = arith.constant 0 : i32
    %c0_i32_0 = arith.constant 0 : i32
    return %arg0, %arg1, %c0_i32 : i32, i32, i32
  }
  func.func @transform_1(%arg0: i32, %arg1: i32) -> (i32, i32, i32) {
    %c0_i32 = arith.constant 0 : i32
    %c0_i32_0 = arith.constant 0 : i32
    return %arg0, %arg1, %c0_i32 : i32, i32, i32
  }
  func.func @transform_2(%arg0: i32, %arg1: i32) -> (i32, i32, i32) {
    %c0_i32 = arith.constant 0 : i32
    %c0_i32_0 = arith.constant 0 : i32
    return %arg0, %arg1, %c0_i32 : i32, i32, i32
  }
  func.func @transform_3(%arg0: i32, %arg1: i32) -> (i32, i32) {
    %c0_i32 = arith.constant 0 : i32
    %c0_i32_0 = arith.constant 0 : i32
    %c0_i32_1 = arith.constant 0 : i32
    return %c0_i32, %c0_i32_0 : i32, i32
  }
  func.func @transform_4(%arg0: i32, %arg1: i32) -> (i32, i32) {
    %c0_i32 = arith.constant 0 : i32
    %c0_i32_0 = arith.constant 0 : i32
    %c0_i32_1 = arith.constant 0 : i32
    return %c0_i32, %c0_i32_0 : i32, i32
  }
  func.func @transform_5(%arg0: i32, %arg1: i32) -> (i32, i32) {
    %c0_i32 = arith.constant 0 : i32
    %c0_i32_0 = arith.constant 0 : i32
    %c0_i32_1 = arith.constant 0 : i32
    return %c0_i32, %c0_i32_0 : i32, i32
  }
  func.func @transform_6(%arg0: i32, %arg1: i32) -> (i32, i32) {
    %c0_i32 = arith.constant 0 : i32
    %c0_i32_0 = arith.constant 0 : i32
    %c0_i32_1 = arith.constant 0 : i32
    return %c0_i32, %c0_i32_0 : i32, i32
  }
  func.func @transform_7(%arg0: i32, %arg1: i32) -> (i32, i32) {
    %c0_i32 = arith.constant 0 : i32
    %c0_i32_0 = arith.constant 0 : i32
    %c0_i32_1 = arith.constant 0 : i32
    return %c0_i32, %c0_i32_0 : i32, i32
  }
  func.func @transform_8(%arg0: i32, %arg1: i32) -> (i32, i32) {
    %c0_i32 = arith.constant 0 : i32
    %c0_i32_0 = arith.constant 0 : i32
    %c0_i32_1 = arith.constant 0 : i32
    return %c0_i32, %c0_i32_0 : i32, i32
  }
  func.func @transform_9(%arg0: i32, %arg1: i32) -> (i32, i32) {
    %c0_i32 = arith.constant 0 : i32
    %c0_i32_0 = arith.constant 0 : i32
    %c0_i32_1 = arith.constant 0 : i32
    return %c0_i32, %c0_i32_0 : i32, i32
  }
  func.func @transform_10(%arg0: i32, %arg1: i32) -> (i32, i32) {
    %c0_i32 = arith.constant 0 : i32
    %c0_i32_0 = arith.constant 0 : i32
    %c0_i32_1 = arith.constant 0 : i32
    return %c0_i32, %c0_i32_0 : i32, i32
  }
  func.func @transform_11(%arg0: i32, %arg1: i32) -> (i32, i32, i32) {
    %c0_i32 = arith.constant 0 : i32
    %c0_i32_0 = arith.constant 0 : i32
    return %arg0, %arg1, %c0_i32 : i32, i32, i32
  }
  func.func @transform_12(%arg0: i32, %arg1: i32) -> (i32, i32, i32) {
    %c0_i32 = arith.constant 0 : i32
    %c0_i32_0 = arith.constant 0 : i32
    return %arg0, %arg1, %c0_i32 : i32, i32, i32
  }
  func.func @transform_13(%arg0: i32, %arg1: i32) -> (i32, i32, i32) {
    %c0_i32 = arith.constant 0 : i32
    %c0_i32_0 = arith.constant 0 : i32
    return %arg0, %arg1, %c0_i32 : i32, i32, i32
  }
}

module attributes {stable_mosaic.version = 11 : i64} {
  func.func @_proj_kernel(%arg0: i32, %arg1: i32, %arg2: memref<1x64x32xf32, #tpu.memory_space<vmem>>, %arg3: memref<1x64x32xf32, #tpu.memory_space<vmem>>, %arg4: memref<1x64x8xf32, #tpu.memory_space<vmem>>, %arg5: memref<32x32xbf16, #tpu.memory_space<vmem>>, %arg6: memref<1x32xf32, #tpu.memory_space<vmem>>, %arg7: memref<8x32xf32, #tpu.memory_space<vmem>>, %arg8: memref<1x32xf32, #tpu.memory_space<vmem>>, %arg9: memref<32x16xbf16, #tpu.memory_space<vmem>>, %arg10: memref<1x16xf32, #tpu.memory_space<vmem>>, %arg11: memref<32x32xbf16, #tpu.memory_space<vmem>>, %arg12: memref<1x32xf32, #tpu.memory_space<vmem>>, %arg13: memref<1x64x32xf32, #tpu.memory_space<vmem>>, %arg14: memref<1x64x16xf32, #tpu.memory_space<vmem>>, %arg15: memref<1x64x32xbf16, #tpu.memory_space<vmem>>) attributes {dimension_semantics = [#tpu.dimension_semantics<parallel>, #tpu.dimension_semantics<parallel>], iteration_bounds = array<i64: 2, 2>, scalar_prefetch = 0 : i64, scratch_operands = 0 : i64, tpu.core_type = #tpu.core_type<tc>, window_params = [{transform_indices = @transform_0, window_bounds = array<i64: 1, 64, 32>}, {transform_indices = @transform_1, window_bounds = array<i64: 1, 64, 32>}, {transform_indices = @transform_2, window_bounds = array<i64: 1, 64, 8>}, {pipeline_mode = #tpu.pipeline_mode<synchronous>, transform_indices = @transform_3, window_bounds = array<i64: 32, 32>}, {pipeline_mode = #tpu.pipeline_mode<synchronous>, transform_indices = @transform_4, window_bounds = array<i64: 1, 32>}, {pipeline_mode = #tpu.pipeline_mode<synchronous>, transform_indices = @transform_5, window_bounds = array<i64: 8, 32>}, {pipeline_mode = #tpu.pipeline_mode<synchronous>, transform_indices = @transform_6, window_bounds = array<i64: 1, 32>}, {pipeline_mode = #tpu.pipeline_mode<synchronous>, transform_indices = @transform_7, window_bounds = array<i64: 32, 16>}, {pipeline_mode = #tpu.pipeline_mode<synchronous>, transform_indices = @transform_8, window_bounds = array<i64: 1, 16>}, {pipeline_mode = #tpu.pipeline_mode<synchronous>, transform_indices = @transform_9, window_bounds = array<i64: 32, 32>}, {pipeline_mode = #tpu.pipeline_mode<synchronous>, transform_indices = @transform_10, window_bounds = array<i64: 1, 32>}, {transform_indices = @transform_11, window_bounds = array<i64: 1, 64, 32>}, {transform_indices = @transform_12, window_bounds = array<i64: 1, 64, 16>}, {transform_indices = @transform_13, window_bounds = array<i64: 1, 64, 32>}]} {
    %c0 = arith.constant 0 : index
    %c0_0 = arith.constant 0 : index
    %c0_1 = arith.constant 0 : index
    %0 = vector.load %arg2[%c0, %c0_0, %c0_1] : memref<1x64x32xf32, #tpu.memory_space<vmem>>, vector<1x64x32xf32>
    %1 = vector.shape_cast %0 : vector<1x64x32xf32> to vector<64x32xf32>
    %c0_2 = arith.constant 0 : index
    %c0_3 = arith.constant 0 : index
    %c0_4 = arith.constant 0 : index
    %2 = vector.load %arg3[%c0_2, %c0_3, %c0_4] : memref<1x64x32xf32, #tpu.memory_space<vmem>>, vector<1x64x32xf32>
    %3 = vector.shape_cast %2 : vector<1x64x32xf32> to vector<64x32xf32>
    %4 = arith.addf %1, %3 : vector<64x32xf32>
    %5 = arith.truncf %4 : vector<64x32xf32> to vector<64x32xbf16>
    %c0_5 = arith.constant 0 : index
    %c0_6 = arith.constant 0 : index
    %6 = vector.load %arg5[%c0_5, %c0_6] : memref<32x32xbf16, #tpu.memory_space<vmem>>, vector<32x32xbf16>
    %cst = arith.constant dense<0.000000e+00> : vector<64x32xf32>
    %7 = tpu.matmul %5, %6, %cst {dimension_numbers = #tpu.dot_dimension_numbers<[1], [0], [0], [1], [0, 0, 1, 1], [], []>} : vector<64x32xbf16>, vector<32x32xbf16>, vector<64x32xf32> -> vector<64x32xf32>
    %c0_7 = arith.constant 0 : index
    %c0_8 = arith.constant 0 : index
    %8 = vector.load %arg6[%c0_7, %c0_8] : memref<1x32xf32, #tpu.memory_space<vmem>>, vector<1x32xf32>
    %9 = vector.broadcast %8 : vector<1x32xf32> to vector<64x32xf32>
    %10 = arith.addf %7, %9 : vector<64x32xf32>
    %c0_9 = arith.constant 0 : index
    %c0_10 = arith.constant 0 : index
    %c0_11 = arith.constant 0 : index
    %11 = vector.load %arg4[%c0_9, %c0_10, %c0_11] : memref<1x64x8xf32, #tpu.memory_space<vmem>>, vector<1x64x8xf32>
    %12 = vector.shape_cast %11 : vector<1x64x8xf32> to vector<64x8xf32>
    %c0_12 = arith.constant 0 : index
    %c0_13 = arith.constant 0 : index
    %13 = vector.load %arg7[%c0_12, %c0_13] : memref<8x32xf32, #tpu.memory_space<vmem>>, vector<8x32xf32>
    %cst_14 = arith.constant dense<0.000000e+00> : vector<64x32xf32>
    %14 = tpu.matmul %12, %13, %cst_14 {dimension_numbers = #tpu.dot_dimension_numbers<[1], [0], [0], [1], [0, 0, 1, 1], [], []>} : vector<64x8xf32>, vector<8x32xf32>, vector<64x32xf32> -> vector<64x32xf32>
    %c0_15 = arith.constant 0 : index
    %c0_16 = arith.constant 0 : index
    %15 = vector.load %arg8[%c0_15, %c0_16] : memref<1x32xf32, #tpu.memory_space<vmem>>, vector<1x32xf32>
    %16 = vector.broadcast %15 : vector<1x32xf32> to vector<64x32xf32>
    %17 = arith.mulf %10, %16 : vector<64x32xf32>
    %18 = arith.addf %14, %17 : vector<64x32xf32>
    %c0_17 = arith.constant 0 : index
    %c0_18 = arith.constant 0 : index
    %c0_19 = arith.constant 0 : index
    %19 = vector.load %arg13[%c0_17, %c0_18, %c0_19] : memref<1x64x32xf32, #tpu.memory_space<vmem>>, vector<1x64x32xf32>
    %20 = vector.shape_cast %19 : vector<1x64x32xf32> to vector<64x32xf32>
    %21 = vector.shape_cast %18 : vector<64x32xf32> to vector<1x64x32xf32>
    tpu.vector_store %arg13[%c0_17, %c0_18, %c0_19], %21 {strides = array<i32>} : memref<1x64x32xf32, #tpu.memory_space<vmem>>, vector<1x64x32xf32>,
    %c0_20 = arith.constant 0 : index
    %c0_21 = arith.constant 0 : index
    %22 = vector.load %arg9[%c0_20, %c0_21] : memref<32x16xbf16, #tpu.memory_space<vmem>>, vector<32x16xbf16>
    %cst_22 = arith.constant dense<0.000000e+00> : vector<64x16xf32>
    %23 = tpu.matmul %5, %22, %cst_22 {dimension_numbers = #tpu.dot_dimension_numbers<[1], [0], [0], [1], [0, 0, 1, 1], [], []>} : vector<64x32xbf16>, vector<32x16xbf16>, vector<64x16xf32> -> vector<64x16xf32>
    %c0_23 = arith.constant 0 : index
    %c0_24 = arith.constant 0 : index
    %24 = vector.load %arg10[%c0_23, %c0_24] : memref<1x16xf32, #tpu.memory_space<vmem>>, vector<1x16xf32>
    %25 = vector.broadcast %24 : vector<1x16xf32> to vector<64x16xf32>
    %26 = arith.addf %23, %25 : vector<64x16xf32>
    %27 = vector.extract_strided_slice %26 {offsets = [0, 0], sizes = [64, 4], strides = [1, 1]} : vector<64x16xf32> to vector<64x4xf32>
    %cst_25 = arith.constant dense<0xFF800000> : vector<64xf32>
    %28 = vector.multi_reduction <maximumf>, %27, %cst_25 [1] : vector<64x4xf32> to vector<64xf32>
    %29 = vector.shape_cast %28 : vector<64xf32> to vector<64x1xf32>
    %30 = vector.broadcast %29 : vector<64x1xf32> to vector<64x4xf32>
    %31 = arith.subf %27, %30 : vector<64x4xf32>
    %32 = math.exp %31 : vector<64x4xf32>
    %cst_26 = arith.constant dense<0.000000e+00> : vector<64xf32>
    %33 = vector.multi_reduction <add>, %32, %cst_26 [1] : vector<64x4xf32> to vector<64xf32>
    %34 = vector.shape_cast %33 : vector<64xf32> to vector<64x1xf32>
    %35 = tpu.reciprocal %34 {approx = true} : vector<64x1xf32> -> vector<64x1xf32>
    %36 = vector.broadcast %35 : vector<64x1xf32> to vector<64x4xf32>
    %37 = arith.mulf %32, %36 : vector<64x4xf32>
    %38 = vector.extract_strided_slice %26 {offsets = [0, 4], sizes = [64, 4], strides = [1, 1]} : vector<64x16xf32> to vector<64x4xf32>
    %cst_27 = arith.constant dense<0xFF800000> : vector<64xf32>
    %39 = vector.multi_reduction <maximumf>, %38, %cst_27 [1] : vector<64x4xf32> to vector<64xf32>
    %40 = vector.shape_cast %39 : vector<64xf32> to vector<64x1xf32>
    %41 = vector.broadcast %40 : vector<64x1xf32> to vector<64x4xf32>
    %42 = arith.subf %38, %41 : vector<64x4xf32>
    %43 = math.exp %42 : vector<64x4xf32>
    %cst_28 = arith.constant dense<0.000000e+00> : vector<64xf32>
    %44 = vector.multi_reduction <add>, %43, %cst_28 [1] : vector<64x4xf32> to vector<64xf32>
    %45 = vector.shape_cast %44 : vector<64xf32> to vector<64x1xf32>
    %46 = tpu.reciprocal %45 {approx = true} : vector<64x1xf32> -> vector<64x1xf32>
    %47 = vector.broadcast %46 : vector<64x1xf32> to vector<64x4xf32>
    %48 = arith.mulf %43, %47 : vector<64x4xf32>
    %49 = vector.extract_strided_slice %26 {offsets = [0, 8], sizes = [64, 4], strides = [1, 1]} : vector<64x16xf32> to vector<64x4xf32>
    %cst_29 = arith.constant dense<0xFF800000> : vector<64xf32>
    %50 = vector.multi_reduction <maximumf>, %49, %cst_29 [1] : vector<64x4xf32> to vector<64xf32>
    %51 = vector.shape_cast %50 : vector<64xf32> to vector<64x1xf32>
    %52 = vector.broadcast %51 : vector<64x1xf32> to vector<64x4xf32>
    %53 = arith.subf %49, %52 : vector<64x4xf32>
    %54 = math.exp %53 : vector<64x4xf32>
    %cst_30 = arith.constant dense<0.000000e+00> : vector<64xf32>
    %55 = vector.multi_reduction <add>, %54, %cst_30 [1] : vector<64x4xf32> to vector<64xf32>
    %56 = vector.shape_cast %55 : vector<64xf32> to vector<64x1xf32>
    %57 = tpu.reciprocal %56 {approx = true} : vector<64x1xf32> -> vector<64x1xf32>
    %58 = vector.broadcast %57 : vector<64x1xf32> to vector<64x4xf32>
    %59 = arith.mulf %54, %58 : vector<64x4xf32>
    %60 = vector.extract_strided_slice %26 {offsets = [0, 12], sizes = [64, 4], strides = [1, 1]} : vector<64x16xf32> to vector<64x4xf32>
    %cst_31 = arith.constant dense<0xFF800000> : vector<64xf32>
    %61 = vector.multi_reduction <maximumf>, %60, %cst_31 [1] : vector<64x4xf32> to vector<64xf32>
    %62 = vector.shape_cast %61 : vector<64xf32> to vector<64x1xf32>
    %63 = vector.broadcast %62 : vector<64x1xf32> to vector<64x4xf32>
    %64 = arith.subf %60, %63 : vector<64x4xf32>
    %65 = math.exp %64 : vector<64x4xf32>
    %cst_32 = arith.constant dense<0.000000e+00> : vector<64xf32>
    %66 = vector.multi_reduction <add>, %65, %cst_32 [1] : vector<64x4xf32> to vector<64xf32>
    %67 = vector.shape_cast %66 : vector<64xf32> to vector<64x1xf32>
    %68 = tpu.reciprocal %67 {approx = true} : vector<64x1xf32> -> vector<64x1xf32>
    %69 = vector.broadcast %68 : vector<64x1xf32> to vector<64x4xf32>
    %70 = arith.mulf %65, %69 : vector<64x4xf32>
    %71 = tpu.concatenate %37, %48, %59, %70 in 1 : vector<64x4xf32>, vector<64x4xf32>, vector<64x4xf32>, vector<64x4xf32> -> vector<64x16xf32>
    %c0_33 = arith.constant 0 : index
    %c0_34 = arith.constant 0 : index
    %c0_35 = arith.constant 0 : index
    %72 = vector.load %arg14[%c0_33, %c0_34, %c0_35] : memref<1x64x16xf32, #tpu.memory_space<vmem>>, vector<1x64x16xf32>
    %73 = vector.shape_cast %72 : vector<1x64x16xf32> to vector<64x16xf32>
    %74 = vector.shape_cast %71 : vector<64x16xf32> to vector<1x64x16xf32>
    tpu.vector_store %arg14[%c0_33, %c0_34, %c0_35], %74 {strides = array<i32>} : memref<1x64x16xf32, #tpu.memory_space<vmem>>, vector<1x64x16xf32>,
    %75 = arith.truncf %1 : vector<64x32xf32> to vector<64x32xbf16>
    %c0_36 = arith.constant 0 : index
    %c0_37 = arith.constant 0 : index
    %76 = vector.load %arg11[%c0_36, %c0_37] : memref<32x32xbf16, #tpu.memory_space<vmem>>, vector<32x32xbf16>
    %cst_38 = arith.constant dense<0.000000e+00> : vector<64x32xf32>
    %77 = tpu.matmul %75, %76, %cst_38 {dimension_numbers = #tpu.dot_dimension_numbers<[1], [0], [0], [1], [0, 0, 1, 1], [], []>} : vector<64x32xbf16>, vector<32x32xbf16>, vector<64x32xf32> -> vector<64x32xf32>
    %c0_39 = arith.constant 0 : index
    %c0_40 = arith.constant 0 : index
    %78 = vector.load %arg12[%c0_39, %c0_40] : memref<1x32xf32, #tpu.memory_space<vmem>>, vector<1x32xf32>
    %79 = vector.broadcast %78 : vector<1x32xf32> to vector<64x32xf32>
    %80 = arith.addf %77, %79 : vector<64x32xf32>
    %81 = arith.truncf %80 : vector<64x32xf32> to vector<64x32xbf16>
    %c0_41 = arith.constant 0 : index
    %c0_42 = arith.constant 0 : index
    %c0_43 = arith.constant 0 : index
    %82 = vector.load %arg15[%c0_41, %c0_42, %c0_43] : memref<1x64x32xbf16, #tpu.memory_space<vmem>>, vector<1x64x32xbf16>
    %83 = vector.shape_cast %82 : vector<1x64x32xbf16> to vector<64x32xbf16>
    %84 = vector.shape_cast %81 : vector<64x32xbf16> to vector<1x64x32xbf16>
    tpu.vector_store %arg15[%c0_41, %c0_42, %c0_43], %84 {strides = array<i32>} : memref<1x64x32xbf16, #tpu.memory_space<vmem>>, vector<1x64x32xbf16>,
    return
  }
  func.func @transform_0(%arg0: i32, %arg1: i32) -> (i32, i32, i32) {
    %c0_i32 = arith.constant 0 : i32
    %c0_i32_0 = arith.constant 0 : i32
    return %arg0, %arg1, %c0_i32 : i32, i32, i32
  }
  func.func @transform_1(%arg0: i32, %arg1: i32) -> (i32, i32, i32) {
    %c0_i32 = arith.constant 0 : i32
    %c0_i32_0 = arith.constant 0 : i32
    return %arg0, %arg1, %c0_i32 : i32, i32, i32
  }
  func.func @transform_2(%arg0: i32, %arg1: i32) -> (i32, i32, i32) {
    %c0_i32 = arith.constant 0 : i32
    %c0_i32_0 = arith.constant 0 : i32
    return %arg0, %arg1, %c0_i32 : i32, i32, i32
  }
  func.func @transform_3(%arg0: i32, %arg1: i32) -> (i32, i32) {
    %c0_i32 = arith.constant 0 : i32
    %c0_i32_0 = arith.constant 0 : i32
    %c0_i32_1 = arith.constant 0 : i32
    return %c0_i32, %c0_i32_0 : i32, i32
  }
  func.func @transform_4(%arg0: i32, %arg1: i32) -> (i32, i32) {
    %c0_i32 = arith.constant 0 : i32
    %c0_i32_0 = arith.constant 0 : i32
    %c0_i32_1 = arith.constant 0 : i32
    return %c0_i32, %c0_i32_0 : i32, i32
  }
  func.func @transform_5(%arg0: i32, %arg1: i32) -> (i32, i32) {
    %c0_i32 = arith.constant 0 : i32
    %c0_i32_0 = arith.constant 0 : i32
    %c0_i32_1 = arith.constant 0 : i32
    return %c0_i32, %c0_i32_0 : i32, i32
  }
  func.func @transform_6(%arg0: i32, %arg1: i32) -> (i32, i32) {
    %c0_i32 = arith.constant 0 : i32
    %c0_i32_0 = arith.constant 0 : i32
    %c0_i32_1 = arith.constant 0 : i32
    return %c0_i32, %c0_i32_0 : i32, i32
  }
  func.func @transform_7(%arg0: i32, %arg1: i32) -> (i32, i32) {
    %c0_i32 = arith.constant 0 : i32
    %c0_i32_0 = arith.constant 0 : i32
    %c0_i32_1 = arith.constant 0 : i32
    return %c0_i32, %c0_i32_0 : i32, i32
  }
  func.func @transform_8(%arg0: i32, %arg1: i32) -> (i32, i32) {
    %c0_i32 = arith.constant 0 : i32
    %c0_i32_0 = arith.constant 0 : i32
    %c0_i32_1 = arith.constant 0 : i32
    return %c0_i32, %c0_i32_0 : i32, i32
  }
  func.func @transform_9(%arg0: i32, %arg1: i32) -> (i32, i32) {
    %c0_i32 = arith.constant 0 : i32
    %c0_i32_0 = arith.constant 0 : i32
    %c0_i32_1 = arith.constant 0 : i32
    return %c0_i32, %c0_i32_0 : i32, i32
  }
  func.func @transform_10(%arg0: i32, %arg1: i32) -> (i32, i32) {
    %c0_i32 = arith.constant 0 : i32
    %c0_i32_0 = arith.constant 0 : i32
    %c0_i32_1 = arith.constant 0 : i32
    return %c0_i32, %c0_i32_0 : i32, i32
  }
  func.func @transform_11(%arg0: i32, %arg1: i32) -> (i32, i32, i32) {
    %c0_i32 = arith.constant 0 : i32
    %c0_i32_0 = arith.constant 0 : i32
    return %arg0, %arg1, %c0_i32 : i32, i32, i32
  }
  func.func @transform_12(%arg0: i32, %arg1: i32) -> (i32, i32, i32) {
    %c0_i32 = arith.constant 0 : i32
    %c0_i32_0 = arith.constant 0 : i32
    return %arg0, %arg1, %c0_i32 : i32, i32, i32
  }
  func.func @transform_13(%arg0: i32, %arg1: i32) -> (i32, i32, i32) {
    %c0_i32 = arith.constant 0 : i32
    %c0_i32_0 = arith.constant 0 : i32
    return %arg0, %arg1, %c0_i32 : i32, i32, i32
  }
}

module attributes {stable_mosaic.version = 11 : i64} {
  func.func @_ffn_kernel(%arg0: i32, %arg1: i32, %arg2: memref<1x64x32xf32, #tpu.memory_space<vmem>>, %arg3: memref<1x64x32xbf16, #tpu.memory_space<vmem>>, %arg4: memref<32x32xbf16, #tpu.memory_space<vmem>>, %arg5: memref<1x32xf32, #tpu.memory_space<vmem>>, %arg6: memref<1x32xf32, #tpu.memory_space<vmem>>, %arg7: memref<1x32xf32, #tpu.memory_space<vmem>>, %arg8: memref<32x64xbf16, #tpu.memory_space<vmem>>, %arg9: memref<1x64xf32, #tpu.memory_space<vmem>>, %arg10: memref<64x32xbf16, #tpu.memory_space<vmem>>, %arg11: memref<1x32xf32, #tpu.memory_space<vmem>>, %arg12: memref<1x32xf32, #tpu.memory_space<vmem>>, %arg13: memref<1x32xf32, #tpu.memory_space<vmem>>, %arg14: memref<1x64x32xf32, #tpu.memory_space<vmem>>) attributes {dimension_semantics = [#tpu.dimension_semantics<parallel>, #tpu.dimension_semantics<parallel>], iteration_bounds = array<i64: 2, 2>, scalar_prefetch = 0 : i64, scratch_operands = 0 : i64, tpu.core_type = #tpu.core_type<tc>, window_params = [{transform_indices = @transform_0, window_bounds = array<i64: 1, 64, 32>}, {transform_indices = @transform_1, window_bounds = array<i64: 1, 64, 32>}, {pipeline_mode = #tpu.pipeline_mode<synchronous>, transform_indices = @transform_2, window_bounds = array<i64: 32, 32>}, {pipeline_mode = #tpu.pipeline_mode<synchronous>, transform_indices = @transform_3, window_bounds = array<i64: 1, 32>}, {pipeline_mode = #tpu.pipeline_mode<synchronous>, transform_indices = @transform_4, window_bounds = array<i64: 1, 32>}, {pipeline_mode = #tpu.pipeline_mode<synchronous>, transform_indices = @transform_5, window_bounds = array<i64: 1, 32>}, {pipeline_mode = #tpu.pipeline_mode<synchronous>, transform_indices = @transform_6, window_bounds = array<i64: 32, 64>}, {pipeline_mode = #tpu.pipeline_mode<synchronous>, transform_indices = @transform_7, window_bounds = array<i64: 1, 64>}, {pipeline_mode = #tpu.pipeline_mode<synchronous>, transform_indices = @transform_8, window_bounds = array<i64: 64, 32>}, {pipeline_mode = #tpu.pipeline_mode<synchronous>, transform_indices = @transform_9, window_bounds = array<i64: 1, 32>}, {pipeline_mode = #tpu.pipeline_mode<synchronous>, transform_indices = @transform_10, window_bounds = array<i64: 1, 32>}, {pipeline_mode = #tpu.pipeline_mode<synchronous>, transform_indices = @transform_11, window_bounds = array<i64: 1, 32>}, {transform_indices = @transform_12, window_bounds = array<i64: 1, 64, 32>}]} {
    %c0 = arith.constant 0 : index
    %c0_0 = arith.constant 0 : index
    %c0_1 = arith.constant 0 : index
    %0 = vector.load %arg2[%c0, %c0_0, %c0_1] : memref<1x64x32xf32, #tpu.memory_space<vmem>>, vector<1x64x32xf32>
    %1 = vector.shape_cast %0 : vector<1x64x32xf32> to vector<64x32xf32>
    %c0_2 = arith.constant 0 : index
    %c0_3 = arith.constant 0 : index
    %c0_4 = arith.constant 0 : index
    %2 = vector.load %arg3[%c0_2, %c0_3, %c0_4] : memref<1x64x32xbf16, #tpu.memory_space<vmem>>, vector<1x64x32xbf16>
    %3 = vector.shape_cast %2 : vector<1x64x32xbf16> to vector<64x32xbf16>
    %c0_5 = arith.constant 0 : index
    %c0_6 = arith.constant 0 : index
    %4 = vector.load %arg4[%c0_5, %c0_6] : memref<32x32xbf16, #tpu.memory_space<vmem>>, vector<32x32xbf16>
    %cst = arith.constant dense<0.000000e+00> : vector<64x32xf32>
    %5 = tpu.matmul %3, %4, %cst {dimension_numbers = #tpu.dot_dimension_numbers<[1], [0], [0], [1], [0, 0, 1, 1], [], []>} : vector<64x32xbf16>, vector<32x32xbf16>, vector<64x32xf32> -> vector<64x32xf32>
    %6 = arith.addf %1, %5 : vector<64x32xf32>
    %c0_7 = arith.constant 0 : index
    %c0_8 = arith.constant 0 : index
    %7 = vector.load %arg5[%c0_7, %c0_8] : memref<1x32xf32, #tpu.memory_space<vmem>>, vector<1x32xf32>
    %8 = vector.broadcast %7 : vector<1x32xf32> to vector<64x32xf32>
    %9 = arith.addf %6, %8 : vector<64x32xf32>
    %c0_9 = arith.constant 0 : index
    %c0_10 = arith.constant 0 : index
    %10 = vector.load %arg6[%c0_9, %c0_10] : memref<1x32xf32, #tpu.memory_space<vmem>>, vector<1x32xf32>
    %c0_11 = arith.constant 0 : index
    %c0_12 = arith.constant 0 : index
    %11 = vector.load %arg7[%c0_11, %c0_12] : memref<1x32xf32, #tpu.memory_space<vmem>>, vector<1x32xf32>
    %cst_13 = arith.constant dense<0.000000e+00> : vector<64xf32>
    %12 = vector.multi_reduction <add>, %9, %cst_13 [1] : vector<64x32xf32> to vector<64xf32>
    %13 = vector.shape_cast %12 : vector<64xf32> to vector<64x1xf32>
    %cst_14 = arith.constant 3.200000e+01 : f32
    %14 = vector.broadcast %cst_14 : f32 to vector<64x1xf32>
    %15 = arith.divf %13, %14 : vector<64x1xf32>
    %16 = arith.mulf %9, %9 : vector<64x32xf32>
    %cst_15 = arith.constant dense<0.000000e+00> : vector<64xf32>
    %17 = vector.multi_reduction <add>, %16, %cst_15 [1] : vector<64x32xf32> to vector<64xf32>
    %18 = vector.shape_cast %17 : vector<64xf32> to vector<64x1xf32>
    %cst_16 = arith.constant 3.200000e+01 : f32
    %19 = vector.broadcast %cst_16 : f32 to vector<64x1xf32>
    %20 = arith.divf %18, %19 : vector<64x1xf32>
    %21 = arith.mulf %15, %15 : vector<64x1xf32>
    %22 = arith.subf %20, %21 : vector<64x1xf32>
    %23 = vector.broadcast %15 : vector<64x1xf32> to vector<64x32xf32>
    %24 = arith.subf %9, %23 : vector<64x32xf32>
    %cst_17 = arith.constant 9.99999974E-6 : f32
    %25 = vector.broadcast %cst_17 : f32 to vector<64x1xf32>
    %26 = arith.addf %22, %25 : vector<64x1xf32>
    %27 = math.rsqrt %26 : vector<64x1xf32>
    %28 = vector.broadcast %27 : vector<64x1xf32> to vector<64x32xf32>
    %29 = arith.mulf %24, %28 : vector<64x32xf32>
    %30 = vector.broadcast %10 : vector<1x32xf32> to vector<64x32xf32>
    %31 = arith.mulf %29, %30 : vector<64x32xf32>
    %32 = vector.broadcast %11 : vector<1x32xf32> to vector<64x32xf32>
    %33 = arith.addf %31, %32 : vector<64x32xf32>
    %34 = arith.truncf %33 : vector<64x32xf32> to vector<64x32xbf16>
    %c0_18 = arith.constant 0 : index
    %c0_19 = arith.constant 0 : index
    %35 = vector.load %arg8[%c0_18, %c0_19] : memref<32x64xbf16, #tpu.memory_space<vmem>>, vector<32x64xbf16>
    %cst_20 = arith.constant dense<0.000000e+00> : vector<64x64xf32>
    %36 = tpu.matmul %34, %35, %cst_20 {dimension_numbers = #tpu.dot_dimension_numbers<[1], [0], [0], [1], [0, 0, 1, 1], [], []>} : vector<64x32xbf16>, vector<32x64xbf16>, vector<64x64xf32> -> vector<64x64xf32>
    %c0_21 = arith.constant 0 : index
    %c0_22 = arith.constant 0 : index
    %37 = vector.load %arg9[%c0_21, %c0_22] : memref<1x64xf32, #tpu.memory_space<vmem>>, vector<1x64xf32>
    %38 = vector.broadcast %37 : vector<1x64xf32> to vector<64x64xf32>
    %39 = arith.addf %36, %38 : vector<64x64xf32>
    %cst_23 = arith.constant 0.000000e+00 : f32
    %40 = vector.broadcast %cst_23 : f32 to vector<64x64xf32>
    %41 = arith.maximumf %39, %40 : vector<64x64xf32>
    %42 = arith.truncf %41 : vector<64x64xf32> to vector<64x64xbf16>
    %c0_24 = arith.constant 0 : index
    %c0_25 = arith.constant 0 : index
    %43 = vector.load %arg10[%c0_24, %c0_25] : memref<64x32xbf16, #tpu.memory_space<vmem>>, vector<64x32xbf16>
    %cst_26 = arith.constant dense<0.000000e+00> : vector<64x32xf32>
    %44 = tpu.matmul %42, %43, %cst_26 {dimension_numbers = #tpu.dot_dimension_numbers<[1], [0], [0], [1], [0, 0, 1, 1], [], []>} : vector<64x64xbf16>, vector<64x32xbf16>, vector<64x32xf32> -> vector<64x32xf32>
    %c0_27 = arith.constant 0 : index
    %c0_28 = arith.constant 0 : index
    %45 = vector.load %arg11[%c0_27, %c0_28] : memref<1x32xf32, #tpu.memory_space<vmem>>, vector<1x32xf32>
    %46 = vector.broadcast %45 : vector<1x32xf32> to vector<64x32xf32>
    %47 = arith.addf %44, %46 : vector<64x32xf32>
    %48 = arith.addf %33, %47 : vector<64x32xf32>
    %c0_29 = arith.constant 0 : index
    %c0_30 = arith.constant 0 : index
    %49 = vector.load %arg12[%c0_29, %c0_30] : memref<1x32xf32, #tpu.memory_space<vmem>>, vector<1x32xf32>
    %c0_31 = arith.constant 0 : index
    %c0_32 = arith.constant 0 : index
    %50 = vector.load %arg13[%c0_31, %c0_32] : memref<1x32xf32, #tpu.memory_space<vmem>>, vector<1x32xf32>
    %cst_33 = arith.constant dense<0.000000e+00> : vector<64xf32>
    %51 = vector.multi_reduction <add>, %48, %cst_33 [1] : vector<64x32xf32> to vector<64xf32>
    %52 = vector.shape_cast %51 : vector<64xf32> to vector<64x1xf32>
    %cst_34 = arith.constant 3.200000e+01 : f32
    %53 = vector.broadcast %cst_34 : f32 to vector<64x1xf32>
    %54 = arith.divf %52, %53 : vector<64x1xf32>
    %55 = arith.mulf %48, %48 : vector<64x32xf32>
    %cst_35 = arith.constant dense<0.000000e+00> : vector<64xf32>
    %56 = vector.multi_reduction <add>, %55, %cst_35 [1] : vector<64x32xf32> to vector<64xf32>
    %57 = vector.shape_cast %56 : vector<64xf32> to vector<64x1xf32>
    %cst_36 = arith.constant 3.200000e+01 : f32
    %58 = vector.broadcast %cst_36 : f32 to vector<64x1xf32>
    %59 = arith.divf %57, %58 : vector<64x1xf32>
    %60 = arith.mulf %54, %54 : vector<64x1xf32>
    %61 = arith.subf %59, %60 : vector<64x1xf32>
    %62 = vector.broadcast %54 : vector<64x1xf32> to vector<64x32xf32>
    %63 = arith.subf %48, %62 : vector<64x32xf32>
    %cst_37 = arith.constant 9.99999974E-6 : f32
    %64 = vector.broadcast %cst_37 : f32 to vector<64x1xf32>
    %65 = arith.addf %61, %64 : vector<64x1xf32>
    %66 = math.rsqrt %65 : vector<64x1xf32>
    %67 = vector.broadcast %66 : vector<64x1xf32> to vector<64x32xf32>
    %68 = arith.mulf %63, %67 : vector<64x32xf32>
    %69 = vector.broadcast %49 : vector<1x32xf32> to vector<64x32xf32>
    %70 = arith.mulf %68, %69 : vector<64x32xf32>
    %71 = vector.broadcast %50 : vector<1x32xf32> to vector<64x32xf32>
    %72 = arith.addf %70, %71 : vector<64x32xf32>
    %c0_38 = arith.constant 0 : index
    %c0_39 = arith.constant 0 : index
    %c0_40 = arith.constant 0 : index
    %73 = vector.load %arg14[%c0_38, %c0_39, %c0_40] : memref<1x64x32xf32, #tpu.memory_space<vmem>>, vector<1x64x32xf32>
    %74 = vector.shape_cast %73 : vector<1x64x32xf32> to vector<64x32xf32>
    %75 = vector.shape_cast %72 : vector<64x32xf32> to vector<1x64x32xf32>
    tpu.vector_store %arg14[%c0_38, %c0_39, %c0_40], %75 {strides = array<i32>} : memref<1x64x32xf32, #tpu.memory_space<vmem>>, vector<1x64x32xf32>,
    return
  }
  func.func @transform_0(%arg0: i32, %arg1: i32) -> (i32, i32, i32) {
    %c0_i32 = arith.constant 0 : i32
    %c0_i32_0 = arith.constant 0 : i32
    return %arg0, %arg1, %c0_i32 : i32, i32, i32
  }
  func.func @transform_1(%arg0: i32, %arg1: i32) -> (i32, i32, i32) {
    %c0_i32 = arith.constant 0 : i32
    %c0_i32_0 = arith.constant 0 : i32
    return %arg0, %arg1, %c0_i32 : i32, i32, i32
  }
  func.func @transform_2(%arg0: i32, %arg1: i32) -> (i32, i32) {
    %c0_i32 = arith.constant 0 : i32
    %c0_i32_0 = arith.constant 0 : i32
    %c0_i32_1 = arith.constant 0 : i32
    return %c0_i32, %c0_i32_0 : i32, i32
  }
  func.func @transform_3(%arg0: i32, %arg1: i32) -> (i32, i32) {
    %c0_i32 = arith.constant 0 : i32
    %c0_i32_0 = arith.constant 0 : i32
    %c0_i32_1 = arith.constant 0 : i32
    return %c0_i32, %c0_i32_0 : i32, i32
  }
  func.func @transform_4(%arg0: i32, %arg1: i32) -> (i32, i32) {
    %c0_i32 = arith.constant 0 : i32
    %c0_i32_0 = arith.constant 0 : i32
    %c0_i32_1 = arith.constant 0 : i32
    return %c0_i32, %c0_i32_0 : i32, i32
  }
  func.func @transform_5(%arg0: i32, %arg1: i32) -> (i32, i32) {
    %c0_i32 = arith.constant 0 : i32
    %c0_i32_0 = arith.constant 0 : i32
    %c0_i32_1 = arith.constant 0 : i32
    return %c0_i32, %c0_i32_0 : i32, i32
  }
  func.func @transform_6(%arg0: i32, %arg1: i32) -> (i32, i32) {
    %c0_i32 = arith.constant 0 : i32
    %c0_i32_0 = arith.constant 0 : i32
    %c0_i32_1 = arith.constant 0 : i32
    return %c0_i32, %c0_i32_0 : i32, i32
  }
  func.func @transform_7(%arg0: i32, %arg1: i32) -> (i32, i32) {
    %c0_i32 = arith.constant 0 : i32
    %c0_i32_0 = arith.constant 0 : i32
    %c0_i32_1 = arith.constant 0 : i32
    return %c0_i32, %c0_i32_0 : i32, i32
  }
  func.func @transform_8(%arg0: i32, %arg1: i32) -> (i32, i32) {
    %c0_i32 = arith.constant 0 : i32
    %c0_i32_0 = arith.constant 0 : i32
    %c0_i32_1 = arith.constant 0 : i32
    return %c0_i32, %c0_i32_0 : i32, i32
  }
  func.func @transform_9(%arg0: i32, %arg1: i32) -> (i32, i32) {
    %c0_i32 = arith.constant 0 : i32
    %c0_i32_0 = arith.constant 0 : i32
    %c0_i32_1 = arith.constant 0 : i32
    return %c0_i32, %c0_i32_0 : i32, i32
  }
  func.func @transform_10(%arg0: i32, %arg1: i32) -> (i32, i32) {
    %c0_i32 = arith.constant 0 : i32
    %c0_i32_0 = arith.constant 0 : i32
    %c0_i32_1 = arith.constant 0 : i32
    return %c0_i32, %c0_i32_0 : i32, i32
  }
  func.func @transform_11(%arg0: i32, %arg1: i32) -> (i32, i32) {
    %c0_i32 = arith.constant 0 : i32
    %c0_i32_0 = arith.constant 0 : i32
    %c0_i32_1 = arith.constant 0 : i32
    return %c0_i32, %c0_i32_0 : i32, i32
  }
  func.func @transform_12(%arg0: i32, %arg1: i32) -> (i32, i32, i32) {
    %c0_i32 = arith.constant 0 : i32
    %c0_i32_0 = arith.constant 0 : i32
    return %arg0, %arg1, %c0_i32 : i32, i32, i32
  }
}

</mosaic_0001>

<bundles_post_ra>
// kernel: deformable_transformer_encoder_forward.4
= control target key start
LH: loop header
LB: loop body
LE: loop exit
PB: predicated region body
PF: predicated region fallthrough
CT: control target
= control target key end

     0   :  { %s3335_s0 = inlined_call_operand.vmem [shape: f32[2,128,32], index: 0, kind: input, shape index: {}]   ;;  %s3336_s1 = inlined_call_operand.vmem [shape: f32[2,128,32], index: 1, kind: input, shape index: {}]   ;;  %s3337_s2 = inlined_call_operand.vmem [shape: f32[2,128,8], index: 2, kind: input, shape index: {}]   ;;  %s3338_s3 = inlined_call_operand.hbm [shape: bf16[32,32], index: 3, kind: input, shape index: {}]   ;;  %s3339_s4 = inlined_call_operand.hbm [shape: f32[1,32], index: 4, kind: input, shape index: {}]   ;;  %s3340_s5 = inlined_call_operand.hbm [shape: f32[8,32], index: 5, kind: input, shape index: {}]   ;;  %s3341_s6 = inlined_call_operand.hbm [shape: f32[1,32], index: 6, kind: input, shape index: {}]   ;;  %s3342_s7 = inlined_call_operand.hbm [shape: bf16[32,16], index: 7, kind: input, shape index: {}]   ;;  %s3343_s8 = inlined_call_operand.vmem [shape: f32[1,16], index: 8, kind: input, shape index: {}]   ;;  %s3344_s9 = inlined_call_operand.hbm [shape: bf16[32,32], index: 9, kind: input, shape index: {}]   ;;  %s3345_s10 = inlined_call_operand.vmem [shape: f32[1,32], index: 10, kind: input, shape index: {}]   ;;  %s3346_s11 = inlined_call_operand.vmem [shape: f32[2,128,32], index: 11, kind: output, shape index: {0}]   ;;  %s3347_s12 = inlined_call_operand.vmem [shape: f32[2,128,16], index: 12, kind: output, shape index: {1}]   ;;  %s3348_s13 = inlined_call_operand.vmem [shape: bf16[2,128,32], index: 13, kind: output, shape index: {2}]  }
   0x1   :  { %3353 = sst [smem:[#allocation18_spill]] %s3339_s4 }
   0x2   :  { %3354 = sst [smem:[#allocation19_spill]] %s3341_s6 }
   0x3   :  { %19 = vsyncpa [#allocation3], 0 }
   0x4   :  { %20 = vsyncpa [#allocation5], 0 }
   0x5   :  { %21 = vsyncpa [#allocation8], 0 }
   0x6   :  { %22 = vsyncpa [#allocation11], 0  ;;  %s2671_s25 = smov 0   ;;  %s2673_s26 = smov 0  }
   0x7   :  { %s2675_s27 = smov 0   ;;  %s2677_s28 = smov 0  }
   0x8   :  { %s2679_s29 = smov 0  }
   0x9 LB: > { %3355 = sst [smem:[#allocation16_spill]] %s2584_s28  ;;  %s2590_s30 = smov [#allocation4]   ;;  %s2588_s29 = sphi %s2679_s29, %s28_s29   ;;  %s2584_s28 = sphi %s2677_s28, %s3369_s28   ;;  %s2580_s27 = sphi %s2675_s27, %s3368_s27   ;;  %s2576_s26 = sphi %s2673_s26, %s3365_s26   ;;  %s2572_s25 = sphi %s2671_s25, %s3367_s25  }
   0xa   : > { %s407_s14 = sshll.u32 %s2590_s30, 4  ;;  %s1978_s15 = sadd.s32 4294967295, %s2588_s29   ;;  %s408_s14 = int_to_ptr.vmem [resolvable:$true] %s407_s14 }
   0xb   : > { %p1980_p0 = scmp.ge.s32.totalorder %s2588_s29, 1  ;;  %p381_p1 = scmp.lt.s32.totalorder %s2588_s29, 5 }
   0xc   : > { %p2699_p2 = scmp.eq.s32.totalorder %s1978_s15, 0  ;;  %s2591_s18 = smov [#allocation7]  }
   0xd   : > { %p2703_p3 = pnand %p1980_p0, %p381_p1  ;;  %s429_s19 = sshll.u32 %s2591_s18, 4  ;;  %s430_s19 = int_to_ptr.vmem [resolvable:$true] %s429_s19 }
   0xe   : > { %s3356_s16 = scalar_select %p2699_p2, 1, 0 }
   0xf   : > { %s3357_s17 = scalar_select %p2703_p3, 1, 0 }
  0x10   : > { %p2162_p4 = pneg %p2703_p3  ;;  %s2389_s22 = scalar_lea.vmem %s408_s14, 16 }
  0x11   : > { %p2390_p7 = scmp.ne.s32.totalorder %s408_s14, %s2389_s22  ;;  %s2396_s23 = scalar_lea.vmem %s408_s14, 32 }
  0x12   : > { %p2711_p5 = pnand %p2699_p2, %p2162_p4  ;;  %p2397_p10 = scmp.lt.s32.totalorder %s408_s14, %s408_s14 }
  0x13   : > { %p2398_p11 = scmp.lt.s32.totalorder %s2396_s23, %s2389_s22 }
  0x14   : > { %p2717_p6 = pneg %p2711_p5 }
  0x15   : > { %p2399_p12 = por %p2398_p11, %p2397_p10 }
  0x16   : > { %p2392_p8 = pnand %p2390_p7, %p2717_p6 }
  0x18   : > { %p2393_p9 = pneg %p2392_p8 }
  0x1a   : > { %p2400_p13 = pnand %p2399_p12, %p2393_p9 }
  0x1c   : > { %2403 = shalt.err (!%p2400_p13)
}
  0x1d   : > { %s3360_s4 = sld [smem:[#allocation18_spill]]  ;;  %s2415_s15 = scalar_lea.vmem %s430_s19, 16 }
  0x1e   : > { %p2416_p0 = scmp.ne.s32.totalorder %s430_s19, %s2415_s15  ;;  %s2422_s18 = scalar_lea.vmem %s430_s19, 32 }
  0x1f   : > { %p2423_p7 = scmp.lt.s32.totalorder %s430_s19, %s430_s19  ;;  %p2424_p8 = scmp.lt.s32.totalorder %s2422_s18, %s2415_s15 }
  0x20   : > { %p2418_p1 = pnand %p2416_p0, %p2717_p6 }
  0x21   : > { %p2425_p2 = por %p2424_p8, %p2423_p7 }
  0x22   : > { %p2419_p4 = pneg %p2418_p1 }
  0x23   : > { %2168 = dma.hbm_to_vmem [thread:$0]  (!%p2711_p5), %s3360_s4, 16, %s408_s14, [#allocation5]  }
  0x24   : > { %p2426_p3 = pnand %p2425_p2, %p2419_p4 }
  0x26   : > { %2429 = shalt.err (!%p2426_p3)
}
  0x27   : > { %s3361_s6 = sld [smem:[#allocation19_spill]]  ;;  %s37_s14 = sadd.s32 1, %s2580_s27 }
  0x28   : > { %p38_p9 = scmp.ge.s32.totalorder %s37_s14, 2  ;;  %s40_s24 = sadd.s32 1, %s2584_s28 }
  0x29   : > { %s2592_s30 = smov [#allocation2]  }
  0x2a   : > { %s3371_s14 = smov (%p38_p9, %s37_s14), 0  ;;  %s3373_s24 = smov (!%p38_p9, %s40_s24), %s2584_s28 }
  0x2b   : > { %3362 = sst [smem:[#allocation17_spill]] %s3371_s14  ;;  %s393_s15 = sshll.u32 %s2592_s30, 4  ;;  %s394_s15 = int_to_ptr.vmem [resolvable:$true] %s393_s15 }
  0x2c   : > { %p42_p2 = scmp.ge.s32.totalorder %s3373_s24, 2  ;;  %s2441_s18 = scalar_lea.vmem %s394_s15, 256 }
  0x2d   : > { %2174 = dma.hbm_to_vmem [thread:$0]  (!%p2711_p5), %s3361_s6, 16, %s430_s19, [#allocation8]  }
  0x2e   : > { %p2442_p3 = scmp.ne.s32.totalorder %s394_s15, %s2441_s18  ;;  %p2449_p12 = scmp.lt.s32.totalorder %s394_s15, %s394_s15 }
  0x2f   : > { %p2450_p13 = scmp.lt.s32.totalorder %s2441_s18, %s2441_s18 }
  0x30   : > { %p2444_p10 = pnand %p2442_p3, %p2717_p6 }
  0x31   : > { %p2451_p0 = por %p2450_p13, %p2449_p12 }
  0x32   : > { %p2445_p11 = pneg %p2444_p10 }
  0x34   : > { %p2452_p1 = pnand %p2451_p0, %p2445_p11 }
  0x36   : > { %2455 = shalt.err (!%p2452_p1)
}
  0x37   : > { %s2593_s19 = smov 64   ;;  %s2594_s22 = smov 4  }
  0x38   : > { %2165 = dma.hbm_to_vmem [thread:$0]  (!%p2711_p5), %s3338_s3, 256, %s394_s15, [#allocation3], %s2593_s19, %s2593_s19, %s2594_s22  }
  0x39   : > { %s3375_s24 = smov (%p42_p2, %s3373_s24), 0  ;;  %s2595_s4 = smov [#allocation6]  }
  0x3a   : > { %s418_s18 = sshll.u32 %s2595_s4, 4  ;;  %s2596_s6 = smov [#allocation9]   ;;  %s419_s18 = int_to_ptr.vmem [resolvable:$true] %s418_s18 }
  0x3b   : > { %s439_s14 = sshll.u32 %s2596_s6, 4  ;;  %s2467_s28 = scalar_lea.vmem %s419_s18, 128  ;;  %s440_s14 = int_to_ptr.vmem [resolvable:$true] %s439_s14 }
  0x3c   : > { %p2468_p4 = scmp.ne.s32.totalorder %s419_s18, %s2467_s28  ;;  %p2475_p9 = scmp.lt.s32.totalorder %s419_s18, %s419_s18 }
  0x3d   : > { %p2476_p3 = scmp.lt.s32.totalorder %s2467_s28, %s2467_s28 }
  0x3e   : > { %p2470_p7 = pnand %p2468_p4, %p2717_p6 }
  0x3f   : > { %p2477_p10 = por %p2476_p3, %p2475_p9 }
  0x40   : > { %p2471_p8 = pneg %p2470_p7 }
  0x42   : > { %p2478_p11 = pnand %p2477_p10, %p2471_p8 }
  0x44   : > { %2481 = shalt.err (!%p2478_p11)
}
  0x45   : > { %2171 = dma.hbm_to_vmem [thread:$0]  (!%p2711_p5), %s3340_s5, 128, %s419_s18, [#allocation5]  }
  0x46   : > { %s2493_s4 = scalar_lea.vmem %s440_s14, 256  ;;  %p2501_p0 = scmp.lt.s32.totalorder %s440_s14, %s440_s14 }
  0x47   : > { %p2494_p2 = scmp.ne.s32.totalorder %s440_s14, %s2493_s4  ;;  %p2502_p1 = scmp.lt.s32.totalorder %s2493_s4, %s2493_s4 }
  0x49   : > { %p2496_p12 = pnand %p2494_p2, %p2717_p6  ;;  %p2503_p4 = por %p2502_p1, %p2501_p0 }
  0x4b   : > { %p2497_p13 = pneg %p2496_p12 }
  0x4d   : > { %p2504_p7 = pnand %p2503_p4, %p2497_p13 }
  0x4f   : > { %2507 = shalt.err (!%p2504_p7)
}
  0x50   : > { %2177 = dma.hbm_to_vmem [thread:$0]  (!%p2711_p5), %s3342_s7, 256, %s440_s14, [#allocation8], %s2593_s19, %s2593_s19, %s2594_s22  }
  0x51   : > { %s2597_s30 = smov [#allocation10]  }
  0x52   : > { %s455_s18 = sshll.u32 %s2597_s30, 4  ;;  %s456_s18 = int_to_ptr.vmem [resolvable:$true] %s455_s18 }
  0x53   : > { %s2519_s15 = scalar_lea.vmem %s456_s18, 256  ;;  %p2527_p10 = scmp.lt.s32.totalorder %s456_s18, %s456_s18 }
  0x54   : > { %p2520_p8 = scmp.ne.s32.totalorder %s456_s18, %s2519_s15  ;;  %p2528_p11 = scmp.lt.s32.totalorder %s2519_s15, %s2519_s15 }
  0x56   : > { %p2522_p9 = pnand %p2520_p8, %p2717_p6  ;;  %p2529_p2 = por %p2528_p11, %p2527_p10 }
  0x58   : > { %p2523_p3 = pneg %p2522_p9 }
  0x5a   : > { %p2530_p12 = pnand %p2529_p2, %p2523_p3 }
  0x5c   : > { %2533 = shalt.err (!%p2530_p12)
}
  0x5d   : > { %2180 = dma.hbm_to_vmem [thread:$0]  (!%p2711_p5), %s3344_s9, 256, %s456_s18, [#allocation11], %s2593_s19, %s2593_s19, %s2594_s22  }
  0x5e   : > { %p3363_p13 = scmp.ne.s32.totalorder %s3357_s17, 0 }
  0x5f   : > { %p3364_p6 = scmp.ne.s32.totalorder (!%p3363_p13), %s3356_s16, 0 }
  0x60   : > { %513 = sbr.rel (%p3363_p13) target bundleno = 970 (0x3ca), region = 64 }
  0x65   : > { %2555 = dma.done.wait (%p3364_p6), [#allocation3], 256  }
  0x66   : > { %2557 = vsyncadd (%p3364_p6), [#allocation3], 4294967040 }
  0x67   : > { %2559 = dma.done.wait (%p3364_p6), [#allocation5], 144  }
  0x68   : > { %2561 = vsyncadd (%p3364_p6), [#allocation5], 4294967152 }
  0x69   : > { %2563 = dma.done.wait (%p3364_p6), [#allocation8], 272  }
  0x6a   : > { %2565 = vsyncadd (%p3364_p6), [#allocation8], 4294967024 }
  0x6b   : > { %2567 = dma.done.wait (%p3364_p6), [#allocation11], 256  }
  0x6c   : > { %2569 = vsyncadd (%p3364_p6), [#allocation11], 4294967040  ;;  %s1995_s17 = sshll.u32 %s2572_s25, 3  ;;  %p622_p5 = scmp.lt.s32.totalorder %s2576_s26, 1  ;;  %vm835_vm0 = vcmask 64512   ;;  %v819_v0 = vld [vmem:[#allocation6] sm:$0xff] }
  0x6d   : > { %p624_p0 = scmp.lt.s32.totalorder %s1995_s17, 15  ;;  %2100 = vmatprep.subr.mxu1 %v819_v0  ;;  %v2244_v2 = vld [vmem:[#allocation2 + $0x8] sm:$0xff]   ;;  %v2246_v6 = vld [vmem:[#allocation2] sm:$0xff]   ;;  %vm733_vm1 = vcmask 261120   ;;  %v2013_v47 = vld [vmem:[#allocation4] ss:$0 sm:$0xff] }
  0x6e   : > { %s3377_s26 = smov (!%p622_p5, %s2576_s26), 1  ;;  %2101 = vmatpush3.msra.mxu1 %v819_v0  ;;  %v2245_v4 = vld [vmem:[#allocation9 + $0x8] sm:$0xff]   ;;  %2088 = vmatprep.subr.bf16.mxu0 %v2244_v2  ;;  %v2247_v24 = vld [vmem:[#allocation9] sm:$0xff]   ;;  %v2020_v50 = vld [vmem:[#allocation7] ss:$0 sm:$0xff]  ;;  %vm1061_vm2 = vcmask 31744  }
  0x6f   : > { %s3379_s17 = smov (!%p624_p0, %s1995_s17), 15  ;;  %s1996_s20 = sshll.u32 %s3377_s26, 4  ;;  %2114 = vmatprep.subr.bf16.mxu1 %v2245_v4  ;;  %2089 = vmatpush3.bf16.msra.mxu0 %v2244_v2  ;;  %v2896_v62 = vld [vmem:[%s3343_s8] ss:$0 sm:$0xff]  ;;  %vm1150_vm3 = vcmask 64544   ;;  %vm1271_vm4 = vcmask 97344  }
  0x70   : > { %s2801_s21 = sadd.s32 %s1996_s20, %s3379_s17  ;;  %2090 = vmatprep.subr.bf16.mxu0 %v2246_v6  ;;  %vm1392_vm5 = vcmask 130144   ;;  %s2598_s16 = smov 124   ;;  %vm1683_vm6 = vcmask 257024   ;;  %vm1529_vm7 = vcmask 97280   ;;  %vm1538_vm8 = vcmask 130048  }
  0x71   : > { %s2804_s19 = sshll.u32 %s2801_s21, 3  ;;  %s2599_s22 = smov 120  }
  0x72   : > { %s2810_s4 = scalar_lea.vmem %s3337_s2, %s2804_s19  ;;  %s2818_s6 = scalar_lea.vmem %s3335_s0, %s2804_s19 }
  0x73   : > { %v811_v1 = vld [vmem:[%s2810_s4] sm:$0xff]  ;;  %v812_v3 = vld [vmem:[%s2810_s4 + $0x8] sm:$0xff]  ;;  %s2825_s18 = scalar_lea.vmem %s3336_s1, %s2804_s19  ;;  %v813_v5 = vld [vmem:[%s2810_s4 + $0x10] sm:$0xff]  ;;  %2091 = vmatpush3.bf16.msra.mxu0 %v2246_v6  ;;  %s2891_s14 = scalar_lea.vmem %s3346_s11, %s2804_s19 }
  0x74   : > { %2102 = vmatprep.mubr.msk.f32.mxu1 %vm835_vm0, %v811_v1  ;;  %v814_v7 = vld [vmem:[%s2810_s4 + $0x18] sm:$0xff]  ;;  %v682_v8 = vld [vmem:[%s2818_s6] sm:$0xff]  ;;  %v683_v9 = vld [vmem:[%s2818_s6 + $0x8] sm:$0xff]  ;;  %s3245_s23 = scalar_lea.vmem %s3347_s12, %s2804_s19 }
  0x75   : > { %2103 = vmatmul.mubr.msk.f32.vlgmr.msra.gmra.mxu1 %vm835_vm0, %v812_v3  ;;  %v690_v10 = vld [vmem:[%s2825_s18] sm:$0xff]  ;;  %v691_v11 = vld [vmem:[%s2825_s18 + $0x8] sm:$0xff]  ;;  %v2837_v15 = vld [vmem:[%s2818_s6 + $0x10] sm:$0xff]  ;;  %v1547_v42 = vpack.c.bf16 %v683_v9, %v682_v8 }
  0x76   : > { %2115 = vmatpush3.bf16.msra.mxu1 %v2245_v4  ;;  %2105 = vmatprep.mubr.msk.f32.mxu1 %vm835_vm0, %v813_v5  ;;  %v698_v12 = vadd.f32 %v690_v10, %v682_v8  ;;  %v699_v13 = vadd.f32 %v691_v11, %v683_v9  ;;  %v815_v14 = vld [vmem:[%s2810_s4 + $0x20] sm:$0xff]  ;;  %v2840_v16 = vld [vmem:[%s2818_s6 + $0x18] sm:$0xff]  ;;  %v692_v17 = vld [vmem:[%s2825_s18 + $0x10] sm:$0xff] }
  0x77   : > { %v693_v18 = vld [vmem:[%s2825_s18 + $0x18] sm:$0xff]  ;;  %v1548_v19 = vpack.c.bf16 %v2840_v16, %v2837_v15  ;;  %v816_v20 = vld [vmem:[%s2810_s4 + $0x28] sm:$0xff]  ;;  %v700_v22 = vadd.f32 %v692_v17, %v2837_v15  ;;  %v817_v25 = vld [vmem:[%s2810_s4 + $0x30] sm:$0xff]  ;;  %2116 = vmatprep.subr.bf16.mxu1 %v2247_v24 }
  0x78   : > { %v706_v21 = vpack.c.bf16 %v699_v13, %v698_v12  ;;  %v701_v23 = vadd.f32 %v693_v18, %v2840_v16  ;;  %v2853_v26 = vld [vmem:[%s2818_s6 + $0x20] sm:$0xff]  ;;  %v818_v28 = vld [vmem:[%s2810_s4 + $0x38] sm:$0xff]  ;;  %v2858_v29 = vld [vmem:[%s2818_s6 + $0x28] sm:$0xff]  ;;  %s2600_s4 = smov 116  }
  0x79   : > { %2106 = vmatmul.mubr.msk.f32.gmra.mxu1 %vm835_vm0, %v814_v7  ;;  %v694_v30 = vld [vmem:[%s2825_s18 + $0x20] sm:$0xff]  ;;  %v695_v31 = vld [vmem:[%s2825_s18 + $0x28] sm:$0xff]  ;;  %v2866_v34 = vld [vmem:[%s2818_s6 + $0x30] sm:$0xff] }
  0x7a   : > { %2108 = vmatprep.mubr.msk.f32.mxu1 %vm835_vm0, %v815_v14  ;;  %2092 = vmatprep.mubr.msk.bf16.mxu0 %vm733_vm1, %v706_v21  ;;  %v707_v27 = vpack.c.bf16 %v701_v23, %v700_v22  ;;  %v702_v32 = vadd.f32 %v694_v30, %v2853_v26  ;;  %v703_v33 = vadd.f32 %v695_v31, %v2858_v29  ;;  %v2869_v35 = vld [vmem:[%s2818_s6 + $0x38] sm:$0xff]  ;;  %v696_v36 = vld [vmem:[%s2825_s18 + $0x30] sm:$0xff]  ;;  %s2012_s6 = sshll.u32 %s2801_s21, 2 }
  0x7b   : > { %2117 = vmatpush3.bf16.msra.mxu1 %v2247_v24  ;;  %v697_v37 = vld [vmem:[%s2825_s18 + $0x38] sm:$0xff]  ;;  %v704_v38 = vadd.f32 %v696_v36, %v2866_v34  ;;  %s679_s18 = scalar_lea.vmem %s3348_s13, %s2012_s6 }
  0x7c   : > { %2093 = vmatmul.mubr.msk.bf16.vlgmr.msra.gmra.mxu0 %vm733_vm1, %v707_v27  ;;  %v708_v39 = vpack.c.bf16 %v703_v33, %v702_v32  ;;  %v705_v40 = vadd.f32 %v697_v37, %v2869_v35 }
  0x7d   : > { %2109 = vmatmul.mubr.msk.f32.gmra.mxu1 %vm835_vm0, %v816_v20 }
  0x7e   : > { %2111 = vmatprep.mubr.msk.f32.mxu1 %vm835_vm0, %v817_v25  ;;  %2096 = vmatprep.mubr.msk.bf16.mxu0 %vm733_vm1, %v708_v39  ;;  %v709_v41 = vpack.c.bf16 %v705_v40, %v704_v38 }
  0x81   : > { %2112 = vmatmul.mubr.msk.f32.gmra.mxu1 %vm835_vm0, %v818_v28 }
  0x82   : > { %2118 = vmatprep.mubr.msk.bf16.mxu1 %vm733_vm1, %v706_v21 }
  0x84   : > { %2097 = vmatmul.mubr.msk.bf16.gmra.mxu0 %vm733_vm1, %v709_v41 }
  0x85   : > { %2119 = vmatmul.mubr.msk.bf16.vlgmr.msra.gmra.mxu1 %vm733_vm1, %v707_v27  ;;  %2130 = vmatprep.mubr.msk.bf16.mxu0 %vm733_vm1, %v1547_v42 }
  0x86   : > { %2122 = vmatprep.mubr.msk.bf16.mxu1 %vm733_vm1, %v708_v39 }
  0x8d   : > { %2123 = vmatmul.mubr.msk.bf16.gmra.mxu1 %vm733_vm1, %v709_v41 }
 0x135   : > { %v2104_v43 = vpop.f32.mrf.mxu1 }
 0x137   : > { %v926_v44 = vpop.f32.mrf.mxu1 }
 0x139   : > { %v2107_v45 = vpop.f32.mrf.mxu1 }
 0x13b   : > { %v936_v46 = vpop.f32.mrf.mxu1 }
 0x13c   : > { %v2094_v49 = vpop.f32.mrf.mxu0 }
 0x13d   : > { %v2885_v48 = vpop.f32.mrf.mxu1  ;;  %v789_v51 = vadd.f32 %v2094_v49, %v2013_v47 }
 0x13e   : > { %v780_v53 = vpop.f32.mrf.mxu0 }
 0x13f   : > { %v946_v52 = vpop.f32.mrf.mxu1  ;;  %v829_v54 = vmul.f32 %v2020_v50, %v789_v51  ;;  %v781_v55 = vadd.f32 %v2013_v47, %v780_v53 }
 0x140   : > { %v2095_v57 = vpop.f32.mrf.mxu0 }
 0x141   : > { %v2113_v56 = vpop.f32.mrf.mxu1  ;;  %v937_v58 = vadd.f32 %v936_v46, %v829_v54  ;;  %v827_v59 = vmul.f32 %v2020_v50, %v781_v55  ;;  %v792_v60 = vadd.f32 %v2095_v57, %v2013_v47 }
 0x142   : > { %v783_v63 = vpop.f32.mrf.mxu0 }
 0x143   : > { %v956_v61 = vpop.f32.mrf.mxu1  ;;  %967 = vst.msk [vmem:[%s2891_s14 + $0x10] sm:$0xff] %vm733_vm1, %v937_v58  ;;  %v927_v0 = vadd.f32 %v926_v44, %v827_v59  ;;  %v830_v1 = vmul.f32 %v2020_v50, %v792_v60  ;;  %v784_v2 = vadd.f32 %v2013_v47, %v783_v63 }
 0x144   : > { %v2098_v4 = vpop.f32.mrf.mxu0 }
 0x145   : > { %v2120_v3 = vpop.f32.mrf.mxu1  ;;  %965 = vst.msk [vmem:[%s2891_s14] sm:$0xff] %vm733_vm1, %v927_v0  ;;  %v942_v6 = vadd.f32 %v2107_v45, %v830_v1  ;;  %v828_v7 = vmul.f32 %v2020_v50, %v784_v2  ;;  %v805_v8 = vadd.f32 %v2098_v4, %v2013_v47 }
 0x146   : > { %v2901_v5 = vadd.f32 %v2120_v3, %v2896_v62  ;;  %v796_v10 = vpop.f32.mrf.mxu0 }
 0x147   : > { %v1030_v9 = vpop.f32.mrf.mxu1  ;;  %968 = vst.msk [vmem:[%s2891_s14 + $0x18] sm:$0xff] %vm733_vm1, %v942_v6  ;;  %v932_v13 = vadd.f32 %v2104_v43, %v828_v7  ;;  %v833_v14 = vmul.f32 %v2020_v50, %v805_v8  ;;  %v797_v17 = vadd.f32 %v2013_v47, %v796_v10 }
 0x148   : > { %v2906_v11 = vadd.f32 %v2896_v62, %v1030_v9  ;;  %v1068_v12 = vsel %vm1061_vm2, %v2901_v5, -inf  ;;  %v2099_v20 = vpop.f32.mrf.mxu0  ;;  %v1157_v28 = vsel %vm1150_vm3, %v2901_v5, -inf  ;;  %v1278_v38 = vsel %vm1271_vm4, %v2901_v5, -inf }
 0x149   : > { %1069 = vmax.xlane.f32.xlu1 %v1068_v12  ;;  %v2121_v18 = vpop.f32.mrf.mxu1  ;;  %966 = vst.msk [vmem:[%s2891_s14 + $0x8] sm:$0xff] %vm733_vm1, %v932_v13  ;;  %v957_v23 = vadd.f32 %v956_v61, %v833_v14  ;;  %v831_v24 = vmul.f32 %v2020_v50, %v797_v17  ;;  %v808_v25 = vadd.f32 %v2099_v20, %v2013_v47  ;;  %v1399_v42 = vsel %vm1392_vm5, %v2901_v5, -inf }
 0x14a   : > { %v2913_v21 = vadd.f32 %v2121_v18, %v2896_v62  ;;  %v1062_v22 = vsel %vm1061_vm2, %v2906_v11, -inf  ;;  %v799_v27 = vpop.f32.mrf.mxu0  ;;  %v1151_v45 = vsel %vm1150_vm3, %v2906_v11, -inf }
 0x14b   : > { %1063 = vmax.xlane.f32.xlu0 %v1062_v22  ;;  %971 = vst.msk [vmem:[%s2891_s14 + $0x30] sm:$0xff] %vm733_vm1, %v957_v23  ;;  %v947_v30 = vadd.f32 %v946_v52, %v831_v24  ;;  %v834_v31 = vmul.f32 %v2020_v50, %v808_v25  ;;  %v800_v32 = vadd.f32 %v2013_v47, %v799_v27  ;;  %v1033_v41 = vpop.f32.mrf.mxu1  ;;  %v1272_v47 = vsel %vm1271_vm4, %v2906_v11, -inf }
 0x14c   : > { %v1160_v33 = vsel %vm1150_vm3, %v2913_v21, -inf  ;;  %v1281_v40 = vsel %vm1271_vm4, %v2913_v21, -inf  ;;  %v2939_v43 = vadd.f32 %v2896_v62, %v1033_v41  ;;  %v1402_v44 = vsel %vm1392_vm5, %v2913_v21, -inf }
 0x14d   : > { %1158 = vmax.xlane.f32.xlu1 %v1157_v28  ;;  %969 = vst.msk [vmem:[%s2891_s14 + $0x20] sm:$0xff] %vm733_vm1, %v947_v30  ;;  %v962_v36 = vadd.f32 %v2113_v56, %v834_v31  ;;  %v832_v37 = vmul.f32 %v2020_v50, %v800_v32  ;;  %v2124_v49 = vpop.f32.mrf.mxu1  ;;  %v1393_v50 = vsel %vm1392_vm5, %v2906_v11, -inf  ;;  %v1071_v53 = vsel %vm1061_vm2, %v2913_v21, -inf }
 0x14e   : > { %v1065_v46 = vsel %vm1061_vm2, %v2939_v43, -inf  ;;  %v1275_v51 = vsel %vm1271_vm4, %v2939_v43, -inf  ;;  %v2956_v52 = vadd.f32 %v2124_v49, %v2896_v62  ;;  %v1396_v55 = vsel %vm1392_vm5, %v2939_v43, -inf }
 0x14f   : > { %1161 = vmax.xlane.f32.xlu0 %v1160_v33  ;;  %972 = vst.msk [vmem:[%s2891_s14 + $0x38] sm:$0xff] %vm733_vm1, %v962_v36  ;;  %v952_v39 = vadd.f32 %v2885_v48, %v832_v37  ;;  %v1154_v48 = vsel %vm1150_vm3, %v2939_v43, -inf  ;;  %v1046_v54 = vpop.f32.mrf.mxu1 }
 0x150   : > { %v1169_v56 = vsel %vm1150_vm3, %v2956_v52, -inf  ;;  %v2965_v57 = vadd.f32 %v2896_v62, %v1046_v54  ;;  %v1080_v58 = vsel %vm1061_vm2, %v2956_v52, -inf  ;;  %v1290_v60 = vsel %vm1271_vm4, %v2956_v52, -inf }
 0x151   : > { %1279 = vmax.xlane.f32.xlu1 %v1278_v38  ;;  %970 = vst.msk [vmem:[%s2891_s14 + $0x28] sm:$0xff] %vm733_vm1, %v952_v39  ;;  %v2125_v59 = vpop.f32.mrf.mxu1  ;;  %v1411_v0 = vsel %vm1392_vm5, %v2956_v52, -inf }
 0x152   : > { %v2972_v61 = vadd.f32 %v2125_v59, %v2896_v62  ;;  %v1074_v63 = vsel %vm1061_vm2, %v2965_v57, -inf  ;;  %v1163_v2 = vsel %vm1150_vm3, %v2965_v57, -inf  ;;  %v1284_v6 = vsel %vm1271_vm4, %v2965_v57, -inf }
 0x153   : > { %1282 = vmax.xlane.f32.xlu0 %v1281_v40  ;;  %v1049_v4 = vpop.f32.mrf.mxu1  ;;  %v1405_v9 = vsel %vm1392_vm5, %v2965_v57, -inf }
 0x154   : > { %v1172_v1 = vsel %vm1150_vm3, %v2972_v61, -inf  ;;  %v1293_v3 = vsel %vm1271_vm4, %v2972_v61, -inf  ;;  %v2987_v7 = vadd.f32 %v2896_v62, %v1049_v4  ;;  %v1414_v8 = vsel %vm1392_vm5, %v2972_v61, -inf }
 0x155   : > { %1400 = vmax.xlane.f32.xlu1 %v1399_v42  ;;  %v1083_v12 = vsel %vm1061_vm2, %v2972_v61, -inf }
 0x156   : > { %v1166_v10 = vsel %vm1150_vm3, %v2987_v7, -inf  ;;  %v1287_v62 = vsel %vm1271_vm4, %v2987_v7, -inf  ;;  %v1077_v13 = vsel %vm1061_vm2, %v2987_v7, -inf  ;;  %v1408_v14 = vsel %vm1392_vm5, %v2987_v7, -inf }
 0x157   : > { %1403 = vmax.xlane.f32.xlu0 %v1402_v44 }
 0x159   : > { %1152 = vmax.xlane.f32.xlu1 %v1151_v45 }
 0x15b   : > { %1066 = vmax.xlane.f32.xlu0 %v1065_v46 }
 0x15d   : > { %1273 = vmax.xlane.f32.xlu1 %v1272_v47 }
 0x15f   : > { %1155 = vmax.xlane.f32.xlu0 %v1154_v48 }
 0x161   : > { %1394 = vmax.xlane.f32.xlu1 %v1393_v50 }
 0x163   : > { %1276 = vmax.xlane.f32.xlu0 %v1275_v51 }
 0x165   : > { %1072 = vmax.xlane.f32.xlu1 %v1071_v53 }
 0x167   : > { %1397 = vmax.xlane.f32.xlu0 %v1396_v55 }
 0x169   : > { %1170 = vmax.xlane.f32.xlu1 %v1169_v56 }
 0x16b   : > { %1081 = vmax.xlane.f32.xlu0 %v1080_v58 }
 0x16d   : > { %1291 = vmax.xlane.f32.xlu1 %v1290_v60 }
 0x16f   : > { %1075 = vmax.xlane.f32.xlu0 %v1074_v63 }
 0x171   : > { %1412 = vmax.xlane.f32.xlu1 %v1411_v0 }
 0x173   : > { %1173 = vmax.xlane.f32.xlu0 %v1172_v1 }
 0x175   : > { %1164 = vmax.xlane.f32.xlu1 %v1163_v2 }
 0x177   : > { %1294 = vmax.xlane.f32.xlu0 %v1293_v3 }
 0x179   : > { %1285 = vmax.xlane.f32.xlu1 %v1284_v6 }
 0x17b   : > { %1415 = vmax.xlane.f32.xlu0 %v1414_v8 }
 0x17d   : > { %1406 = vmax.xlane.f32.xlu1 %v1405_v9 }
 0x17f   : > { %1167 = vmax.xlane.f32.xlu0 %v1166_v10 }
 0x181   : > { %1084 = vmax.xlane.f32.xlu1 %v1083_v12 }
 0x183   : > { %1288 = vmax.xlane.f32.xlu0 %v1287_v62 }
 0x185   : > { %1078 = vmax.xlane.f32.xlu1 %v1077_v13 }
 0x187   : > { %1409 = vmax.xlane.f32.xlu0 %v1408_v14 }
 0x1d2   : > { %v1070_v17 = vpop.xlane.xlu1 %1069 }
 0x1d3   : > { %v1088_v53 = vsub.f32 %v2901_v5, %v1070_v17 }
 0x1d4   : > { %v3003_v18 = vpop.xlane.xlu0 %1063 }
 0x1d5   : > { %v1098_v55 = vmul.f32 1.442695, %v1088_v53 }
 0x1d6   : > { %v1159_v20 = vpop.xlane.xlu1 %1158 }
 0x1d7   : > { %v1177_v22 = vsub.f32 %v2901_v5, %v1159_v20 }
 0x1d8   : > { %v1162_v23 = vpop.xlane.xlu0 %1161 }
 0x1d9   : > { %v1187_v24 = vmul.f32 1.442695, %v1177_v22  ;;  %v1178_v25 = vsub.f32 %v2913_v21, %v1162_v23 }
 0x1da   : > { %v1280_v27 = vpop.xlane.xlu1 %1279 }
 0x1db   : > { %2250 = vpow2.f32 %v1187_v24  ;;  %v1189_v28 = vmul.f32 1.442695, %v1178_v25  ;;  %v1298_v30 = vsub.f32 %v2901_v5, %v1280_v27 }
 0x1dc   : > { %v1283_v31 = vpop.xlane.xlu0 %1282 }
 0x1dd   : > { %v1308_v32 = vmul.f32 1.442695, %v1298_v30  ;;  %v1299_v33 = vsub.f32 %v2913_v21, %v1283_v31  ;;  %2252 = vpow2.f32 %v1189_v28  ;;  %v1086_v31 = vsub.f32 %v2906_v11, %v3003_v18 }
 0x1de   : > { %v1401_v36 = vpop.xlane.xlu1 %1400 }
 0x1df   : > { %2254 = vpow2.f32 %v1308_v32  ;;  %v1310_v37 = vmul.f32 1.442695, %v1299_v33  ;;  %v1419_v38 = vsub.f32 %v2901_v5, %v1401_v36  ;;  %v1094_v32 = vmul.f32 1.442695, %v1086_v31 }
 0x1e0   : > { %v1404_v39 = vpop.xlane.xlu0 %1403 }
 0x1e1   : > { %v1429_v40 = vmul.f32 1.442695, %v1419_v38  ;;  %v1420_v41 = vsub.f32 %v2913_v21, %v1404_v39  ;;  %2256 = vpow2.f32 %v1310_v37 }
 0x1e2   : > { %v1153_v46 = vpop.xlane.xlu1 %1152 }
 0x1e3   : > { %2258 = vpow2.f32 %v1429_v40  ;;  %v1431_v42 = vmul.f32 1.442695, %v1420_v41  ;;  %v1175_v2 = vsub.f32 %v2906_v11, %v1153_v46 }
 0x1e4   : > { %v1067_v60 = vpop.xlane.xlu0 %1066 }
 0x1e5   : > { %2260 = vpow2.f32 %v1431_v42  ;;  %v1183_v4 = vmul.f32 1.442695, %v1175_v2  ;;  %v1087_v33 = vsub.f32 %v2939_v43, %v1067_v60 }
 0x1e6   : > { %v1274_v50 = vpop.xlane.xlu1 %1273  ;;  %2262 = vpow2.f32 %v1098_v55 }
 0x1e7   : > { %v1296_v5 = vsub.f32 %v2906_v11, %v1274_v50  ;;  %v1096_v37 = vmul.f32 1.442695, %v1087_v33 }
 0x1e8   : > { %v3011_v44 = vpop.eup %2250  ;;  %v1156_v0 = vpop.xlane.xlu0 %1155 }
 0x1e9   : > { %1211 = vrot.lane.b32.xlu1 %v3011_v44, %s2598_s16  ;;  %v1176_v6 = vsub.f32 %v2939_v43, %v1156_v0 }
 0x1ea   : > { %v3015_v45 = vpop.eup %2252  ;;  %v1395_v54 = vpop.xlane.xlu1 %1394 }
 0x1eb   : > { %v1417_v9 = vsub.f32 %v2906_v11, %v1395_v54  ;;  %v1185_v10 = vmul.f32 1.442695, %v1176_v6 }
 0x1ec   : > { %v3017_v47 = vpop.eup %2254  ;;  %v1277_v3 = vpop.xlane.xlu0 %1276 }
 0x1ed   : > { %1332 = vrot.lane.b32.xlu0 %v3017_v47, %s2599_s22  ;;  %1213 = vrot.lane.b32.xlu1 %v3015_v45, %s2598_s16  ;;  %v1297_v12 = vsub.f32 %v2939_v43, %v1277_v3  ;;  %v1425_v14 = vmul.f32 1.442695, %v1417_v9 }
 0x1ee   : > { %v3023_v48 = vpop.eup %2256  ;;  %v1073_v56 = vpop.xlane.xlu1 %1072 }
 0x1ef   : > { %v1089_v58 = vsub.f32 %v2913_v21, %v1073_v56  ;;  %v1304_v21 = vmul.f32 1.442695, %v1296_v5  ;;  %v1306_v17 = vmul.f32 1.442695, %v1297_v12  ;;  %v2248_v12 = vld [vmem:[#allocation10 + $0x8] sm:$0xff]  }
 0x1f0   : > { %v3025_v49 = vpop.eup %2258  ;;  %v1398_v13 = vpop.xlane.xlu0 %1397  ;;  %2126 = vmatprep.subr.bf16.mxu0 %v2248_v12 }
 0x1f1   : > { %1453 = vrot.lane.b32.xlu0 %v3025_v49, %s2600_s4  ;;  %1334 = vrot.lane.b32.xlu1 %v3023_v48, %s2599_s22  ;;  %v1100_v59 = vmul.f32 1.442695, %v1089_v58  ;;  %v1418_v20 = vsub.f32 %v2939_v43, %v1398_v13 }
 0x1f2   : > { %v3031_v51 = vpop.eup %2260  ;;  %v1171_v39 = vpop.xlane.xlu1 %1170  ;;  %2127 = vmatpush3.bf16.msra.mxu0 %v2248_v12 }
 0x1f3   : > { %2264 = vpow2.f32 %v1100_v59  ;;  %v3037_v63 = vpop.eup %2262  ;;  %v1427_v22 = vmul.f32 1.442695, %v1418_v20  ;;  %v1181_v50 = vsub.f32 %v2956_v52, %v1171_v39  ;;  %v1550_v39 = vpack.c.bf16 %v2869_v35, %v2866_v34 }
 0x1f4   : > { %v1116_v1 = vsel %vm1061_vm2, %v3037_v63, 0.0  ;;  %2266 = vpow2.f32 %v1183_v4  ;;  %v1082_v36 = vpop.xlane.xlu0 %1081 }
 0x1f5   : > { %1455 = vrot.lane.b32.xlu1 %v3031_v51, %s2600_s4  ;;  %2268 = vpow2.f32 %v1304_v21  ;;  %v1195_v43 = vmul.f32 1.442695, %v1181_v50  ;;  %v1092_v31 = vsub.f32 %v2956_v52, %v1082_v36 }
 0x1f6   : > { %2270 = vpow2.f32 %v1185_v10  ;;  %v1292_v42 = vpop.xlane.xlu1 %1291 }
 0x1f7   : > { %2272 = vpow2.f32 %v1425_v14  ;;  %v1302_v11 = vsub.f32 %v2956_v52, %v1292_v42  ;;  %v1106_v33 = vmul.f32 1.442695, %v1092_v31 }
 0x1f8   : > { %2274 = vpow2.f32 %v1306_v17  ;;  %v3078_v38 = vpop.xlane.xlu0 %1075  ;;  %v2249_v17 = vld [vmem:[#allocation10] sm:$0xff]  }
 0x1f9   : > { %2276 = vpow2.f32 %v1427_v22  ;;  %v1316_v56 = vmul.f32 1.442695, %v1302_v11  ;;  %2128 = vmatprep.subr.bf16.mxu0 %v2249_v17  ;;  %v1549_v22 = vpack.c.bf16 %v2858_v29, %v2853_v26 }
 0x1fa   : > { %2278 = vpow2.f32 %v1094_v32  ;;  %v1413_v53 = vpop.xlane.xlu1 %1412  ;;  %2129 = vmatpush3.bf16.msra.mxu0 %v2249_v17 }
 0x1fb   : > { %2280 = vpow2.f32 %v1096_v37  ;;  %v1423_v58 = vsub.f32 %v2956_v52, %v1413_v53 }
 0x1fc   : > { %v1174_v41 = vpop.xlane.xlu0 %1173  ;;  %2282 = vpow2.f32 %v1195_v43 }
 0x1fd   : > { %v1182_v54 = vsub.f32 %v2972_v61, %v1174_v41  ;;  %2284 = vpow2.f32 %v1316_v56  ;;  %v1437_v2 = vmul.f32 1.442695, %v1423_v58  ;;  %2131 = vmatmul.mubr.msk.bf16.vlgmr.msra.gmra.mxu0 %vm733_vm1, %v1548_v19 }
 0x1fe   : > { %v1165_v9 = vpop.xlane.xlu1 %1164  ;;  %2134 = vmatprep.mubr.msk.bf16.mxu0 %vm733_vm1, %v1549_v22 }
 0x1ff   : > { %v1197_v59 = vmul.f32 1.442695, %v1182_v54  ;;  %v1179_v16 = vsub.f32 %v2965_v57, %v1165_v9 }
 0x200   : > { %v3044_v8 = vpop.eup %2264  ;;  %v1295_v18 = vpop.xlane.xlu0 %1294 }
 0x201   : > { %v1119_v62 = vsel %vm1061_vm2, %v3044_v8, 0.0  ;;  %v3051_v23 = vpop.eup %2266  ;;  %v1303_v60 = vsub.f32 %v2972_v61, %v1295_v18  ;;  %2286 = vpow2.f32 %v1197_v59  ;;  %v1191_v34 = vmul.f32 1.442695, %v1179_v16 }
 0x202   : > { %v3055_v24 = vpop.eup %2268  ;;  %2288 = vpow2.f32 %v1437_v2  ;;  %v1286_v14 = vpop.xlane.xlu1 %1285 }
 0x203   : > { %v3057_v25 = vpop.eup %2270  ;;  %v1318_v5 = vmul.f32 1.442695, %v1303_v60  ;;  %v1300_v19 = vsub.f32 %v2965_v57, %v1286_v14 }
 0x204   : > { %v3063_v27 = vpop.eup %2272 }
 0x205   : > { %v3065_v28 = vpop.eup %2274  ;;  %2290 = vpow2.f32 %v1318_v5  ;;  %2135 = vmatmul.mubr.msk.bf16.gmra.mxu0 %vm733_vm1, %v1550_v39  ;;  %v1312_v42 = vmul.f32 1.442695, %v1300_v19 }
 0x206   : > { %v3071_v30 = vpop.eup %2276  ;;  %v1407_v32 = vpop.xlane.xlu1 %1406 }
 0x207   : > { %v3080_v40 = vpop.eup %2278 }
 0x208   : > { %v1110_v46 = vsel %vm1061_vm2, %v3080_v40, 0.0  ;;  %v3087_v55 = vpop.eup %2280 }
 0x209   : > { %v1113_v0 = vsel %vm1061_vm2, %v3087_v55, 0.0  ;;  %v3094_v6 = vpop.eup %2282 }
 0x20a   : > { %v3098_v21 = vpop.eup %2284  ;;  %v1085_v37 = vpop.xlane.xlu1 %1084 }
 0x20b   : > { %v1093_v41 = vsub.f32 %v2972_v61, %v1085_v37 }
 0x20d   : > { %v1108_v26 = vmul.f32 1.442695, %v1093_v41 }
 0x20e   : > { %v3100_v10 = vpop.eup %2286 }
 0x210   : > { %1117 = vadd.xlane.f32.xlu0 %v1116_v1  ;;  %v1416_v1 = vpop.xlane.xlu0 %1415 }
 0x211   : > { %v1424_v3 = vsub.f32 %v2972_v61, %v1416_v1 }
 0x213   : > { %v1439_v4 = vmul.f32 1.442695, %v1424_v3  ;;  %v1090_v3 = vsub.f32 %v2965_v57, %v3078_v38 }
 0x214   : > { %v1168_v52 = vpop.xlane.xlu0 %1167 }
 0x215   : > { %2292 = vpow2.f32 %v1439_v4  ;;  %v1180_v35 = vsub.f32 %v2987_v7, %v1168_v52  ;;  %v1079_v4 = vpop.xlane.xlu1 %1078  ;;  %v1102_v9 = vmul.f32 1.442695, %v1090_v3 }
 0x216   : > { %2294 = vpow2.f32 %v1106_v33  ;;  %v1091_v14 = vsub.f32 %v2987_v7, %v1079_v4 }
 0x217   : > { %2296 = vpow2.f32 %v1108_v26  ;;  %v1193_v50 = vmul.f32 1.442695, %v1180_v35 }
 0x218   : > { %v1289_v36 = vpop.xlane.xlu0 %1288  ;;  %2298 = vpow2.f32 %v1191_v34  ;;  %v1104_v22 = vmul.f32 1.442695, %v1091_v14 }
 0x219   : > { %1120 = vadd.xlane.f32.xlu1 %v1119_v62  ;;  %v3106_v62 = vpop.eup %2288  ;;  %v1301_v11 = vsub.f32 %v2987_v7, %v1289_v36  ;;  %2300 = vpow2.f32 %v1312_v42 }
 0x21a   : > { %v3108_v13 = vpop.eup %2290  ;;  %2302 = vpow2.f32 %v1193_v50 }
 0x21b   : > { %v1314_v54 = vmul.f32 1.442695, %v1301_v11 }
 0x21c   : > { %v1410_v43 = vpop.xlane.xlu0 %1409 }
 0x21d   : > { %v1422_v56 = vsub.f32 %v2987_v7, %v1410_v43 }
 0x21f   : > { %v1435_v58 = vmul.f32 1.442695, %v1422_v56 }
 0x222   : > { %v3114_v20 = vpop.eup %2292 }
 0x223   : > { %v3130_v29 = vpop.eup %2294 }
 0x224   : > { %v1128_v15 = vsel %vm1061_vm2, %v3130_v29, 0.0  ;;  %v3137_v61 = vpop.eup %2296 }
 0x225   : > { %v1131_v18 = vsel %vm1061_vm2, %v3137_v61, 0.0  ;;  %v3144_v59 = vpop.eup %2298 }
 0x226   : > { %1207 = vrot.lane.b32.xlu0 %v3051_v23, %s2598_s16  ;;  %v3148_v60 = vpop.eup %2300 }
 0x22a   : > { %1328 = vrot.lane.b32.xlu0 %v3055_v24, %s2599_s22  ;;  %1209 = vrot.lane.b32.xlu1 %v3057_v25, %s2598_s16 }
 0x22e   : > { %1449 = vrot.lane.b32.xlu0 %v3063_v27, %s2600_s4  ;;  %1330 = vrot.lane.b32.xlu1 %v3065_v28, %s2599_s22 }
 0x232   : > { %1451 = vrot.lane.b32.xlu1 %v3071_v30, %s2600_s4 }
 0x24d   : > { %1111 = vadd.xlane.f32.xlu0 %v1110_v46  ;;  %v1421_v46 = vsub.f32 %v2965_v57, %v1407_v32 }
 0x24f   : > { %v1433_v53 = vmul.f32 1.442695, %v1421_v46 }
 0x251   : > { %2304 = vpow2.f32 %v1433_v53 }
 0x252   : > { %2306 = vpow2.f32 %v1314_v54 }
 0x253   : > { %2308 = vpow2.f32 %v1435_v58 }
 0x254   : > { %2310 = vpow2.f32 %v1102_v9 }
 0x255   : > { %2312 = vpow2.f32 %v1104_v22 }
 0x256   : > { %1114 = vadd.xlane.f32.xlu1 %v1113_v0  ;;  %v3150_v0 = vpop.eup %2302 }
 0x25b   : > { %v1212_v12 = vpop.permute.xlu1 %1211 }
 0x25c   : > { %v1237_v26 = vsel %vm1061_vm2, %v1212_v12, 0.0 }
 0x25e   : > { %v3156_v1 = vpop.eup %2304 }
 0x25f   : > { %v3158_v2 = vpop.eup %2306  ;;  %v1214_v17 = vpop.permute.xlu1 %1213 }
 0x260   : > { %v3164_v5 = vpop.eup %2308  ;;  %v1333_v31 = vpop.permute.xlu0 %1332  ;;  %v1240_v9 = vsel %vm1061_vm2, %v1214_v17, 0.0 }
 0x261   : > { %v3171_v37 = vpop.eup %2310 }
 0x262   : > { %v1122_v57 = vsel %vm1061_vm2, %v3171_v37, 0.0  ;;  %v3180_v52 = vpop.eup %2312 }
 0x263   : > { %1219 = vrot.lane.b32.xlu0 %v3094_v6, %s2598_s16  ;;  %v1335_v32 = vpop.permute.xlu1 %1334  ;;  %v1125_v19 = vsel %vm1061_vm2, %v3180_v52, 0.0 }
 0x264   : > { %v1454_v33 = vpop.permute.xlu0 %1453  ;;  %v1361_v35 = vsel %vm1061_vm2, %v1335_v32, 0.0 }
 0x265   : > { %v1479_v34 = vsel %vm1061_vm2, %v1454_v33, 0.0 }
 0x267   : > { %1340 = vrot.lane.b32.xlu0 %v3098_v21, %s2599_s22  ;;  %1221 = vrot.lane.b32.xlu1 %v3100_v10, %s2598_s16  ;;  %v1456_v39 = vpop.permute.xlu1 %1455 }
 0x268   : > { %v1482_v11 = vsel %vm1061_vm2, %v1456_v39, 0.0 }
 0x26b   : > { %1461 = vrot.lane.b32.xlu0 %v3106_v62, %s2600_s4  ;;  %1342 = vrot.lane.b32.xlu1 %v3108_v13, %s2599_s22 }
 0x26f   : > { %1463 = vrot.lane.b32.xlu1 %v3114_v20, %s2600_s4 }
 0x28a   : > { %1129 = vadd.xlane.f32.xlu0 %v1128_v15  ;;  %v1358_v15 = vsel %vm1061_vm2, %v1333_v31, 0.0 }
 0x293   : > { %1132 = vadd.xlane.f32.xlu1 %v1131_v18 }
 0x299   : > { %v3173_v41 = vpop.xlane.xlu0 %1117 }
 0x29d   : > { %v1208_v7 = vpop.permute.xlu0 %1207 }
 0x29e   : > { %v1231_v46 = vsel %vm1061_vm2, %v1208_v7, 0.0 }
 0x2a0   : > { %1215 = vrot.lane.b32.xlu0 %v3144_v59, %s2598_s16 }
 0x2a1   : > { %v1329_v36 = vpop.permute.xlu0 %1328 }
 0x2a2   : > { %v3177_v38 = vpop.xlane.xlu1 %1120  ;;  %v1352_v18 = vsel %vm1061_vm2, %v1329_v36, 0.0 }
 0x2a4   : > { %1336 = vrot.lane.b32.xlu0 %v3148_v60, %s2599_s22  ;;  %1217 = vrot.lane.b32.xlu1 %v3150_v0, %s2598_s16 }
 0x2a5   : > { %v1450_v50 = vpop.permute.xlu0 %1449 }
 0x2a6   : > { %v1210_v16 = vpop.permute.xlu1 %1209  ;;  %v1473_v56 = vsel %vm1061_vm2, %v1450_v50, 0.0 }
 0x2a7   : > { %v1234_v54 = vsel %vm1061_vm2, %v1210_v16, 0.0 }
 0x2a8   : > { %1457 = vrot.lane.b32.xlu0 %v3156_v1, %s2600_s4  ;;  %1338 = vrot.lane.b32.xlu1 %v3158_v2, %s2599_s22 }
 0x2aa   : > { %v1331_v42 = vpop.permute.xlu1 %1330 }
 0x2ab   : > { %v1355_v3 = vsel %vm1061_vm2, %v1331_v42, 0.0 }
 0x2ac   : > { %1459 = vrot.lane.b32.xlu1 %v3164_v5, %s2600_s4 }
 0x2ae   : > { %v1452_v43 = vpop.permute.xlu1 %1451 }
 0x2af   : > { %v1476_v14 = vsel %vm1061_vm2, %v1452_v43, 0.0 }
 0x2c7   : > { %1123 = vadd.xlane.f32.xlu0 %v1122_v57 }
 0x2cb   : > { %1238 = vadd.xlane.f32.xlu0 %v1237_v26 }
 0x2cf   : > { %1359 = vadd.xlane.f32.xlu0 %v1358_v15 }
 0x2d0   : > { %1126 = vadd.xlane.f32.xlu1 %v1125_v19 }
 0x2d3   : > { %1480 = vadd.xlane.f32.xlu0 %v1479_v34 }
 0x2d4   : > { %1362 = vadd.xlane.f32.xlu1 %v1361_v35 }
 0x2d6   : > { %v3190_v53 = vpop.xlane.xlu0 %1111 }
 0x2d7   : > { %1232 = vadd.xlane.f32.xlu0 %v1231_v46 }
 0x2d8   : > { %1483 = vadd.xlane.f32.xlu1 %v1482_v11 }
 0x2da   : > { %v1220_v4 = vpop.permute.xlu0 %1219 }
 0x2db   : > { %1353 = vadd.xlane.f32.xlu0 %v1352_v18  ;;  %v1249_v22 = vsel %vm1061_vm2, %v1220_v4, 0.0  ;;  %v2132_v4 = vpop.f32.mrf.mxu0 }
 0x2dc   : > { %1235 = vadd.xlane.f32.xlu1 %v1234_v54 }
 0x2de   : > { %v1341_v31 = vpop.permute.xlu0 %1340 }
 0x2df   : > { %v3194_v58 = vpop.xlane.xlu1 %1114  ;;  %1474 = vadd.xlane.f32.xlu0 %v1473_v56  ;;  %v1370_v39 = vsel %vm1061_vm2, %v1341_v31, 0.0 }
 0x2e0   : > { %1356 = vadd.xlane.f32.xlu1 %v1355_v3 }
 0x2e2   : > { %v1462_v17 = vpop.permute.xlu0 %1461 }
 0x2e3   : > { %v1222_v12 = vpop.permute.xlu1 %1221  ;;  %1241 = vadd.xlane.f32.xlu0 %v1240_v9  ;;  %v1491_v18 = vsel %vm1061_vm2, %v1462_v17, 0.0  ;;  %v1620_v9 = vpop.f32.mrf.mxu0 }
 0x2e4   : > { %1477 = vadd.xlane.f32.xlu1 %v1476_v14  ;;  %v1252_v32 = vsel %vm1061_vm2, %v1222_v12, 0.0  ;;  %v2036_v14 = vld [vmem:[%s3345_s10] ss:$0 sm:$0xff] }
 0x2e5   : > { %v2133_v12 = vpop.f32.mrf.mxu0  ;;  %v1621_v31 = vadd.f32 %v2036_v14, %v1620_v9 }
 0x2e7   : > { %1250 = vadd.xlane.f32.xlu0 %v1249_v22  ;;  %v1343_v33 = vpop.permute.xlu1 %1342  ;;  %v1629_v22 = vadd.f32 %v2132_v4, %v2036_v14  ;;  %v2053_v17 = vpack.c.bf16 %v1621_v31, %v1621_v31 }
 0x2e8   : > { %1253 = vadd.xlane.f32.xlu1 %v1252_v32  ;;  %v1373_v57 = vsel %vm1061_vm2, %v1343_v33, 0.0  ;;  %v1632_v32 = vadd.f32 %v2133_v12, %v2036_v14  ;;  %v1623_v33 = vpop.f32.mrf.mxu0 }
 0x2e9   : > { %1684 = vst.msk [vmem:[%s679_s18] sm:$0xf] %vm1683_vm6, %v2053_v17 }
 0x2eb   : > { %1371 = vadd.xlane.f32.xlu0 %v1370_v39  ;;  %v1464_v15 = vpop.permute.xlu1 %1463  ;;  %v1624_v39 = vadd.f32 %v2036_v14, %v1623_v33 }
 0x2ec   : > { %1374 = vadd.xlane.f32.xlu1 %v1373_v57  ;;  %v1494_v3 = vsel %vm1061_vm2, %v1464_v15, 0.0  ;;  %v2055_v57 = vpack.c.bf16 %v1629_v22, %v1629_v22 }
 0x2ed   : > { %v2054_v15 = vpack.c.bf16 %v1624_v39, %v1624_v39 }
 0x2ee   : > { %1686 = vst.msk [vmem:[%s679_s18 + $0x8] sm:$0xf] %vm1683_vm6, %v2055_v57 }
 0x2ef   : > { %1685 = vst.msk [vmem:[%s679_s18 + $0x4] sm:$0xf] %vm1683_vm6, %v2054_v15 }
 0x313   : > { %v3203_v26 = vpop.xlane.xlu0 %1129 }
 0x317   : > { %v1216_v7 = vpop.permute.xlu0 %1215 }
 0x318   : > { %v1243_v16 = vsel %vm1061_vm2, %v1216_v7, 0.0  ;;  %v2056_v7 = vpack.c.bf16 %v1632_v32, %v1632_v32 }
 0x319   : > { %1244 = vadd.xlane.f32.xlu0 %v1243_v16  ;;  %v2136_v16 = vpop.f32.mrf.mxu0 }
 0x31a   : > { %1687 = vst.msk [vmem:[%s679_s18 + $0xc] sm:$0xf] %vm1683_vm6, %v2056_v7 }
 0x31b   : > { %v1337_v19 = vpop.permute.xlu0 %1336 }
 0x31c   : > { %v3206_v36 = vpop.xlane.xlu1 %1132  ;;  %v1364_v34 = vsel %vm1061_vm2, %v1337_v19, 0.0  ;;  %v1636_v19 = vpop.f32.mrf.mxu0 }
 0x31d   : > { %1365 = vadd.xlane.f32.xlu0 %v1364_v34 }
 0x31e   : > { %v2137_v34 = vpop.f32.mrf.mxu0 }
 0x31f   : > { %v1458_v35 = vpop.permute.xlu0 %1457 }
 0x320   : > { %v1218_v42 = vpop.permute.xlu1 %1217  ;;  %v1485_v46 = vsel %vm1061_vm2, %v1458_v35, 0.0  ;;  %v1645_v35 = vadd.f32 %v2136_v16, %v2036_v14 }
 0x321   : > { %1486 = vadd.xlane.f32.xlu0 %v1485_v46  ;;  %v1246_v50 = vsel %vm1061_vm2, %v1218_v42, 0.0  ;;  %v1637_v42 = vadd.f32 %v2036_v14, %v1636_v19  ;;  %v1648_v46 = vadd.f32 %v2137_v34, %v2036_v14 }
 0x322   : > { %1247 = vadd.xlane.f32.xlu1 %v1246_v50  ;;  %v1639_v50 = vpop.f32.mrf.mxu0 }
 0x324   : > { %v1339_v11 = vpop.permute.xlu1 %1338 }
 0x325   : > { %1492 = vadd.xlane.f32.xlu0 %v1491_v18  ;;  %v1367_v43 = vsel %vm1061_vm2, %v1339_v11, 0.0  ;;  %v1640_v11 = vadd.f32 %v2036_v14, %v1639_v50  ;;  %v2059_v18 = vpack.c.bf16 %v1645_v35, %v1645_v35 }
 0x326   : > { %1368 = vadd.xlane.f32.xlu1 %v1367_v43  ;;  %v2057_v43 = vpack.c.bf16 %v1637_v42, %v1637_v42 }
 0x327   : > { %1690 = vst.msk [vmem:[%s679_s18 + $0x18] sm:$0xf] %vm1683_vm6, %v2059_v18 }
 0x328   : > { %v1460_v54 = vpop.permute.xlu1 %1459  ;;  %1688 = vst.msk [vmem:[%s679_s18 + $0x10] sm:$0xf] %vm1683_vm6, %v2057_v43 }
 0x329   : > { %v1488_v56 = vsel %vm1061_vm2, %v1460_v54, 0.0  ;;  %v2060_v54 = vpack.c.bf16 %v1648_v46, %v1648_v46 }
 0x32a   : > { %1489 = vadd.xlane.f32.xlu1 %v1488_v56  ;;  %v2058_v56 = vpack.c.bf16 %v1640_v11, %v1640_v11 }
 0x32b   : > { %1691 = vst.msk [vmem:[%s679_s18 + $0x1c] sm:$0xf] %vm1683_vm6, %v2060_v54 }
 0x32c   : > { %1689 = vst.msk [vmem:[%s679_s18 + $0x14] sm:$0xf] %vm1683_vm6, %v2058_v56 }
 0x32e   : > { %1495 = vadd.xlane.f32.xlu1 %v1494_v3 }
 0x350   : > { %v3230_v3 = vpop.xlane.xlu0 %1123 }
 0x354   : > { %v1239_v4 = vpop.xlane.xlu0 %1238 }
 0x355   : > { %2314 = vrcp.f32 %v1239_v4 }
 0x356   : > { %2316 = vrcp.f32 %v3173_v41 }
 0x358   : > { %v1360_v9 = vpop.xlane.xlu0 %1359 }
 0x359   : > { %2318 = vrcp.f32 %v1360_v9  ;;  %v3233_v12 = vpop.xlane.xlu1 %1126 }
 0x35c   : > { %v1481_v14 = vpop.xlane.xlu0 %1480 }
 0x35d   : > { %2320 = vrcp.f32 %v1481_v14  ;;  %v1363_v22 = vpop.xlane.xlu1 %1362 }
 0x360   : > { %v1233_v31 = vpop.xlane.xlu0 %1232 }
 0x361   : > { %v1484_v32 = vpop.xlane.xlu1 %1483  ;;  %2322 = vrcp.f32 %v1233_v31 }
 0x362   : > { %v2315_v33 = vpop.eup %2314  ;;  %2324 = vrcp.f32 %v3190_v53 }
 0x363   : > { %v2317_v57 = vpop.eup %2316  ;;  %v1265_v41 = vmul.f32 %v2315_v33, %v3011_v44 }
 0x364   : > { %v1354_v39 = vpop.xlane.xlu0 %1353  ;;  %v1144_v19 = vmul.f32 %v2317_v57, %v3037_v63 }
 0x365   : > { %2326 = vrcp.f32 %v1354_v39  ;;  %v1236_v17 = vpop.xlane.xlu1 %1235 }
 0x366   : > { %v2319_v7 = vpop.eup %2318  ;;  %2328 = vrcp.f32 %v3177_v38  ;;  %v1515_v38 = vsel %vm1061_vm2, %v1144_v19, %v1265_v41 }
 0x367   : > { %2330 = vrcp.f32 %v3194_v58  ;;  %v1386_v16 = vmul.f32 %v2319_v7, %v3017_v47 }
 0x368   : > { %2332 = vrcp.f32 %v1236_v17  ;;  %v1475_v15 = vpop.xlane.xlu0 %1474 }
 0x369   : > { %2334 = vrcp.f32 %v1475_v15  ;;  %v1357_v53 = vpop.xlane.xlu1 %1356  ;;  %v1523_v47 = vsel %vm835_vm0, %v1515_v38, %v1386_v16 }
 0x36a   : > { %v2321_v34 = vpop.eup %2320  ;;  %2336 = vrcp.f32 %v1357_v53 }
 0x36b   : > { %v1507_v44 = vmul.f32 %v2321_v34, %v3025_v49  ;;  %2338 = vrcp.f32 %v1363_v22 }
 0x36c   : > { %2340 = vrcp.f32 %v1484_v32  ;;  %v1242_v63 = vpop.xlane.xlu0 %1241 }
 0x36d   : > { %v1532_v58 = vsel %vm1529_vm7, %v1523_v47, %v1507_v44  ;;  %2342 = vrcp.f32 %v1242_v63  ;;  %v1478_v35 = vpop.xlane.xlu1 %1477 }
 0x36e   : > { %1541 = vst.msk [vmem:[%s3245_s23 + $0x10] sm:$0xff] %vm1538_vm8, %v1532_v58  ;;  %2344 = vrcp.f32 %v1478_v35  ;;  %v2323_v42 = vpop.eup %2322 }
 0x36f   : > { %v2325_v46 = vpop.eup %2324  ;;  %v1263_v18 = vmul.f32 %v2323_v42, %v3051_v23 }
 0x370   : > { %v1142_v56 = vmul.f32 %v2325_v46, %v3080_v40 }
 0x371   : > { %v1254_v34 = vpop.xlane.xlu1 %1253 }
 0x372   : > { %v2327_v50 = vpop.eup %2326  ;;  %v1513_v14 = vsel %vm1061_vm2, %v1142_v56, %v1263_v18 }
 0x373   : > { %v2329_v11 = vpop.eup %2328  ;;  %v1384_v49 = vmul.f32 %v2327_v50, %v3055_v24 }
 0x374   : > { %v2331_v43 = vpop.eup %2330 }
 0x375   : > { %v2333_v54 = vpop.eup %2332  ;;  %v1521_v32 = vsel %vm835_vm0, %v1513_v14, %v1384_v49  ;;  %v1143_v40 = vmul.f32 %v2331_v43, %v3087_v55  ;;  %v1375_v38 = vpop.xlane.xlu1 %1374 }
 0x376   : > { %v2335_v4 = vpop.eup %2334  ;;  %v1264_v33 = vmul.f32 %v2333_v54, %v3057_v25 }
 0x377   : > { %v2337_v9 = vpop.eup %2336  ;;  %v1505_v22 = vmul.f32 %v2335_v4, %v3063_v27  ;;  %v1145_v27 = vmul.f32 %v2329_v11, %v3044_v8 }
 0x378   : > { %v2339_v31 = vpop.eup %2338  ;;  %v1385_v57 = vmul.f32 %v2337_v9, %v3065_v28  ;;  %v1514_v25 = vsel %vm1061_vm2, %v1143_v40, %v1264_v33 }
 0x379   : > { %v2341_v39 = vpop.eup %2340  ;;  %v1530_v23 = vsel %vm1529_vm7, %v1521_v32, %v1505_v22  ;;  %v1387_v41 = vmul.f32 %v2339_v31, %v3023_v48 }
 0x37a   : > { %v2343_v24 = vpop.eup %2342  ;;  %1539 = vst.msk [vmem:[%s3245_s23] sm:$0xff] %vm1538_vm8, %v1530_v23  ;;  %v1508_v28 = vmul.f32 %v2341_v39, %v3031_v51  ;;  %v1522_v15 = vsel %vm835_vm0, %v1514_v25, %v1385_v57 }
 0x37b   : > { %v2345_v17 = vpop.eup %2344  ;;  %v1266_v7 = vmul.f32 %v2343_v24, %v3015_v45  ;;  %v1251_v45 = vpop.xlane.xlu0 %1250 }
 0x37c   : > { %v1506_v16 = vmul.f32 %v2345_v17, %v3071_v30 }
 0x37d   : > { %v1516_v19 = vsel %vm1061_vm2, %v1145_v27, %v1266_v7 }
 0x37e   : > { %v1524_v55 = vsel %vm835_vm0, %v1516_v19, %v1387_v41  ;;  %v1531_v53 = vsel %vm1529_vm7, %v1522_v15, %v1506_v16 }
 0x37f   : > { %v1533_v8 = vsel %vm1529_vm7, %v1524_v55, %v1508_v28  ;;  %1540 = vst.msk [vmem:[%s3245_s23 + $0x8] sm:$0xff] %vm1538_vm8, %v1531_v53  ;;  %v1372_v48 = vpop.xlane.xlu0 %1371 }
 0x380   : > { %1542 = vst.msk [vmem:[%s3245_s23 + $0x18] sm:$0xff] %vm1538_vm8, %v1533_v8 }
 0x3a2   : > { %v1245_v30 = vpop.xlane.xlu0 %1244 }
 0x3a3   : > { %2346 = vrcp.f32 %v1245_v30 }
 0x3a4   : > { %2348 = vrcp.f32 %v3230_v3 }
 0x3a6   : > { %v1366_v51 = vpop.xlane.xlu0 %1365 }
 0x3a7   : > { %2350 = vrcp.f32 %v1366_v51 }
 0x3a8   : > { %2352 = vrcp.f32 %v3203_v26 }
 0x3a9   : > { %2354 = vrcp.f32 %v1251_v45 }
 0x3aa   : > { %2356 = vrcp.f32 %v1372_v48  ;;  %v1487_v44 = vpop.xlane.xlu0 %1486 }
 0x3ab   : > { %2358 = vrcp.f32 %v1487_v44  ;;  %v1248_v47 = vpop.xlane.xlu1 %1247 }
 0x3ac   : > { %2360 = vrcp.f32 %v3233_v12 }
 0x3ad   : > { %2362 = vrcp.f32 %v1248_v47 }
 0x3ae   : > { %v1493_v63 = vpop.xlane.xlu0 %1492 }
 0x3af   : > { %2364 = vrcp.f32 %v1493_v63  ;;  %v1369_v58 = vpop.xlane.xlu1 %1368 }
 0x3b0   : > { %2366 = vrcp.f32 %v1369_v58  ;;  %v2347_v3 = vpop.eup %2346 }
 0x3b1   : > { %2368 = vrcp.f32 %v3206_v36  ;;  %v2349_v35 = vpop.eup %2348  ;;  %v1267_v50 = vmul.f32 %v2347_v3, %v3144_v59 }
 0x3b2   : > { %2370 = vrcp.f32 %v1254_v34  ;;  %v1146_v43 = vmul.f32 %v2349_v35, %v3171_v37 }
 0x3b3   : > { %2372 = vrcp.f32 %v1375_v38  ;;  %v1490_v42 = vpop.xlane.xlu1 %1489 }
 0x3b4   : > { %v2351_v26 = vpop.eup %2350  ;;  %2374 = vrcp.f32 %v1490_v42  ;;  %v1517_v56 = vsel %vm1061_vm2, %v1146_v43, %v1267_v50 }
 0x3b5   : > { %v2353_v46 = vpop.eup %2352  ;;  %v1388_v12 = vmul.f32 %v2351_v26, %v3148_v60 }
 0x3b6   : > { %v2355_v11 = vpop.eup %2354  ;;  %v1148_v60 = vmul.f32 %v2353_v46, %v3130_v29 }
 0x3b7   : > { %v2357_v18 = vpop.eup %2356  ;;  %v1496_v49 = vpop.xlane.xlu1 %1495  ;;  %v1269_v36 = vmul.f32 %v2355_v11, %v3094_v6  ;;  %v1525_v59 = vsel %vm835_vm0, %v1517_v56, %v1388_v12 }
 0x3b8   : > { %v2359_v54 = vpop.eup %2358  ;;  %2376 = vrcp.f32 %v1496_v49  ;;  %v1390_v14 = vmul.f32 %v2357_v18, %v3098_v21 }
 0x3b9   : > { %v1509_v4 = vmul.f32 %v2359_v54, %v3156_v1  ;;  %v2361_v9 = vpop.eup %2360  ;;  %v1519_v6 = vsel %vm1061_vm2, %v1148_v60, %v1269_v36 }
 0x3ba   : > { %v2363_v22 = vpop.eup %2362  ;;  %v1527_v39 = vsel %vm835_vm0, %v1519_v6, %v1390_v14  ;;  %v1147_v40 = vmul.f32 %v2361_v9, %v3180_v52 }
 0x3bb   : > { %v1534_v37 = vsel %vm1529_vm7, %v1525_v59, %v1509_v4  ;;  %v1268_v21 = vmul.f32 %v2363_v22, %v3150_v0 }
 0x3bc   : > { %v2365_v31 = vpop.eup %2364  ;;  %1543 = vst.msk [vmem:[%s3245_s23 + $0x20] sm:$0xff] %vm1538_vm8, %v1534_v37 }
 0x3bd   : > { %v2367_v32 = vpop.eup %2366  ;;  %v1511_v33 = vmul.f32 %v2365_v31, %v3106_v62  ;;  %v1518_v27 = vsel %vm1061_vm2, %v1147_v40, %v1268_v21 }
 0x3be   : > { %v2369_v1 = vpop.eup %2368  ;;  %v1389_v29 = vmul.f32 %v2367_v32, %v3158_v2 }
 0x3bf   : > { %v2371_v23 = vpop.eup %2370  ;;  %v1536_v57 = vsel %vm1529_vm7, %v1527_v39, %v1511_v33  ;;  %v1149_v25 = vmul.f32 %v2369_v1, %v3137_v61 }
 0x3c0   : > { %v2373_v24 = vpop.eup %2372  ;;  %1545 = vst.msk [vmem:[%s3245_s23 + $0x30] sm:$0xff] %vm1538_vm8, %v1536_v57  ;;  %v1270_v62 = vmul.f32 %v2371_v23, %v3100_v10  ;;  %v1526_v41 = vsel %vm835_vm0, %v1518_v27, %v1389_v29 }
 0x3c1   : > { %v2375_v17 = vpop.eup %2374  ;;  %v1391_v0 = vmul.f32 %v2373_v24, %v3108_v13 }
 0x3c2   : > { %v1510_v7 = vmul.f32 %v2375_v17, %v3164_v5  ;;  %v1520_v52 = vsel %vm1061_vm2, %v1149_v25, %v1270_v62 }
 0x3c3   : > { %v1528_v10 = vsel %vm835_vm0, %v1520_v52, %v1391_v0 }
 0x3c4   : > { %v1535_v2 = vsel %vm1529_vm7, %v1526_v41, %v1510_v7 }
 0x3c5   : > { %v2377_v16 = vpop.eup %2376  ;;  %1544 = vst.msk [vmem:[%s3245_s23 + $0x28] sm:$0xff] %vm1538_vm8, %v1535_v2 }
 0x3c6   : > { %v1512_v28 = vmul.f32 %v2377_v16, %v3114_v20 }
 0x3c8   : > { %v1537_v15 = vsel %vm1529_vm7, %v1528_v10, %v1512_v28 }
 0x3c9   : > { %1546 = vst.msk [vmem:[%s3245_s23 + $0x38] sm:$0xff] %vm1538_vm8, %v1537_v15 }
 0x3ca PF: > { %s28_s29 = sadd.s32 1, %s2588_s29   ;;  %s3365_s26 = sld [smem:[#allocation16_spill]] }
 0x3cb   : > { %p25_p1 = scmp.ge.s32.totalorder %s28_s29, 6   ;;  %s3366_s19 = sld [smem:[#allocation17_spill]] }
 0x3cc   : > { %s3367_s25 = smov %s2580_s27  ;;  %s3369_s28 = smov %s3375_s24 }
 0x3cd   :  { %27 = sbr.rel (!%p25_p1) target bundleno = 9 (0x9), region = 149 }
 0x3d1   : > { %s3368_s27 = smov %s3366_s19 }
 0x3d2   :  { %1772 = vsyncpa [#allocation3], 1 }
 0x3d3   :  { %1774 = vsyncpa [#allocation3 + $0x1], 1 }
 0x3d4   :  { %1775 = vsyncpa [#allocation5], 1 }
 0x3d5   :  { %1776 = vsyncpa [#allocation8], 1 }
 0x3d6   :  { %1777 = vsyncpa [#allocation11], 1 }

// kernel: deformable_transformer_encoder_forward.6
= control target key start
LH: loop header
LB: loop body
LE: loop exit
PB: predicated region body
PF: predicated region fallthrough
CT: control target
= control target key end

     0   :  { %s2274_s25 = smov 0   ;;  %s2276_s26 = smov 0   ;;  %s2862_s0 = inlined_call_operand.vmem [shape: f32[2,128,32], index: 0, kind: input, shape index: {}]   ;;  %s2863_s1 = inlined_call_operand.vmem [shape: f32[2,128,32], index: 1, kind: input, shape index: {}]   ;;  %s2864_s2 = inlined_call_operand.vmem [shape: f32[2,128,8], index: 2, kind: input, shape index: {}]   ;;  %s2865_s3 = inlined_call_operand.vmem [shape: bf16[32,32], index: 3, kind: input, shape index: {}]   ;;  %s2866_s4 = inlined_call_operand.vmem [shape: f32[1,32], index: 4, kind: input, shape index: {}]   ;;  %s2867_s5 = inlined_call_operand.vmem [shape: f32[8,32], index: 5, kind: input, shape index: {}]   ;;  %s2868_s6 = inlined_call_operand.vmem [shape: f32[1,32], index: 6, kind: input, shape index: {}]   ;;  %s2869_s7 = inlined_call_operand.vmem [shape: bf16[32,16], index: 7, kind: input, shape index: {}]   ;;  %s2870_s8 = inlined_call_operand.vmem [shape: f32[1,16], index: 8, kind: input, shape index: {}]   ;;  %s2871_s9 = inlined_call_operand.vmem [shape: bf16[32,32], index: 9, kind: input, shape index: {}]   ;;  %s2872_s10 = inlined_call_operand.vmem [shape: f32[1,32], index: 10, kind: input, shape index: {}]   ;;  %s2873_s11 = inlined_call_operand.vmem [shape: f32[2,128,32], index: 11, kind: output, shape index: {0}]   ;;  %s2874_s12 = inlined_call_operand.vmem [shape: f32[2,128,16], index: 12, kind: output, shape index: {1}]   ;;  %s2875_s13 = inlined_call_operand.vmem [shape: bf16[2,128,32], index: 13, kind: output, shape index: {2}]  }
   0x1   :  { %s2278_s27 = smov 0   ;;  %s2280_s28 = smov 0  }
   0x2   :  { %s2282_s29 = smov 0  }
   0x3 LB: > { %s33_s30 = sadd.s32 1, %s2191_s27  ;;  %s36_s14 = sadd.s32 1, %s2195_s28  ;;  %s2199_s29 = sphi %s2282_s29, %s24_s29   ;;  %s2195_s28 = sphi %s2280_s28, %s2879_s28   ;;  %s2191_s27 = sphi %s2278_s27, %s2878_s27   ;;  %s2187_s26 = sphi %s2276_s26, %s2877_s26   ;;  %s2183_s25 = sphi %s2274_s25, %s2876_s25  }
   0x4   : > { %p34_p0 = scmp.ge.s32.totalorder %s33_s30, 2  ;;  %p1840_p1 = scmp.ge.s32.totalorder %s2199_s29, 1 }
   0x5   : > { %p451_p2 = scmp.lt.s32.totalorder %s2199_s29, 5 }
   0x6   : > { %s2881_s30 = smov (%p34_p0, %s33_s30), 0  ;;  %s2883_s14 = smov (!%p34_p0, %s36_s14), %s2195_s28 }
   0x7   : > { %p452_p3 = pnand %p1840_p1, %p451_p2  ;;  %p38_p4 = scmp.ge.s32.totalorder %s2883_s14, 2 }
   0x8   : > { %s1841_s17 = sshll.u32 (!%p452_p3), %s2183_s25, 3  ;;  %p540_p5 = scmp.lt.s32.totalorder (!%p452_p3), %s2187_s26, 1 }
   0x9   : > { %s2885_s14 = smov (%p38_p4, %s2883_s14), 0  ;;  %455 = sbr.rel (%p452_p3) target bundleno = 875 (0x36b), region = 64 }
   0xa   : > { %p542_p6 = scmp.lt.s32.totalorder (!%p452_p3), %s1841_s17, 15  ;;  %s2202_s18 = smov (!%p452_p3), 120  }
   0xe   : > { %v2027_v0 = vld [vmem:[%s2865_s3 + $0x8] sm:$0xff]   ;;  %v737_v1 = vld [vmem:[%s2867_s5] sm:$0xff]  ;;  %s2887_s26 = smov (!%p540_p5, %s2187_s26), 1  ;;  %s2889_s17 = smov (!%p542_p6, %s1841_s17), 15  ;;  %vm753_vm0 = vcmask 64512   ;;  %vm651_vm1 = vcmask 261120  }
   0xf   : > { %1934 = vmatprep.subr.bf16.mxu0 %v2027_v0  ;;  %1946 = vmatprep.subr.mxu1 %v737_v1  ;;  %v2028_v2 = vld [vmem:[%s2869_s7 + $0x8] sm:$0xff]   ;;  %v2029_v3 = vld [vmem:[%s2865_s3] sm:$0xff]   ;;  %s1842_s24 = sshll.u32 %s2887_s26, 4  ;;  %vm979_vm2 = vcmask 31744   ;;  %vm1068_vm3 = vcmask 64544   ;;  %vm1189_vm4 = vcmask 97344  }
  0x10   : > { %1935 = vmatpush3.bf16.msra.mxu0 %v2027_v0  ;;  %1947 = vmatpush3.msra.mxu1 %v737_v1  ;;  %s2316_s25 = sadd.s32 %s1842_s24, %s2889_s17  ;;  %v2030_v4 = vld [vmem:[%s2869_s7] sm:$0xff]   ;;  %vm1310_vm5 = vcmask 130144   ;;  %vm1601_vm6 = vcmask 257024   ;;  %vm1447_vm7 = vcmask 97280   ;;  %vm1456_vm8 = vcmask 130048  }
  0x11   : > { %1960 = vmatprep.subr.bf16.mxu1 %v2028_v2  ;;  %1936 = vmatprep.subr.bf16.mxu0 %v2029_v3  ;;  %s2319_s15 = sshll.u32 %s2316_s25, 3  ;;  %v1859_v45 = vld [vmem:[%s2866_s4] ss:$0 sm:$0xff]  ;;  %s1858_s24 = sshll.u32 %s2316_s25, 2 }
  0x12   : > { %s2325_s19 = scalar_lea.vmem %s2864_s2, %s2319_s15  ;;  %s2336_s22 = scalar_lea.vmem %s2862_s0, %s2319_s15  ;;  %v1866_v48 = vld [vmem:[%s2868_s6] ss:$0 sm:$0xff] }
  0x13   : > { %v729_v5 = vld [vmem:[%s2325_s19] sm:$0xff]  ;;  %v730_v6 = vld [vmem:[%s2325_s19 + $0x8] sm:$0xff]  ;;  %s2342_s16 = scalar_lea.vmem %s2863_s1, %s2319_s15  ;;  %v731_v7 = vld [vmem:[%s2325_s19 + $0x10] sm:$0xff]  ;;  %s2772_s21 = scalar_lea.vmem %s2874_s12, %s2319_s15 }
  0x14   : > { %1937 = vmatpush3.bf16.msra.mxu0 %v2029_v3  ;;  %1948 = vmatprep.mubr.msk.f32.mxu1 %vm753_vm0, %v729_v5  ;;  %v600_v8 = vld [vmem:[%s2336_s22] sm:$0xff]  ;;  %v601_v9 = vld [vmem:[%s2336_s22 + $0x8] sm:$0xff]  ;;  %v2352_v13 = vld [vmem:[%s2336_s22 + $0x10] sm:$0xff] }
  0x15   : > { %v608_v10 = vld [vmem:[%s2342_s16] sm:$0xff]  ;;  %1949 = vmatmul.mubr.msk.f32.vlgmr.msra.gmra.mxu1 %vm753_vm0, %v730_v6  ;;  %v609_v11 = vld [vmem:[%s2342_s16 + $0x8] sm:$0xff]  ;;  %v2355_v14 = vld [vmem:[%s2336_s22 + $0x18] sm:$0xff]  ;;  %v1465_v42 = vpack.c.bf16 %v601_v9, %v600_v8 }
  0x16   : > { %v616_v12 = vadd.f32 %v608_v10, %v600_v8  ;;  %1961 = vmatpush3.bf16.msra.mxu1 %v2028_v2  ;;  %v617_v15 = vadd.f32 %v609_v11, %v601_v9  ;;  %1951 = vmatprep.mubr.msk.f32.mxu1 %vm753_vm0, %v731_v7  ;;  %v610_v16 = vld [vmem:[%s2342_s16 + $0x10] sm:$0xff]  ;;  %v611_v17 = vld [vmem:[%s2342_s16 + $0x18] sm:$0xff]  ;;  %v1466_v18 = vpack.c.bf16 %v2355_v14, %v2352_v13  ;;  %v733_v22 = vld [vmem:[%s2325_s19 + $0x20] sm:$0xff] }
  0x17   : > { %v732_v19 = vld [vmem:[%s2325_s19 + $0x18] sm:$0xff]  ;;  %v618_v20 = vadd.f32 %v610_v16, %v2352_v13  ;;  %v619_v21 = vadd.f32 %v611_v17, %v2355_v14  ;;  %1962 = vmatprep.subr.bf16.mxu1 %v2030_v4  ;;  %v2367_v23 = vld [vmem:[%s2336_s22 + $0x20] sm:$0xff]  ;;  %v2370_v25 = vld [vmem:[%s2336_s22 + $0x28] sm:$0xff] }
  0x18   : > { %v624_v24 = vpack.c.bf16 %v617_v15, %v616_v12  ;;  %v612_v26 = vld [vmem:[%s2342_s16 + $0x20] sm:$0xff]  ;;  %v613_v27 = vld [vmem:[%s2342_s16 + $0x28] sm:$0xff]  ;;  %v2378_v31 = vld [vmem:[%s2336_s22 + $0x30] sm:$0xff] }
  0x19   : > { %v625_v28 = vpack.c.bf16 %v619_v21, %v618_v20  ;;  %1952 = vmatmul.mubr.msk.f32.gmra.mxu1 %vm753_vm0, %v732_v19  ;;  %v620_v29 = vadd.f32 %v612_v26, %v2367_v23  ;;  %v621_v30 = vadd.f32 %v613_v27, %v2370_v25  ;;  %v2381_v32 = vld [vmem:[%s2336_s22 + $0x38] sm:$0xff]  ;;  %v734_v33 = vld [vmem:[%s2325_s19 + $0x28] sm:$0xff]  ;;  %v614_v34 = vld [vmem:[%s2342_s16 + $0x30] sm:$0xff]  ;;  %s2413_s22 = scalar_lea.vmem %s2873_s11, %s2319_s15 }
  0x1a   : > { %1938 = vmatprep.mubr.msk.bf16.mxu0 %vm651_vm1, %v624_v24  ;;  %1954 = vmatprep.mubr.msk.f32.mxu1 %vm753_vm0, %v733_v22  ;;  %v615_v35 = vld [vmem:[%s2342_s16 + $0x38] sm:$0xff]  ;;  %v735_v37 = vld [vmem:[%s2325_s19 + $0x30] sm:$0xff]  ;;  %v622_v38 = vadd.f32 %v614_v34, %v2378_v31  ;;  %v2420_v3 = vld [vmem:[%s2870_s8] ss:$0 sm:$0xff]  ;;  %s2201_s16 = smov 124  }
  0x1b   : > { %1939 = vmatmul.mubr.msk.bf16.vlgmr.msra.gmra.mxu0 %vm651_vm1, %v625_v28  ;;  %1963 = vmatpush3.bf16.msra.mxu1 %v2030_v4  ;;  %v626_v36 = vpack.c.bf16 %v621_v30, %v620_v29  ;;  %v623_v39 = vadd.f32 %v615_v35, %v2381_v32  ;;  %v736_v40 = vld [vmem:[%s2325_s19 + $0x38] sm:$0xff]  ;;  %s2203_s19 = smov 116  }
  0x1d   : > { %1955 = vmatmul.mubr.msk.f32.gmra.mxu1 %vm753_vm0, %v734_v33  ;;  %1942 = vmatprep.mubr.msk.bf16.mxu0 %vm651_vm1, %v626_v36  ;;  %v627_v41 = vpack.c.bf16 %v623_v39, %v622_v38 }
  0x1e   : > { %1957 = vmatprep.mubr.msk.f32.mxu1 %vm753_vm0, %v735_v37 }
  0x21   : > { %1958 = vmatmul.mubr.msk.f32.gmra.mxu1 %vm753_vm0, %v736_v40 }
  0x22   : > { %1964 = vmatprep.mubr.msk.bf16.mxu1 %vm651_vm1, %v624_v24 }
  0x23   : > { %1943 = vmatmul.mubr.msk.bf16.gmra.mxu0 %vm651_vm1, %v627_v41 }
  0x24   : > { %1976 = vmatprep.mubr.msk.bf16.mxu0 %vm651_vm1, %v1465_v42 }
  0x25   : > { %1965 = vmatmul.mubr.msk.bf16.vlgmr.msra.gmra.mxu1 %vm651_vm1, %v625_v28 }
  0x26   : > { %1968 = vmatprep.mubr.msk.bf16.mxu1 %vm651_vm1, %v626_v36 }
  0x2d   : > { %1969 = vmatmul.mubr.msk.bf16.gmra.mxu1 %vm651_vm1, %v627_v41 }
  0xd5   : > { %v1950_v43 = vpop.f32.mrf.mxu1 }
  0xd7   : > { %v844_v44 = vpop.f32.mrf.mxu1 }
  0xd9   : > { %v1953_v46 = vpop.f32.mrf.mxu1 }
  0xdb   : > { %v1940_v47 = vpop.f32.mrf.mxu0  ;;  %v854_v49 = vpop.f32.mrf.mxu1 }
  0xdc   : > { %v707_v50 = vadd.f32 %v1940_v47, %v1859_v45 }
  0xdd   : > { %v698_v51 = vpop.f32.mrf.mxu0  ;;  %v1956_v52 = vpop.f32.mrf.mxu1 }
  0xde   : > { %v699_v53 = vadd.f32 %v1859_v45, %v698_v51  ;;  %v747_v54 = vmul.f32 %v1866_v48, %v707_v50 }
  0xdf   : > { %v1941_v55 = vpop.f32.mrf.mxu0  ;;  %v864_v56 = vpop.f32.mrf.mxu1 }
  0xe0   : > { %v745_v57 = vmul.f32 %v1866_v48, %v699_v53  ;;  %v855_v58 = vadd.f32 %v854_v49, %v747_v54  ;;  %v710_v59 = vadd.f32 %v1941_v55, %v1859_v45 }
  0xe1   : > { %v701_v60 = vpop.f32.mrf.mxu0  ;;  %v1959_v61 = vpop.f32.mrf.mxu1 }
  0xe2   : > { %v845_v62 = vadd.f32 %v844_v44, %v745_v57  ;;  %885 = vst.msk [vmem:[%s2413_s22 + $0x10] sm:$0xff] %vm651_vm1, %v855_v58  ;;  %v748_v63 = vmul.f32 %v1866_v48, %v710_v59  ;;  %v702_v0 = vadd.f32 %v1859_v45, %v701_v60 }
  0xe3   : > { %v1944_v1 = vpop.f32.mrf.mxu0  ;;  %v874_v2 = vpop.f32.mrf.mxu1 }
  0xe4   : > { %883 = vst.msk [vmem:[%s2413_s22] sm:$0xff] %vm651_vm1, %v845_v62  ;;  %v860_v4 = vadd.f32 %v1953_v46, %v748_v63  ;;  %v746_v5 = vmul.f32 %v1866_v48, %v702_v0  ;;  %v723_v6 = vadd.f32 %v1944_v1, %v1859_v45 }
  0xe5   : > { %v714_v7 = vpop.f32.mrf.mxu0  ;;  %v1966_v8 = vpop.f32.mrf.mxu1 }
  0xe6   : > { %886 = vst.msk [vmem:[%s2413_s22 + $0x18] sm:$0xff] %vm651_vm1, %v860_v4  ;;  %v850_v9 = vadd.f32 %v1950_v43, %v746_v5  ;;  %v715_v10 = vadd.f32 %v1859_v45, %v714_v7  ;;  %v751_v11 = vmul.f32 %v1866_v48, %v723_v6  ;;  %v2427_v12 = vadd.f32 %v1966_v8, %v2420_v3 }
  0xe7   : > { %v1945_v15 = vpop.f32.mrf.mxu0  ;;  %v948_v16 = vpop.f32.mrf.mxu1 }
  0xe8   : > { %884 = vst.msk [vmem:[%s2413_s22 + $0x8] sm:$0xff] %vm651_vm1, %v850_v9  ;;  %v749_v17 = vmul.f32 %v1866_v48, %v715_v10  ;;  %v875_v19 = vadd.f32 %v874_v2, %v751_v11  ;;  %v726_v20 = vadd.f32 %v1945_v15, %v1859_v45  ;;  %v2432_v21 = vadd.f32 %v2420_v3, %v948_v16 }
  0xe9   : > { %v717_v22 = vpop.f32.mrf.mxu0  ;;  %v986_v24 = vsel %vm979_vm2, %v2427_v12, -inf  ;;  %v1967_v26 = vpop.f32.mrf.mxu1  ;;  %v1075_v36 = vsel %vm1068_vm3, %v2427_v12, -inf  ;;  %v1196_v39 = vsel %vm1189_vm4, %v2427_v12, -inf  ;;  %v1317_v42 = vsel %vm1310_vm5, %v2427_v12, -inf }
  0xea   : > { %v865_v27 = vadd.f32 %v864_v56, %v749_v17  ;;  %889 = vst.msk [vmem:[%s2413_s22 + $0x30] sm:$0xff] %vm651_vm1, %v875_v19  ;;  %v752_v28 = vmul.f32 %v1866_v48, %v726_v20  ;;  %v718_v29 = vadd.f32 %v1859_v45, %v717_v22  ;;  %987 = vmax.xlane.f32.xlu1 %v986_v24  ;;  %v980_v33 = vsel %vm979_vm2, %v2432_v21, -inf }
  0xeb   : > { %v2439_v30 = vadd.f32 %v1967_v26, %v2420_v3  ;;  %981 = vmax.xlane.f32.xlu0 %v980_v33  ;;  %v951_v41 = vpop.f32.mrf.mxu1  ;;  %v1069_v45 = vsel %vm1068_vm3, %v2432_v21, -inf  ;;  %v1190_v47 = vsel %vm1189_vm4, %v2432_v21, -inf  ;;  %v1311_v50 = vsel %vm1310_vm5, %v2432_v21, -inf }
  0xec   : > { %887 = vst.msk [vmem:[%s2413_s22 + $0x20] sm:$0xff] %vm651_vm1, %v865_v27  ;;  %v880_v34 = vadd.f32 %v1959_v61, %v752_v28  ;;  %v750_v35 = vmul.f32 %v1866_v48, %v718_v29  ;;  %v2460_v43 = vadd.f32 %v2420_v3, %v951_v41 }
  0xed   : > { %v1078_v38 = vsel %vm1068_vm3, %v2439_v30, -inf  ;;  %v1199_v40 = vsel %vm1189_vm4, %v2439_v30, -inf  ;;  %v1320_v44 = vsel %vm1310_vm5, %v2439_v30, -inf  ;;  %v1970_v49 = vpop.f32.mrf.mxu1  ;;  %v989_v53 = vsel %vm979_vm2, %v2439_v30, -inf }
  0xee   : > { %890 = vst.msk [vmem:[%s2413_s22 + $0x38] sm:$0xff] %vm651_vm1, %v880_v34  ;;  %v870_v37 = vadd.f32 %v1956_v52, %v750_v35  ;;  %1076 = vmax.xlane.f32.xlu1 %v1075_v36  ;;  %v983_v46 = vsel %vm979_vm2, %v2460_v43, -inf  ;;  %v1072_v48 = vsel %vm1068_vm3, %v2460_v43, -inf  ;;  %v1193_v51 = vsel %vm1189_vm4, %v2460_v43, -inf }
  0xef   : > { %1079 = vmax.xlane.f32.xlu0 %v1078_v38  ;;  %v2477_v52 = vadd.f32 %v1970_v49, %v2420_v3  ;;  %v964_v54 = vpop.f32.mrf.mxu1  ;;  %v1314_v55 = vsel %vm1310_vm5, %v2460_v43, -inf }
  0xf0   : > { %888 = vst.msk [vmem:[%s2413_s22 + $0x28] sm:$0xff] %vm651_vm1, %v870_v37  ;;  %v2486_v57 = vadd.f32 %v2420_v3, %v964_v54 }
  0xf1   : > { %v1087_v56 = vsel %vm1068_vm3, %v2477_v52, -inf  ;;  %v998_v58 = vsel %vm979_vm2, %v2477_v52, -inf  ;;  %v1971_v59 = vpop.f32.mrf.mxu1  ;;  %v1208_v60 = vsel %vm1189_vm4, %v2477_v52, -inf  ;;  %v1329_v63 = vsel %vm1310_vm5, %v2477_v52, -inf }
  0xf2   : > { %1197 = vmax.xlane.f32.xlu1 %v1196_v39  ;;  %v2493_v61 = vadd.f32 %v1971_v59, %v2420_v3  ;;  %v992_v62 = vsel %vm979_vm2, %v2486_v57, -inf  ;;  %v1081_v1 = vsel %vm1068_vm3, %v2486_v57, -inf  ;;  %v1202_v5 = vsel %vm1189_vm4, %v2486_v57, -inf }
  0xf3   : > { %1200 = vmax.xlane.f32.xlu0 %v1199_v40  ;;  %v967_v4 = vpop.f32.mrf.mxu1  ;;  %v1323_v8 = vsel %vm1310_vm5, %v2486_v57, -inf }
  0xf4   : > { %v1090_v0 = vsel %vm1068_vm3, %v2493_v61, -inf  ;;  %v1211_v2 = vsel %vm1189_vm4, %v2493_v61, -inf  ;;  %v2508_v6 = vadd.f32 %v2420_v3, %v967_v4  ;;  %v1332_v7 = vsel %vm1310_vm5, %v2493_v61, -inf }
  0xf5   : > { %v1001_v10 = vsel %vm979_vm2, %v2493_v61, -inf }
  0xf6   : > { %1318 = vmax.xlane.f32.xlu1 %v1317_v42  ;;  %v1084_v9 = vsel %vm1068_vm3, %v2508_v6, -inf  ;;  %v1205_v3 = vsel %vm1189_vm4, %v2508_v6, -inf  ;;  %v995_v11 = vsel %vm979_vm2, %v2508_v6, -inf  ;;  %v1326_v15 = vsel %vm1310_vm5, %v2508_v6, -inf }
  0xf7   : > { %1321 = vmax.xlane.f32.xlu0 %v1320_v44 }
  0xfa   : > { %1070 = vmax.xlane.f32.xlu1 %v1069_v45 }
  0xfb   : > { %984 = vmax.xlane.f32.xlu0 %v983_v46 }
  0xfe   : > { %1191 = vmax.xlane.f32.xlu1 %v1190_v47 }
  0xff   : > { %1073 = vmax.xlane.f32.xlu0 %v1072_v48 }
 0x102   : > { %1312 = vmax.xlane.f32.xlu1 %v1311_v50 }
 0x103   : > { %1194 = vmax.xlane.f32.xlu0 %v1193_v51 }
 0x106   : > { %990 = vmax.xlane.f32.xlu1 %v989_v53 }
 0x107   : > { %1315 = vmax.xlane.f32.xlu0 %v1314_v55 }
 0x10a   : > { %1088 = vmax.xlane.f32.xlu1 %v1087_v56 }
 0x10b   : > { %999 = vmax.xlane.f32.xlu0 %v998_v58 }
 0x10e   : > { %1209 = vmax.xlane.f32.xlu1 %v1208_v60 }
 0x10f   : > { %993 = vmax.xlane.f32.xlu0 %v992_v62 }
 0x112   : > { %1330 = vmax.xlane.f32.xlu1 %v1329_v63 }
 0x113   : > { %1091 = vmax.xlane.f32.xlu0 %v1090_v0 }
 0x116   : > { %1082 = vmax.xlane.f32.xlu1 %v1081_v1 }
 0x117   : > { %1212 = vmax.xlane.f32.xlu0 %v1211_v2 }
 0x11a   : > { %1203 = vmax.xlane.f32.xlu1 %v1202_v5 }
 0x11b   : > { %1333 = vmax.xlane.f32.xlu0 %v1332_v7 }
 0x11e   : > { %1324 = vmax.xlane.f32.xlu1 %v1323_v8 }
 0x11f   : > { %1085 = vmax.xlane.f32.xlu0 %v1084_v9 }
 0x122   : > { %1002 = vmax.xlane.f32.xlu1 %v1001_v10 }
 0x123   : > { %1206 = vmax.xlane.f32.xlu0 %v1205_v3 }
 0x126   : > { %996 = vmax.xlane.f32.xlu1 %v995_v11 }
 0x127   : > { %1327 = vmax.xlane.f32.xlu0 %v1326_v15 }
 0x173   : > { %v988_v16 = vpop.xlane.xlu1 %987 }
 0x174   : > { %v2524_v17 = vpop.xlane.xlu0 %981  ;;  %v1006_v53 = vsub.f32 %v2427_v12, %v988_v16 }
 0x176   : > { %v1016_v55 = vmul.f32 1.442695, %v1006_v53 }
 0x177   : > { %v1077_v19 = vpop.xlane.xlu1 %1076 }
 0x178   : > { %v1095_v20 = vsub.f32 %v2427_v12, %v1077_v19  ;;  %v1080_v22 = vpop.xlane.xlu0 %1079 }
 0x179   : > { %v1096_v26 = vsub.f32 %v2439_v30, %v1080_v22 }
 0x17a   : > { %v1105_v24 = vmul.f32 1.442695, %v1095_v20 }
 0x17b   : > { %v1198_v27 = vpop.xlane.xlu1 %1197  ;;  %v1107_v28 = vmul.f32 1.442695, %v1096_v26 }
 0x17c   : > { %2033 = vpow2.f32 %v1105_v24  ;;  %v1216_v29 = vsub.f32 %v2427_v12, %v1198_v27  ;;  %v1201_v33 = vpop.xlane.xlu0 %1200 }
 0x17d   : > { %v1217_v35 = vsub.f32 %v2439_v30, %v1201_v33  ;;  %2035 = vpow2.f32 %v1107_v28  ;;  %v1004_v33 = vsub.f32 %v2432_v21, %v2524_v17 }
 0x17e   : > { %v1226_v34 = vmul.f32 1.442695, %v1216_v29 }
 0x17f   : > { %v1319_v36 = vpop.xlane.xlu1 %1318  ;;  %v1228_v37 = vmul.f32 1.442695, %v1217_v35 }
 0x180   : > { %2037 = vpow2.f32 %v1226_v34  ;;  %v1337_v38 = vsub.f32 %v2427_v12, %v1319_v36  ;;  %v1322_v39 = vpop.xlane.xlu0 %1321  ;;  %v1012_v34 = vmul.f32 1.442695, %v1004_v33 }
 0x181   : > { %v1338_v41 = vsub.f32 %v2439_v30, %v1322_v39  ;;  %2039 = vpow2.f32 %v1228_v37 }
 0x182   : > { %v1347_v40 = vmul.f32 1.442695, %v1337_v38 }
 0x183   : > { %v1349_v42 = vmul.f32 1.442695, %v1338_v41  ;;  %v1071_v46 = vpop.xlane.xlu1 %1070 }
 0x184   : > { %2041 = vpow2.f32 %v1347_v40  ;;  %v985_v60 = vpop.xlane.xlu0 %984  ;;  %v1093_v1 = vsub.f32 %v2432_v21, %v1071_v46 }
 0x185   : > { %2043 = vpow2.f32 %v1349_v42  ;;  %v1005_v35 = vsub.f32 %v2460_v43, %v985_v60 }
 0x186   : > { %2045 = vpow2.f32 %v1016_v55  ;;  %v1101_v4 = vmul.f32 1.442695, %v1093_v1 }
 0x187   : > { %v1192_v50 = vpop.xlane.xlu1 %1191  ;;  %v1014_v37 = vmul.f32 1.442695, %v1005_v35 }
 0x188   : > { %v1074_v63 = vpop.xlane.xlu0 %1073  ;;  %v1214_v12 = vsub.f32 %v2432_v21, %v1192_v50 }
 0x189   : > { %v2532_v44 = vpop.eup %2033  ;;  %v1094_v5 = vsub.f32 %v2460_v43, %v1074_v63 }
 0x18a   : > { %1129 = vrot.lane.b32.xlu1 %v2532_v44, %s2201_s16  ;;  %v2536_v45 = vpop.eup %2035 }
 0x18b   : > { %v1313_v54 = vpop.xlane.xlu1 %1312  ;;  %v1103_v9 = vmul.f32 1.442695, %v1094_v5 }
 0x18c   : > { %v1195_v2 = vpop.xlane.xlu0 %1194  ;;  %v1335_v8 = vsub.f32 %v2432_v21, %v1313_v54 }
 0x18d   : > { %v2538_v47 = vpop.eup %2037  ;;  %v1215_v10 = vsub.f32 %v2460_v43, %v1195_v2 }
 0x18e   : > { %1250 = vrot.lane.b32.xlu0 %v2538_v47, %s2202_s18  ;;  %1131 = vrot.lane.b32.xlu1 %v2536_v45, %s2201_s16  ;;  %v2544_v48 = vpop.eup %2039  ;;  %v1343_v15 = vmul.f32 1.442695, %v1335_v8 }
 0x18f   : > { %v991_v56 = vpop.xlane.xlu1 %990  ;;  %v1224_v16 = vmul.f32 1.442695, %v1215_v10  ;;  %v2031_v10 = vld [vmem:[%s2871_s9 + $0x8] sm:$0xff]  }
 0x190   : > { %v1007_v58 = vsub.f32 %v2439_v30, %v991_v56  ;;  %v1222_v30 = vmul.f32 1.442695, %v1214_v12  ;;  %v1316_v11 = vpop.xlane.xlu0 %1315  ;;  %1972 = vmatprep.subr.bf16.mxu0 %v2031_v10 }
 0x191   : > { %v2546_v49 = vpop.eup %2041  ;;  %v1336_v19 = vsub.f32 %v2460_v43, %v1316_v11  ;;  %1973 = vmatpush3.bf16.msra.mxu0 %v2031_v10 }
 0x192   : > { %1371 = vrot.lane.b32.xlu0 %v2546_v49, %s2203_s19  ;;  %1252 = vrot.lane.b32.xlu1 %v2544_v48, %s2202_s18  ;;  %v2552_v51 = vpop.eup %2043  ;;  %v1018_v59 = vmul.f32 1.442695, %v1007_v58 }
 0x193   : > { %v2558_v62 = vpop.eup %2045  ;;  %v1345_v20 = vmul.f32 1.442695, %v1336_v19  ;;  %v1089_v39 = vpop.xlane.xlu1 %1088 }
 0x194   : > { %2047 = vpow2.f32 %v1018_v59  ;;  %v1034_v0 = vsel %vm979_vm2, %v2558_v62, 0.0  ;;  %v1000_v36 = vpop.xlane.xlu0 %999  ;;  %v1099_v50 = vsub.f32 %v2477_v52, %v1089_v39 }
 0x195   : > { %2049 = vpow2.f32 %v1101_v4  ;;  %v1010_v33 = vsub.f32 %v2477_v52, %v1000_v36 }
 0x196   : > { %1373 = vrot.lane.b32.xlu1 %v2552_v51, %s2203_s19  ;;  %2051 = vpow2.f32 %v1222_v30  ;;  %v1113_v43 = vmul.f32 1.442695, %v1099_v50 }
 0x197   : > { %2053 = vpow2.f32 %v1103_v9  ;;  %v1210_v42 = vpop.xlane.xlu1 %1209  ;;  %v1024_v35 = vmul.f32 1.442695, %v1010_v33 }
 0x198   : > { %2055 = vpow2.f32 %v1343_v15  ;;  %v2599_v38 = vpop.xlane.xlu0 %993  ;;  %v1220_v21 = vsub.f32 %v2477_v52, %v1210_v42 }
 0x199   : > { %2057 = vpow2.f32 %v1224_v16  ;;  %v2032_v16 = vld [vmem:[%s2871_s9] sm:$0xff]  }
 0x19a   : > { %2059 = vpow2.f32 %v1345_v20  ;;  %v1234_v56 = vmul.f32 1.442695, %v1220_v21  ;;  %1974 = vmatprep.subr.bf16.mxu0 %v2032_v16  ;;  %v1467_v20 = vpack.c.bf16 %v2370_v25, %v2367_v23 }
 0x19b   : > { %2061 = vpow2.f32 %v1012_v34  ;;  %v1331_v53 = vpop.xlane.xlu1 %1330  ;;  %1975 = vmatpush3.bf16.msra.mxu0 %v2032_v16 }
 0x19c   : > { %2063 = vpow2.f32 %v1014_v37  ;;  %v1092_v41 = vpop.xlane.xlu0 %1091  ;;  %v1341_v58 = vsub.f32 %v2477_v52, %v1331_v53  ;;  %v1468_v37 = vpack.c.bf16 %v2381_v32, %v2378_v31 }
 0x19d   : > { %v1100_v54 = vsub.f32 %v2493_v61, %v1092_v41  ;;  %2065 = vpow2.f32 %v1113_v43 }
 0x19e   : > { %2067 = vpow2.f32 %v1234_v56  ;;  %v1355_v1 = vmul.f32 1.442695, %v1341_v58  ;;  %1977 = vmatmul.mubr.msk.bf16.vlgmr.msra.gmra.mxu0 %vm651_vm1, %v1466_v18 }
 0x19f   : > { %v1115_v59 = vmul.f32 1.442695, %v1100_v54  ;;  %v1083_v8 = vpop.xlane.xlu1 %1082  ;;  %1980 = vmatprep.mubr.msk.bf16.mxu0 %vm651_vm1, %v1467_v20 }
 0x1a0   : > { %v1213_v17 = vpop.xlane.xlu0 %1212  ;;  %v1097_v14 = vsub.f32 %v2486_v57, %v1083_v8 }
 0x1a1   : > { %v2565_v7 = vpop.eup %2047  ;;  %v1221_v60 = vsub.f32 %v2493_v61, %v1213_v17  ;;  %2069 = vpow2.f32 %v1115_v59 }
 0x1a2   : > { %v1037_v3 = vsel %vm979_vm2, %v2565_v7, 0.0  ;;  %v2572_v22 = vpop.eup %2049  ;;  %2071 = vpow2.f32 %v1355_v1  ;;  %v1109_v32 = vmul.f32 1.442695, %v1097_v14 }
 0x1a3   : > { %v2576_v24 = vpop.eup %2051  ;;  %v1236_v12 = vmul.f32 1.442695, %v1221_v60  ;;  %v1204_v15 = vpop.xlane.xlu1 %1203 }
 0x1a4   : > { %v2578_v26 = vpop.eup %2053  ;;  %v1218_v18 = vsub.f32 %v2486_v57, %v1204_v15 }
 0x1a5   : > { %v2584_v27 = vpop.eup %2055  ;;  %2073 = vpow2.f32 %v1236_v12 }
 0x1a6   : > { %v2586_v28 = vpop.eup %2057  ;;  %1981 = vmatmul.mubr.msk.bf16.gmra.mxu0 %vm651_vm1, %v1468_v37 }
 0x1a7   : > { %v2592_v29 = vpop.eup %2059  ;;  %v1325_v34 = vpop.xlane.xlu1 %1324 }
 0x1a8   : > { %v2601_v40 = vpop.eup %2061 }
 0x1a9   : > { %v1028_v46 = vsel %vm979_vm2, %v2601_v40, 0.0  ;;  %v2608_v55 = vpop.eup %2063 }
 0x1aa   : > { %v1031_v63 = vsel %vm979_vm2, %v2608_v55, 0.0  ;;  %v2615_v5 = vpop.eup %2065 }
 0x1ab   : > { %v2619_v30 = vpop.eup %2067  ;;  %v1003_v39 = vpop.xlane.xlu1 %1002 }
 0x1ac   : > { %v1011_v23 = vsub.f32 %v2493_v61, %v1003_v39 }
 0x1ae   : > { %v2621_v9 = vpop.eup %2069  ;;  %v1026_v25 = vmul.f32 1.442695, %v1011_v23 }
 0x1b1   : > { %1035 = vadd.xlane.f32.xlu0 %v1034_v0  ;;  %v1334_v0 = vpop.xlane.xlu0 %1333 }
 0x1b2   : > { %v1342_v2 = vsub.f32 %v2493_v61, %v1334_v0  ;;  %v1230_v61 = vmul.f32 1.442695, %v1218_v18 }
 0x1b4   : > { %v1357_v4 = vmul.f32 1.442695, %v1342_v2  ;;  %v1008_v2 = vsub.f32 %v2486_v57, %v2599_v38 }
 0x1b5   : > { %v1086_v36 = vpop.xlane.xlu0 %1085 }
 0x1b6   : > { %2075 = vpow2.f32 %v1357_v4  ;;  %v1098_v41 = vsub.f32 %v2508_v6, %v1086_v36  ;;  %v997_v4 = vpop.xlane.xlu1 %996  ;;  %v1020_v8 = vmul.f32 1.442695, %v1008_v2 }
 0x1b7   : > { %2077 = vpow2.f32 %v1024_v35  ;;  %v1009_v15 = vsub.f32 %v2508_v6, %v997_v4 }
 0x1b8   : > { %2079 = vpow2.f32 %v1026_v25  ;;  %v1111_v50 = vmul.f32 1.442695, %v1098_v41 }
 0x1b9   : > { %v1207_v31 = vpop.xlane.xlu0 %1206  ;;  %2081 = vpow2.f32 %v1109_v32  ;;  %v1022_v20 = vmul.f32 1.442695, %v1009_v15 }
 0x1ba   : > { %1038 = vadd.xlane.f32.xlu1 %v1037_v3  ;;  %v2630_v3 = vpop.eup %2071  ;;  %v1219_v21 = vsub.f32 %v2508_v6, %v1207_v31  ;;  %2083 = vpow2.f32 %v1230_v61 }
 0x1bb   : > { %v2632_v11 = vpop.eup %2073  ;;  %2085 = vpow2.f32 %v1111_v50 }
 0x1bc   : > { %v1232_v54 = vmul.f32 1.442695, %v1219_v21 }
 0x1bd   : > { %v1328_v43 = vpop.xlane.xlu0 %1327 }
 0x1be   : > { %v1340_v56 = vsub.f32 %v2508_v6, %v1328_v43 }
 0x1c0   : > { %v1353_v58 = vmul.f32 1.442695, %v1340_v56 }
 0x1c3   : > { %v2641_v19 = vpop.eup %2075 }
 0x1c4   : > { %v2657_v52 = vpop.eup %2077 }
 0x1c5   : > { %v1046_v13 = vsel %vm979_vm2, %v2657_v52, 0.0  ;;  %v2664_v42 = vpop.eup %2079 }
 0x1c6   : > { %v1049_v17 = vsel %vm979_vm2, %v2664_v42, 0.0  ;;  %v2671_v59 = vpop.eup %2081 }
 0x1c7   : > { %1125 = vrot.lane.b32.xlu0 %v2572_v22, %s2201_s16  ;;  %v2675_v60 = vpop.eup %2083 }
 0x1cb   : > { %1246 = vrot.lane.b32.xlu0 %v2576_v24, %s2202_s18  ;;  %1127 = vrot.lane.b32.xlu1 %v2578_v26, %s2201_s16 }
 0x1cf   : > { %1367 = vrot.lane.b32.xlu0 %v2584_v27, %s2203_s19  ;;  %1248 = vrot.lane.b32.xlu1 %v2586_v28, %s2202_s18 }
 0x1d3   : > { %1369 = vrot.lane.b32.xlu1 %v2592_v29, %s2203_s19 }
 0x1ee   : > { %1029 = vadd.xlane.f32.xlu0 %v1028_v46  ;;  %v1339_v46 = vsub.f32 %v2486_v57, %v1325_v34 }
 0x1f0   : > { %v1351_v53 = vmul.f32 1.442695, %v1339_v46 }
 0x1f2   : > { %2087 = vpow2.f32 %v1351_v53 }
 0x1f3   : > { %2089 = vpow2.f32 %v1232_v54 }
 0x1f4   : > { %2091 = vpow2.f32 %v1353_v58 }
 0x1f5   : > { %2093 = vpow2.f32 %v1020_v8 }
 0x1f6   : > { %2095 = vpow2.f32 %v1022_v20 }
 0x1f7   : > { %1032 = vadd.xlane.f32.xlu1 %v1031_v63  ;;  %v2677_v63 = vpop.eup %2085 }
 0x1fc   : > { %v1130_v10 = vpop.permute.xlu1 %1129 }
 0x1fd   : > { %v1155_v25 = vsel %vm979_vm2, %v1130_v10, 0.0 }
 0x1ff   : > { %v2683_v0 = vpop.eup %2087 }
 0x200   : > { %v2685_v1 = vpop.eup %2089  ;;  %v1132_v16 = vpop.permute.xlu1 %1131 }
 0x201   : > { %v2691_v12 = vpop.eup %2091  ;;  %v1251_v33 = vpop.permute.xlu0 %1250  ;;  %v1158_v8 = vsel %vm979_vm2, %v1132_v16, 0.0 }
 0x202   : > { %v2698_v37 = vpop.eup %2093 }
 0x203   : > { %v1040_v57 = vsel %vm979_vm2, %v2698_v37, 0.0  ;;  %v2707_v36 = vpop.eup %2095 }
 0x204   : > { %1137 = vrot.lane.b32.xlu0 %v2615_v5, %s2201_s16  ;;  %v1253_v34 = vpop.permute.xlu1 %1252  ;;  %v1043_v18 = vsel %vm979_vm2, %v2707_v36, 0.0 }
 0x205   : > { %v1372_v35 = vpop.permute.xlu0 %1371  ;;  %v1279_v41 = vsel %vm979_vm2, %v1253_v34, 0.0 }
 0x206   : > { %v1397_v32 = vsel %vm979_vm2, %v1372_v35, 0.0 }
 0x208   : > { %1258 = vrot.lane.b32.xlu0 %v2619_v30, %s2202_s18  ;;  %1139 = vrot.lane.b32.xlu1 %v2621_v9, %s2201_s16  ;;  %v1374_v39 = vpop.permute.xlu1 %1373 }
 0x209   : > { %v1400_v21 = vsel %vm979_vm2, %v1374_v39, 0.0 }
 0x20c   : > { %1379 = vrot.lane.b32.xlu0 %v2630_v3, %s2203_s19  ;;  %1260 = vrot.lane.b32.xlu1 %v2632_v11, %s2202_s18 }
 0x210   : > { %1381 = vrot.lane.b32.xlu1 %v2641_v19, %s2203_s19 }
 0x22b   : > { %1047 = vadd.xlane.f32.xlu0 %v1046_v13  ;;  %v1276_v13 = vsel %vm979_vm2, %v1251_v33, 0.0 }
 0x234   : > { %1050 = vadd.xlane.f32.xlu1 %v1049_v17 }
 0x23a   : > { %v2700_v23 = vpop.xlane.xlu0 %1035 }
 0x23e   : > { %v1126_v6 = vpop.permute.xlu0 %1125 }
 0x23f   : > { %v1149_v46 = vsel %vm979_vm2, %v1126_v6, 0.0 }
 0x241   : > { %1133 = vrot.lane.b32.xlu0 %v2671_v59, %s2201_s16 }
 0x242   : > { %v1247_v31 = vpop.permute.xlu0 %1246 }
 0x243   : > { %v2704_v38 = vpop.xlane.xlu1 %1038  ;;  %v1270_v17 = vsel %vm979_vm2, %v1247_v31, 0.0 }
 0x245   : > { %1254 = vrot.lane.b32.xlu0 %v2675_v60, %s2202_s18  ;;  %1135 = vrot.lane.b32.xlu1 %v2677_v63, %s2201_s16 }
 0x246   : > { %v1368_v50 = vpop.permute.xlu0 %1367 }
 0x247   : > { %v1128_v14 = vpop.permute.xlu1 %1127  ;;  %v1391_v56 = vsel %vm979_vm2, %v1368_v50, 0.0 }
 0x248   : > { %v1152_v54 = vsel %vm979_vm2, %v1128_v14, 0.0 }
 0x249   : > { %1375 = vrot.lane.b32.xlu0 %v2683_v0, %s2203_s19  ;;  %1256 = vrot.lane.b32.xlu1 %v2685_v1, %s2202_s18 }
 0x24b   : > { %v1249_v61 = vpop.permute.xlu1 %1248 }
 0x24c   : > { %v1273_v2 = vsel %vm979_vm2, %v1249_v61, 0.0 }
 0x24d   : > { %1377 = vrot.lane.b32.xlu1 %v2691_v12, %s2203_s19  ;;  %s597_s19 = scalar_lea.vmem %s2875_s13, %s1858_s24 }
 0x24f   : > { %v1370_v43 = vpop.permute.xlu1 %1369 }
 0x250   : > { %v1394_v15 = vsel %vm979_vm2, %v1370_v43, 0.0 }
 0x268   : > { %1041 = vadd.xlane.f32.xlu0 %v1040_v57 }
 0x26c   : > { %1156 = vadd.xlane.f32.xlu0 %v1155_v25 }
 0x270   : > { %1277 = vadd.xlane.f32.xlu0 %v1276_v13 }
 0x271   : > { %1044 = vadd.xlane.f32.xlu1 %v1043_v18 }
 0x274   : > { %1398 = vadd.xlane.f32.xlu0 %v1397_v32 }
 0x275   : > { %1280 = vadd.xlane.f32.xlu1 %v1279_v41 }
 0x277   : > { %v2717_v53 = vpop.xlane.xlu0 %1029 }
 0x278   : > { %1150 = vadd.xlane.f32.xlu0 %v1149_v46 }
 0x279   : > { %1401 = vadd.xlane.f32.xlu1 %v1400_v21 }
 0x27b   : > { %v1138_v4 = vpop.permute.xlu0 %1137 }
 0x27c   : > { %1271 = vadd.xlane.f32.xlu0 %v1270_v17  ;;  %v1167_v20 = vsel %vm979_vm2, %v1138_v4, 0.0  ;;  %v1978_v4 = vpop.f32.mrf.mxu0 }
 0x27d   : > { %1153 = vadd.xlane.f32.xlu1 %v1152_v54 }
 0x27f   : > { %v1259_v33 = vpop.permute.xlu0 %1258 }
 0x280   : > { %v2721_v58 = vpop.xlane.xlu1 %1032  ;;  %1392 = vadd.xlane.f32.xlu0 %v1391_v56  ;;  %v1288_v39 = vsel %vm979_vm2, %v1259_v33, 0.0 }
 0x281   : > { %1274 = vadd.xlane.f32.xlu1 %v1273_v2 }
 0x283   : > { %v1380_v16 = vpop.permute.xlu0 %1379 }
 0x284   : > { %v1140_v10 = vpop.permute.xlu1 %1139  ;;  %1159 = vadd.xlane.f32.xlu0 %v1158_v8  ;;  %v1409_v17 = vsel %vm979_vm2, %v1380_v16, 0.0  ;;  %v1538_v8 = vpop.f32.mrf.mxu0 }
 0x285   : > { %1395 = vadd.xlane.f32.xlu1 %v1394_v15  ;;  %v1170_v34 = vsel %vm979_vm2, %v1140_v10, 0.0  ;;  %v1882_v15 = vld [vmem:[%s2872_s10] ss:$0 sm:$0xff] }
 0x286   : > { %v1979_v10 = vpop.f32.mrf.mxu0  ;;  %v1547_v33 = vadd.f32 %v1978_v4, %v1882_v15 }
 0x288   : > { %1168 = vadd.xlane.f32.xlu0 %v1167_v20  ;;  %v1261_v35 = vpop.permute.xlu1 %1260  ;;  %v1541_v20 = vpop.f32.mrf.mxu0  ;;  %v1901_v16 = vpack.c.bf16 %v1547_v33, %v1547_v33 }
 0x289   : > { %1171 = vadd.xlane.f32.xlu1 %v1170_v34  ;;  %v1291_v57 = vsel %vm979_vm2, %v1261_v35, 0.0  ;;  %v1539_v34 = vadd.f32 %v1882_v15, %v1538_v8  ;;  %v1550_v35 = vadd.f32 %v1979_v10, %v1882_v15 }
 0x28a   : > { %1604 = vst.msk [vmem:[%s597_s19 + $0x8] sm:$0xf] %vm1601_vm6, %v1901_v16 }
 0x28c   : > { %1289 = vadd.xlane.f32.xlu0 %v1288_v39  ;;  %v1382_v13 = vpop.permute.xlu1 %1381  ;;  %v1542_v39 = vadd.f32 %v1882_v15, %v1541_v20 }
 0x28d   : > { %1292 = vadd.xlane.f32.xlu1 %v1291_v57  ;;  %v1412_v2 = vsel %vm979_vm2, %v1382_v13, 0.0  ;;  %v1982_v57 = vpop.f32.mrf.mxu0 }
 0x28f   : > { %v1554_v13 = vpop.f32.mrf.mxu0 }
 0x2b4   : > { %v2730_v25 = vpop.xlane.xlu0 %1047 }
 0x2b8   : > { %v1134_v6 = vpop.permute.xlu0 %1133 }
 0x2b9   : > { %v1161_v14 = vsel %vm979_vm2, %v1134_v6, 0.0  ;;  %v1899_v6 = vpack.c.bf16 %v1539_v34, %v1539_v34 }
 0x2ba   : > { %1162 = vadd.xlane.f32.xlu0 %v1161_v14  ;;  %v1902_v14 = vpack.c.bf16 %v1550_v35, %v1550_v35 }
 0x2bb   : > { %1602 = vst.msk [vmem:[%s597_s19] sm:$0xf] %vm1601_vm6, %v1899_v6 }
 0x2bc   : > { %v1255_v18 = vpop.permute.xlu0 %1254  ;;  %1605 = vst.msk [vmem:[%s597_s19 + $0xc] sm:$0xf] %vm1601_vm6, %v1902_v14 }
 0x2bd   : > { %v2733_v31 = vpop.xlane.xlu1 %1050  ;;  %v1282_v32 = vsel %vm979_vm2, %v1255_v18, 0.0  ;;  %v1900_v18 = vpack.c.bf16 %v1542_v39, %v1542_v39 }
 0x2be   : > { %1283 = vadd.xlane.f32.xlu0 %v1282_v32  ;;  %v1983_v32 = vpop.f32.mrf.mxu0 }
 0x2bf   : > { %1603 = vst.msk [vmem:[%s597_s19 + $0x4] sm:$0xf] %vm1601_vm6, %v1900_v18 }
 0x2c0   : > { %v1376_v41 = vpop.permute.xlu0 %1375 }
 0x2c1   : > { %v1136_v61 = vpop.permute.xlu1 %1135  ;;  %v1403_v46 = vsel %vm979_vm2, %v1376_v41, 0.0  ;;  %v1557_v41 = vpop.f32.mrf.mxu0 }
 0x2c2   : > { %1404 = vadd.xlane.f32.xlu0 %v1403_v46  ;;  %v1164_v50 = vsel %vm979_vm2, %v1136_v61, 0.0  ;;  %v1563_v61 = vadd.f32 %v1982_v57, %v1882_v15  ;;  %v1555_v46 = vadd.f32 %v1882_v15, %v1554_v13 }
 0x2c3   : > { %1165 = vadd.xlane.f32.xlu1 %v1164_v50  ;;  %v1566_v50 = vadd.f32 %v1983_v32, %v1882_v15 }
 0x2c5   : > { %v1257_v21 = vpop.permute.xlu1 %1256 }
 0x2c6   : > { %1410 = vadd.xlane.f32.xlu0 %v1409_v17  ;;  %v1285_v43 = vsel %vm979_vm2, %v1257_v21, 0.0  ;;  %v1558_v21 = vadd.f32 %v1882_v15, %v1557_v41  ;;  %v1905_v17 = vpack.c.bf16 %v1563_v61, %v1563_v61 }
 0x2c7   : > { %1286 = vadd.xlane.f32.xlu1 %v1285_v43  ;;  %v1903_v43 = vpack.c.bf16 %v1555_v46, %v1555_v46 }
 0x2c8   : > { %1608 = vst.msk [vmem:[%s597_s19 + $0x18] sm:$0xf] %vm1601_vm6, %v1905_v17 }
 0x2c9   : > { %v1378_v54 = vpop.permute.xlu1 %1377  ;;  %1606 = vst.msk [vmem:[%s597_s19 + $0x10] sm:$0xf] %vm1601_vm6, %v1903_v43 }
 0x2ca   : > { %v1406_v56 = vsel %vm979_vm2, %v1378_v54, 0.0  ;;  %v1906_v54 = vpack.c.bf16 %v1566_v50, %v1566_v50 }
 0x2cb   : > { %1407 = vadd.xlane.f32.xlu1 %v1406_v56  ;;  %v1904_v56 = vpack.c.bf16 %v1558_v21, %v1558_v21 }
 0x2cc   : > { %1609 = vst.msk [vmem:[%s597_s19 + $0x1c] sm:$0xf] %vm1601_vm6, %v1906_v54 }
 0x2cd   : > { %1607 = vst.msk [vmem:[%s597_s19 + $0x14] sm:$0xf] %vm1601_vm6, %v1904_v56 }
 0x2cf   : > { %1413 = vadd.xlane.f32.xlu1 %v1412_v2 }
 0x2f1   : > { %v2757_v2 = vpop.xlane.xlu0 %1041 }
 0x2f5   : > { %v1157_v4 = vpop.xlane.xlu0 %1156 }
 0x2f6   : > { %2097 = vrcp.f32 %v1157_v4 }
 0x2f7   : > { %2099 = vrcp.f32 %v2700_v23 }
 0x2f9   : > { %v1278_v8 = vpop.xlane.xlu0 %1277 }
 0x2fa   : > { %2101 = vrcp.f32 %v1278_v8  ;;  %v2760_v10 = vpop.xlane.xlu1 %1044 }
 0x2fd   : > { %v1399_v15 = vpop.xlane.xlu0 %1398 }
 0x2fe   : > { %2103 = vrcp.f32 %v1399_v15  ;;  %v1281_v20 = vpop.xlane.xlu1 %1280 }
 0x301   : > { %v1151_v33 = vpop.xlane.xlu0 %1150 }
 0x302   : > { %v1402_v34 = vpop.xlane.xlu1 %1401  ;;  %2105 = vrcp.f32 %v1151_v33 }
 0x303   : > { %v2098_v35 = vpop.eup %2097  ;;  %2107 = vrcp.f32 %v2717_v53 }
 0x304   : > { %v2100_v57 = vpop.eup %2099  ;;  %v1183_v23 = vmul.f32 %v2098_v35, %v2532_v44 }
 0x305   : > { %v1272_v39 = vpop.xlane.xlu0 %1271  ;;  %v1062_v13 = vmul.f32 %v2100_v57, %v2558_v62 }
 0x306   : > { %2109 = vrcp.f32 %v1272_v39  ;;  %v1154_v16 = vpop.xlane.xlu1 %1153 }
 0x307   : > { %v2102_v6 = vpop.eup %2101  ;;  %2111 = vrcp.f32 %v2704_v38  ;;  %v1433_v38 = vsel %vm979_vm2, %v1062_v13, %v1183_v23 }
 0x308   : > { %2113 = vrcp.f32 %v2721_v58  ;;  %v1304_v14 = vmul.f32 %v2102_v6, %v2538_v47 }
 0x309   : > { %2115 = vrcp.f32 %v1154_v16  ;;  %v1393_v18 = vpop.xlane.xlu0 %1392 }
 0x30a   : > { %2117 = vrcp.f32 %v1393_v18  ;;  %v1275_v53 = vpop.xlane.xlu1 %1274  ;;  %v1441_v47 = vsel %vm753_vm0, %v1433_v38, %v1304_v14 }
 0x30b   : > { %v2104_v32 = vpop.eup %2103  ;;  %2119 = vrcp.f32 %v1275_v53 }
 0x30c   : > { %v1425_v44 = vmul.f32 %v2104_v32, %v2546_v49  ;;  %2121 = vrcp.f32 %v1281_v20 }
 0x30d   : > { %2123 = vrcp.f32 %v1402_v34  ;;  %v1160_v62 = vpop.xlane.xlu0 %1159 }
 0x30e   : > { %v1450_v58 = vsel %vm1447_vm7, %v1441_v47, %v1425_v44  ;;  %2125 = vrcp.f32 %v1160_v62  ;;  %v1396_v41 = vpop.xlane.xlu1 %1395 }
 0x30f   : > { %1459 = vst.msk [vmem:[%s2772_s21 + $0x10] sm:$0xff] %vm1456_vm8, %v1450_v58  ;;  %2127 = vrcp.f32 %v1396_v41  ;;  %v2106_v61 = vpop.eup %2105 }
 0x310   : > { %v2108_v46 = vpop.eup %2107  ;;  %v1181_v17 = vmul.f32 %v2106_v61, %v2572_v22 }
 0x311   : > { %v1060_v56 = vmul.f32 %v2108_v46, %v2601_v40 }
 0x312   : > { %v1172_v32 = vpop.xlane.xlu1 %1171 }
 0x313   : > { %v2110_v50 = vpop.eup %2109  ;;  %v1431_v15 = vsel %vm979_vm2, %v1060_v56, %v1181_v17 }
 0x314   : > { %v2112_v21 = vpop.eup %2111  ;;  %v1302_v49 = vmul.f32 %v2110_v50, %v2576_v24 }
 0x315   : > { %v2114_v43 = vpop.eup %2113 }
 0x316   : > { %v2116_v54 = vpop.eup %2115  ;;  %v1439_v34 = vsel %vm753_vm0, %v1431_v15, %v1302_v49  ;;  %v1061_v40 = vmul.f32 %v2114_v43, %v2608_v55  ;;  %v1293_v38 = vpop.xlane.xlu1 %1292 }
 0x317   : > { %v2118_v4 = vpop.eup %2117  ;;  %v1182_v35 = vmul.f32 %v2116_v54, %v2578_v26 }
 0x318   : > { %v2120_v8 = vpop.eup %2119  ;;  %v1423_v20 = vmul.f32 %v2118_v4, %v2584_v27  ;;  %v1063_v27 = vmul.f32 %v2112_v21, %v2565_v7 }
 0x319   : > { %v2122_v33 = vpop.eup %2121  ;;  %v1303_v57 = vmul.f32 %v2120_v8, %v2586_v28  ;;  %v1432_v26 = vsel %vm979_vm2, %v1061_v40, %v1182_v35 }
 0x31a   : > { %v2124_v39 = vpop.eup %2123  ;;  %v1448_v22 = vsel %vm1447_vm7, %v1439_v34, %v1423_v20  ;;  %v1305_v23 = vmul.f32 %v2122_v33, %v2544_v48 }
 0x31b   : > { %v2126_v24 = vpop.eup %2125  ;;  %1457 = vst.msk [vmem:[%s2772_s21] sm:$0xff] %vm1456_vm8, %v1448_v22  ;;  %v1426_v28 = vmul.f32 %v2124_v39, %v2552_v51  ;;  %v1440_v18 = vsel %vm753_vm0, %v1432_v26, %v1303_v57 }
 0x31c   : > { %v2128_v16 = vpop.eup %2127  ;;  %v1184_v6 = vmul.f32 %v2126_v24, %v2536_v45  ;;  %v1169_v45 = vpop.xlane.xlu0 %1168 }
 0x31d   : > { %v1424_v14 = vmul.f32 %v2128_v16, %v2592_v29 }
 0x31e   : > { %v1434_v13 = vsel %vm979_vm2, %v1063_v27, %v1184_v6 }
 0x31f   : > { %v1442_v55 = vsel %vm753_vm0, %v1434_v13, %v1305_v23  ;;  %v1449_v53 = vsel %vm1447_vm7, %v1440_v18, %v1424_v14 }
 0x320   : > { %v1451_v7 = vsel %vm1447_vm7, %v1442_v55, %v1426_v28  ;;  %1458 = vst.msk [vmem:[%s2772_s21 + $0x8] sm:$0xff] %vm1456_vm8, %v1449_v53  ;;  %v1290_v48 = vpop.xlane.xlu0 %1289 }
 0x321   : > { %1460 = vst.msk [vmem:[%s2772_s21 + $0x18] sm:$0xff] %vm1456_vm8, %v1451_v7 }
 0x343   : > { %v1163_v29 = vpop.xlane.xlu0 %1162 }
 0x344   : > { %2129 = vrcp.f32 %v1163_v29 }
 0x345   : > { %2131 = vrcp.f32 %v2757_v2 }
 0x347   : > { %v1284_v51 = vpop.xlane.xlu0 %1283 }
 0x348   : > { %2133 = vrcp.f32 %v1284_v51 }
 0x349   : > { %2135 = vrcp.f32 %v2730_v25 }
 0x34a   : > { %2137 = vrcp.f32 %v1169_v45 }
 0x34b   : > { %2139 = vrcp.f32 %v1290_v48  ;;  %v1405_v44 = vpop.xlane.xlu0 %1404 }
 0x34c   : > { %2141 = vrcp.f32 %v1405_v44  ;;  %v1166_v47 = vpop.xlane.xlu1 %1165 }
 0x34d   : > { %2143 = vrcp.f32 %v2760_v10 }
 0x34e   : > { %2145 = vrcp.f32 %v1166_v47 }
 0x34f   : > { %v1411_v62 = vpop.xlane.xlu0 %1410 }
 0x350   : > { %2147 = vrcp.f32 %v1411_v62  ;;  %v1287_v58 = vpop.xlane.xlu1 %1286 }
 0x351   : > { %2149 = vrcp.f32 %v1287_v58  ;;  %v2130_v2 = vpop.eup %2129 }
 0x352   : > { %2151 = vrcp.f32 %v2733_v31  ;;  %v2132_v41 = vpop.eup %2131  ;;  %v1185_v50 = vmul.f32 %v2130_v2, %v2671_v59 }
 0x353   : > { %2153 = vrcp.f32 %v1172_v32  ;;  %v1064_v43 = vmul.f32 %v2132_v41, %v2698_v37 }
 0x354   : > { %2155 = vrcp.f32 %v1293_v38  ;;  %v1408_v61 = vpop.xlane.xlu1 %1407 }
 0x355   : > { %v2134_v25 = vpop.eup %2133  ;;  %2157 = vrcp.f32 %v1408_v61  ;;  %v1435_v56 = vsel %vm979_vm2, %v1064_v43, %v1185_v50 }
 0x356   : > { %v2136_v46 = vpop.eup %2135  ;;  %v1306_v10 = vmul.f32 %v2134_v25, %v2675_v60 }
 0x357   : > { %v2138_v21 = vpop.eup %2137  ;;  %v1066_v60 = vmul.f32 %v2136_v46, %v2657_v52 }
 0x358   : > { %v2140_v17 = vpop.eup %2139  ;;  %v1414_v49 = vpop.xlane.xlu1 %1413  ;;  %v1187_v31 = vmul.f32 %v2138_v21, %v2615_v5  ;;  %v1443_v59 = vsel %vm753_vm0, %v1435_v56, %v1306_v10 }
 0x359   : > { %v2142_v54 = vpop.eup %2141  ;;  %2159 = vrcp.f32 %v1414_v49  ;;  %v1308_v15 = vmul.f32 %v2140_v17, %v2619_v30 }
 0x35a   : > { %v1427_v4 = vmul.f32 %v2142_v54, %v2683_v0  ;;  %v2144_v8 = vpop.eup %2143  ;;  %v1437_v5 = vsel %vm979_vm2, %v1066_v60, %v1187_v31 }
 0x35b   : > { %v2146_v20 = vpop.eup %2145  ;;  %v1445_v39 = vsel %vm753_vm0, %v1437_v5, %v1308_v15  ;;  %v1065_v40 = vmul.f32 %v2144_v8, %v2707_v36 }
 0x35c   : > { %v1452_v37 = vsel %vm1447_vm7, %v1443_v59, %v1427_v4  ;;  %v1186_v30 = vmul.f32 %v2146_v20, %v2677_v63 }
 0x35d   : > { %v2148_v33 = vpop.eup %2147  ;;  %1461 = vst.msk [vmem:[%s2772_s21 + $0x20] sm:$0xff] %vm1456_vm8, %v1452_v37 }
 0x35e   : > { %v2150_v34 = vpop.eup %2149  ;;  %v1429_v35 = vmul.f32 %v2148_v33, %v2630_v3  ;;  %v1436_v27 = vsel %vm979_vm2, %v1065_v40, %v1186_v30 }
 0x35f   : > { %v2152_v0 = vpop.eup %2151  ;;  %v1307_v52 = vmul.f32 %v2150_v34, %v2685_v1 }
 0x360   : > { %v2154_v22 = vpop.eup %2153  ;;  %v1454_v57 = vsel %vm1447_vm7, %v1445_v39, %v1429_v35  ;;  %v1067_v26 = vmul.f32 %v2152_v0, %v2664_v42 }
 0x361   : > { %v2156_v24 = vpop.eup %2155  ;;  %1463 = vst.msk [vmem:[%s2772_s21 + $0x30] sm:$0xff] %vm1456_vm8, %v1454_v57  ;;  %v1188_v3 = vmul.f32 %v2154_v22, %v2621_v9  ;;  %v1444_v23 = vsel %vm753_vm0, %v1436_v27, %v1307_v52 }
 0x362   : > { %v2158_v16 = vpop.eup %2157  ;;  %v1309_v63 = vmul.f32 %v2156_v24, %v2632_v11 }
 0x363   : > { %v1428_v6 = vmul.f32 %v2158_v16, %v2691_v12  ;;  %v1438_v36 = vsel %vm979_vm2, %v1067_v26, %v1188_v3 }
 0x364   : > { %v1446_v9 = vsel %vm753_vm0, %v1438_v36, %v1309_v63 }
 0x365   : > { %v1453_v1 = vsel %vm1447_vm7, %v1444_v23, %v1428_v6 }
 0x366   : > { %v2160_v14 = vpop.eup %2159  ;;  %1462 = vst.msk [vmem:[%s2772_s21 + $0x28] sm:$0xff] %vm1456_vm8, %v1453_v1 }
 0x367   : > { %v1430_v28 = vmul.f32 %v2160_v14, %v2641_v19 }
 0x369   : > { %v1455_v18 = vsel %vm1447_vm7, %v1446_v9, %v1430_v28 }
 0x36a   : > { %1464 = vst.msk [vmem:[%s2772_s21 + $0x38] sm:$0xff] %vm1456_vm8, %v1455_v18 }
 0x36b PF: > { %s24_s29 = sadd.s32 1, %s2199_s29   ;;  %s2876_s25 = smov %s2191_s27 }
 0x36c   : > { %p21_p7 = scmp.ge.s32.totalorder %s24_s29, 6   ;;  %s2877_s26 = smov %s2195_s28 }
 0x36d   : > { %s2878_s27 = smov %s2881_s30  ;;  %s2879_s28 = smov %s2885_s14 }
 0x36e   :  { %23 = sbr.rel (!%p21_p7) target bundleno = 3 (0x3), region = 124 }

// kernel: deformable_transformer_encoder_forward.5
= control target key start
LH: loop header
LB: loop body
LE: loop exit
PB: predicated region body
PF: predicated region fallthrough
CT: control target
= control target key end

     0   :  { %s1605_s21 = smov 0   ;;  %s1607_s22 = smov 0   ;;  %s1968_s0 = inlined_call_operand.vmem [shape: f32[2,128,32], index: 0, kind: input, shape index: {}, may-alias: {0,12}]   ;;  %s1969_s1 = inlined_call_operand.vmem [shape: bf16[2,128,32], index: 1, kind: input, shape index: {}]   ;;  %s1970_s2 = inlined_call_operand.vmem [shape: bf16[32,32], index: 2, kind: input, shape index: {}]   ;;  %s1971_s3 = inlined_call_operand.vmem [shape: f32[1,32], index: 3, kind: input, shape index: {}, may-alias: {3,5,9,11}]   ;;  %s1972_s4 = inlined_call_operand.vmem [shape: f32[1,32], index: 4, kind: input, shape index: {}, may-alias: {4,10}]   ;;  %s1973_s5 = inlined_call_operand.vmem [shape: f32[1,32], index: 5, kind: input, shape index: {}, may-alias: {3,5,9,11}]   ;;  %s1974_s6 = inlined_call_operand.vmem [shape: bf16[32,64], index: 6, kind: input, shape index: {}]   ;;  %s1975_s7 = inlined_call_operand.vmem [shape: f32[1,64], index: 7, kind: input, shape index: {}]   ;;  %s1976_s8 = inlined_call_operand.vmem [shape: bf16[64,32], index: 8, kind: input, shape index: {}]   ;;  %s1977_s9 = inlined_call_operand.vmem [shape: f32[1,32], index: 9, kind: input, shape index: {}, may-alias: {3,5,9,11}]   ;;  %s1978_s10 = inlined_call_operand.vmem [shape: f32[1,32], index: 10, kind: input, shape index: {}, may-alias: {4,10}]   ;;  %s1979_s11 = inlined_call_operand.vmem [shape: f32[1,32], index: 11, kind: input, shape index: {}, may-alias: {3,5,9,11}]   ;;  %s1980_s12 = inlined_call_operand.vmem [shape: f32[2,128,32], index: 12, kind: output, shape index: {}, may-alias: {0,12}]  }
   0x1   :  { %s1609_s23 = smov 0   ;;  %s1611_s24 = smov 0  }
   0x2   :  { %s1613_s25 = smov 0  }
   0x3 LB: > { %s31_s26 = sadd.s32 1, %s1530_s23  ;;  %s34_s27 = sadd.s32 1, %s1534_s24  ;;  %s1538_s25 = sphi %s1613_s25, %s22_s25   ;;  %s1534_s24 = sphi %s1611_s24, %s1984_s24   ;;  %s1530_s23 = sphi %s1609_s23, %s1983_s23   ;;  %s1526_s22 = sphi %s1607_s22, %s1982_s22   ;;  %s1522_s21 = sphi %s1605_s21, %s1981_s21  }
   0x4   : > { %p32_p0 = scmp.ge.s32.totalorder %s31_s26, 2  ;;  %p1305_p1 = scmp.ge.s32.totalorder %s1538_s25, 1 }
   0x5   : > { %p400_p2 = scmp.lt.s32.totalorder %s1538_s25, 5 }
   0x6   : > { %s1986_s26 = smov (%p32_p0, %s31_s26), 0  ;;  %s1988_s27 = smov (!%p32_p0, %s34_s27), %s1534_s24 }
   0x7   : > { %p401_p3 = pnand %p1305_p1, %p400_p2  ;;  %p36_p4 = scmp.ge.s32.totalorder %s1988_s27, 2 }
   0x8   : > { %s1306_s30 = sshll.u32 (!%p401_p3), %s1522_s21, 3  ;;  %p460_p5 = scmp.lt.s32.totalorder (!%p401_p3), %s1526_s22, 1 }
   0x9   : > { %s1990_s27 = smov (%p36_p4, %s1988_s27), 0  ;;  %404 = sbr.rel (%p401_p3) target bundleno = 1005 (0x3ed), region = 68 }
   0xa   : > { %p462_p6 = scmp.lt.s32.totalorder (!%p401_p3), %s1306_s30, 15 }
   0xe   : > { %v1456_v0 = vld [vmem:[%s1970_s2 + $0x8] sm:$0xff]   ;;  %v1457_v1 = vld [vmem:[%s1970_s2] sm:$0xff]   ;;  %s1992_s22 = smov (!%p460_p5, %s1526_s22), 1  ;;  %s1994_s30 = smov (!%p462_p6, %s1306_s30), 15  ;;  %vm542_vm0 = vcmask 261120   ;;  %vm949_vm1 = vcmask 523264  }
   0xf   : > { %1368 = vmatprep.subr.bf16.mxu0 %v1456_v0  ;;  %s1307_s15 = sshll.u32 %s1992_s22, 4  ;;  %v1325_v8 = vld [vmem:[%s1971_s3] ss:$0 sm:$0xff]  ;;  %v1462_v63 = vld [vmem:[%s1974_s6 + $0x8] sm:$0xff]  }
  0x10   : > { %1369 = vmatpush3.bf16.msra.mxu0 %v1456_v0  ;;  %s1641_s16 = sadd.s32 %s1307_s15, %s1994_s30  ;;  %v1463_v0 = vld [vmem:[%s1974_s6] sm:$0xff]   ;;  %1380 = vmatprep.subr.bf16.mxu1 %v1462_v63 }
  0x11   : > { %1370 = vmatprep.subr.bf16.mxu0 %v1457_v1  ;;  %s1311_s17 = sshll.u32 %s1641_s16, 2  ;;  %s1308_s21 = sshll.u32 %s1641_s16, 3  ;;  %1381 = vmatpush3.bf16.msra.mxu1 %v1462_v63 }
  0x12   : > { %s477_s20 = scalar_lea.vmem %s1969_s1, %s1311_s17  ;;  %s1657_s29 = scalar_lea.vmem %s1968_s0, %s1308_s21  ;;  %1382 = vmatprep.subr.bf16.mxu1 %v1463_v0 }
  0x13   : > { %v1458_v2 = vld [vmem:[%s477_s20] sm:$0xff]   ;;  %v1459_v3 = vld [vmem:[%s477_s20 + $0x8] sm:$0xff]   ;;  %v1460_v4 = vld [vmem:[%s477_s20 + $0x10] sm:$0xff]   ;;  %s1919_s19 = scalar_lea.vmem %s1980_s12, %s1308_s21 }
  0x14   : > { %1371 = vmatpush3.bf16.msra.mxu0 %v1457_v1  ;;  %1372 = vmatprep.mubr.msk.bf16.mxu0 %vm542_vm0, %v1458_v2  ;;  %v1461_v5 = vld [vmem:[%s477_s20 + $0x18] sm:$0xff]   ;;  %v492_v6 = vld [vmem:[%s1657_s29 + $0x10] sm:$0xff]  ;;  %v490_v9 = vld [vmem:[%s1657_s29] sm:$0xff] }
  0x15   : > { %v493_v12 = vld [vmem:[%s1657_s29 + $0x18] sm:$0xff]  ;;  %v491_v16 = vld [vmem:[%s1657_s29 + $0x8] sm:$0xff]  ;;  %v496_v29 = vld [vmem:[%s1657_s29 + $0x30] sm:$0xff]  ;;  %1383 = vmatpush3.bf16.msra.mxu1 %v1463_v0 }
  0x16   : > { %v497_v31 = vld [vmem:[%s1657_s29 + $0x38] sm:$0xff]  ;;  %v495_v39 = vld [vmem:[%s1657_s29 + $0x28] sm:$0xff]  ;;  %v494_v43 = vld [vmem:[%s1657_s29 + $0x20] sm:$0xff] }
  0x17   : > { %1373 = vmatmul.mubr.msk.bf16.vlgmr.msra.gmra.mxu0 %vm542_vm0, %v1459_v3  ;;  %v1735_v1 = vld [vmem:[%s1976_s8 + $0x18] sm:$0xff]  }
  0x18   : > { %1376 = vmatprep.mubr.msk.bf16.mxu0 %vm542_vm0, %v1460_v4  ;;  %1392 = vmatprep.subr.bf16.mxu0 %v1735_v1 }
  0x19   : > { %1408 = vmatprep.subr.bf16.mxu1 %v1735_v1  ;;  %1393 = vmatpush3.bf16.msra.mxu0 %v1735_v1 }
  0x1f   : > { %1377 = vmatmul.mubr.msk.bf16.gmra.mxu0 %vm542_vm0, %v1461_v5 }
  0xd7   : > { %v1374_v7 = vpop.f32.mrf.mxu0 }
  0xd8   : > { %v622_v10 = vadd.f32 %v1374_v7, %v492_v6 }
  0xd9   : > { %v589_v11 = vpop.f32.mrf.mxu0 }
  0xda   : > { %v1665_v13 = vadd.f32 %v1325_v8, %v622_v10  ;;  %v620_v14 = vadd.f32 %v589_v11, %v490_v9 }
  0xdb   : > { %v1375_v15 = vpop.f32.mrf.mxu0 }
  0xdc   : > { %v1668_v17 = vadd.f32 %v1325_v8, %v620_v14  ;;  %v623_v18 = vadd.f32 %v1375_v15, %v493_v12  ;;  %v651_v19 = vsel %vm542_vm0, %v1665_v13, 0.0  ;;  %v680_v24 = vmul.f32 %v1665_v13, %v1665_v13 }
  0xdd   : > { %v592_v20 = vpop.f32.mrf.mxu0  ;;  %652 = vadd.xlane.f32.xlu1 %v651_v19 }
  0xde   : > { %v1672_v21 = vadd.f32 %v1325_v8, %v623_v18  ;;  %v621_v22 = vadd.f32 %v592_v20, %v491_v16  ;;  %v645_v23 = vsel %vm542_vm0, %v1668_v17, 0.0  ;;  %v692_v32 = vsel %vm542_vm0, %v680_v24, 0.0 }
  0xdf   : > { %646 = vadd.xlane.f32.xlu0 %v645_v23  ;;  %v1378_v25 = vpop.f32.mrf.mxu0  ;;  %v678_v33 = vmul.f32 %v1668_v17, %v1668_v17 }
  0xe0   : > { %v1678_v26 = vadd.f32 %v1325_v8, %v621_v22  ;;  %v654_v27 = vsel %vm542_vm0, %v1672_v21, 0.0  ;;  %v681_v28 = vmul.f32 %v1672_v21, %v1672_v21  ;;  %v626_v35 = vadd.f32 %v1378_v25, %v496_v29 }
  0xe1   : > { %655 = vadd.xlane.f32.xlu1 %v654_v27  ;;  %v605_v30 = vpop.f32.mrf.mxu0  ;;  %v686_v42 = vsel %vm542_vm0, %v678_v33, 0.0 }
  0xe2   : > { %v695_v36 = vsel %vm542_vm0, %v681_v28, 0.0  ;;  %v679_v38 = vmul.f32 %v1678_v26, %v1678_v26  ;;  %v1697_v44 = vadd.f32 %v1325_v8, %v626_v35  ;;  %v624_v47 = vadd.f32 %v605_v30, %v494_v43 }
  0xe3   : > { %693 = vadd.xlane.f32.xlu0 %v692_v32  ;;  %v1379_v34 = vpop.f32.mrf.mxu0  ;;  %v648_v48 = vsel %vm542_vm0, %v1678_v26, 0.0 }
  0xe4   : > { %v627_v37 = vadd.f32 %v1379_v34, %v497_v31  ;;  %v689_v46 = vsel %vm542_vm0, %v679_v38, 0.0  ;;  %v663_v51 = vsel %vm542_vm0, %v1697_v44, 0.0  ;;  %v1708_v52 = vadd.f32 %v1325_v8, %v624_v47 }
  0xe5   : > { %696 = vadd.xlane.f32.xlu1 %v695_v36  ;;  %v608_v40 = vpop.f32.mrf.mxu0  ;;  %v684_v60 = vmul.f32 %v1697_v44, %v1697_v44 }
  0xe6   : > { %v1693_v41 = vadd.f32 %v1325_v8, %v627_v37  ;;  %v625_v45 = vadd.f32 %v608_v40, %v495_v39  ;;  %v657_v55 = vsel %vm542_vm0, %v1708_v52, 0.0  ;;  %v682_v56 = vmul.f32 %v1708_v52, %v1708_v52 }
  0xe7   : > { %687 = vadd.xlane.f32.xlu0 %v686_v42  ;;  %v704_v62 = vsel %vm542_vm0, %v684_v60, 0.0 }
  0xe8   : > { %v666_v49 = vsel %vm542_vm0, %v1693_v41, 0.0  ;;  %v1704_v50 = vadd.f32 %v1325_v8, %v625_v45  ;;  %v685_v58 = vmul.f32 %v1693_v41, %v1693_v41  ;;  %v698_v59 = vsel %vm542_vm0, %v682_v56, 0.0 }
  0xe9   : > { %690 = vadd.xlane.f32.xlu1 %v689_v46 }
  0xea   : > { %v660_v53 = vsel %vm542_vm0, %v1704_v50, 0.0  ;;  %v683_v54 = vmul.f32 %v1704_v50, %v1704_v50  ;;  %v707_v61 = vsel %vm542_vm0, %v685_v58, 0.0 }
  0xeb   : > { %649 = vadd.xlane.f32.xlu0 %v648_v48 }
  0xec   : > { %v701_v57 = vsel %vm542_vm0, %v683_v54, 0.0 }
  0xed   : > { %667 = vadd.xlane.f32.xlu1 %v666_v49 }
  0xef   : > { %664 = vadd.xlane.f32.xlu0 %v663_v51 }
  0xf1   : > { %661 = vadd.xlane.f32.xlu1 %v660_v53 }
  0xf3   : > { %658 = vadd.xlane.f32.xlu0 %v657_v55 }
  0xf5   : > { %702 = vadd.xlane.f32.xlu1 %v701_v57 }
  0xf7   : > { %699 = vadd.xlane.f32.xlu0 %v698_v59 }
  0xf9   : > { %708 = vadd.xlane.f32.xlu1 %v707_v61 }
  0xfb   : > { %705 = vadd.xlane.f32.xlu0 %v704_v62 }
 0x166   : > { %v653_v2 = vpop.xlane.xlu1 %652 }
 0x167   : > { %v1740_v4 = vmul.f32 0.03125, %v653_v2 }
 0x168   : > { %v647_v3 = vpop.xlane.xlu0 %646 }
 0x169   : > { %v1742_v8 = vmul.f32 0.03125, %v647_v3  ;;  %v720_v10 = vmul.f32 %v1740_v4, %v1740_v4 }
 0x16a   : > { %v656_v5 = vpop.xlane.xlu1 %655 }
 0x16b   : > { %v673_v6 = vmul.f32 0.03125, %v656_v5  ;;  %v718_v18 = vmul.f32 %v1742_v8, %v1742_v8  ;;  %v734_v60 = vsub.f32 %v1668_v17, %v1742_v8  ;;  %v1326_v8 = vld [vmem:[%s1972_s4] ss:$0 sm:$0xff] }
 0x16c   : > { %v694_v7 = vpop.xlane.xlu0 %693 }
 0x16d   : > { %v712_v9 = vmul.f32 0.03125, %v694_v7  ;;  %v721_v12 = vmul.f32 %v673_v6, %v673_v6  ;;  %v737_v61 = vsub.f32 %v1672_v21, %v673_v6  ;;  %v736_v7 = vsub.f32 %v1665_v13, %v1740_v4  ;;  %v1327_v4 = vld [vmem:[%s1973_s5] ss:$0 sm:$0xff] }
 0x16e   : > { %v697_v11 = vpop.xlane.xlu1 %696 }
 0x16f   : > { %v713_v14 = vmul.f32 0.03125, %v697_v11  ;;  %v728_v15 = vsub.f32 %v712_v9, %v720_v10 }
 0x170   : > { %v688_v16 = vpop.xlane.xlu0 %687 }
 0x171   : > { %v729_v19 = vsub.f32 %v713_v14, %v721_v12  ;;  %v710_v20 = vmul.f32 0.03125, %v688_v16  ;;  %v744_v25 = vadd.f32 1e-05, %v728_v15 }
 0x172   : > { %v691_v22 = vpop.xlane.xlu1 %690 }
 0x173   : > { %v745_v23 = vadd.f32 1e-05, %v729_v19  ;;  %v726_v24 = vsub.f32 %v710_v20, %v718_v18  ;;  %v711_v31 = vmul.f32 0.03125, %v691_v22 }
 0x174   : > { %v650_v27 = vpop.xlane.xlu0 %649 }
 0x175   : > { %v742_v28 = vadd.f32 1e-05, %v726_v24  ;;  %v671_v29 = vmul.f32 0.03125, %v650_v27  ;;  %1468 = vrsqrt.f32 %v745_v23 }
 0x176   : > { %v668_v30 = vpop.xlane.xlu1 %667 }
 0x177   : > { %1470 = vrsqrt.f32 %v742_v28  ;;  %v719_v32 = vmul.f32 %v671_v29, %v671_v29  ;;  %v1748_v42 = vmul.f32 0.03125, %v668_v30  ;;  %v735_v21 = vsub.f32 %v1678_v26, %v671_v29 }
 0x178   : > { %1472 = vrsqrt.f32 %v744_v25  ;;  %v665_v33 = vpop.xlane.xlu0 %664 }
 0x179   : > { %v727_v34 = vsub.f32 %v711_v31, %v719_v32  ;;  %v1750_v46 = vmul.f32 0.03125, %v665_v33  ;;  %v725_v55 = vmul.f32 %v1748_v42, %v1748_v42  ;;  %v741_v32 = vsub.f32 %v1693_v41, %v1748_v42 }
 0x17a   : > { %v662_v35 = vpop.xlane.xlu1 %661 }
 0x17b   : > { %v743_v36 = vadd.f32 1e-05, %v727_v34  ;;  %v675_v37 = vmul.f32 0.03125, %v662_v35  ;;  %v724_v62 = vmul.f32 %v1750_v46, %v1750_v46  ;;  %v740_v35 = vsub.f32 %v1697_v44, %v1750_v46  ;;  %v1465_v46 = vld [vmem:[%s1976_s8 + $0x10] sm:$0xff]  }
 0x17c   : > { %v659_v38 = vpop.xlane.xlu0 %658  ;;  %1394 = vmatprep.subr.bf16.mxu0 %v1465_v46 }
 0x17d   : > { %1474 = vrsqrt.f32 %v743_v36  ;;  %v674_v39 = vmul.f32 0.03125, %v659_v38  ;;  %v723_v43 = vmul.f32 %v675_v37, %v675_v37  ;;  %v739_v24 = vsub.f32 %v1704_v50, %v675_v37  ;;  %1395 = vmatpush3.bf16.msra.mxu0 %v1465_v46 }
 0x17e   : > { %v703_v40 = vpop.xlane.xlu1 %702 }
 0x17f   : > { %v715_v45 = vmul.f32 0.03125, %v703_v40  ;;  %v722_v48 = vmul.f32 %v674_v39, %v674_v39  ;;  %v738_v29 = vsub.f32 %v1708_v52, %v674_v39 }
 0x180   : > { %v700_v47 = vpop.xlane.xlu0 %699 }
 0x181   : > { %v731_v49 = vsub.f32 %v715_v45, %v723_v43  ;;  %v714_v51 = vmul.f32 0.03125, %v700_v47  ;;  %v1466_v47 = vld [vmem:[%s1976_s8 + $0x8] sm:$0xff]  }
 0x182   : > { %v709_v53 = vpop.xlane.xlu1 %708  ;;  %v1469_v54 = vpop.eup %1468  ;;  %1396 = vmatprep.subr.bf16.mxu0 %v1466_v47 }
 0x183   : > { %v747_v56 = vadd.f32 1e-05, %v731_v49  ;;  %v730_v57 = vsub.f32 %v714_v51, %v722_v48  ;;  %v717_v58 = vmul.f32 0.03125, %v709_v53  ;;  %v761_v9 = vmul.f32 %v1469_v54, %v737_v61  ;;  %1397 = vmatpush3.bf16.msra.mxu0 %v1466_v47  ;;  %v1467_v48 = vld [vmem:[%s1976_s8] sm:$0xff]  }
 0x184   : > { %v1471_v59 = vpop.eup %1470  ;;  %v706_v63 = vpop.xlane.xlu0 %705  ;;  %1398 = vmatprep.subr.bf16.mxu0 %v1467_v48  ;;  %v1328_v53 = vld [vmem:[%s1975_s7] ss:$0 sm:$0xff] }
 0x185   : > { %v1473_v0 = vpop.eup %1472  ;;  %1476 = vrsqrt.f32 %v747_v56  ;;  %v746_v2 = vadd.f32 1e-05, %v730_v57  ;;  %v733_v3 = vsub.f32 %v717_v58, %v725_v55  ;;  %v716_v5 = vmul.f32 0.03125, %v706_v63 }
 0x186   : > { %v758_v12 = vmul.f32 %v1471_v59, %v734_v60  ;;  %v760_v17 = vmul.f32 %v1473_v0, %v736_v7  ;;  %v775_v15 = vmul.f32 %v1326_v8, %v761_v9 }
 0x187   : > { %1478 = vrsqrt.f32 %v746_v2  ;;  %v749_v10 = vadd.f32 1e-05, %v733_v3  ;;  %v732_v11 = vsub.f32 %v716_v5, %v724_v62  ;;  %1399 = vmatpush3.bf16.msra.mxu0 %v1467_v48 }
 0x188   : > { %v772_v18 = vmul.f32 %v1326_v8, %v758_v12  ;;  %v774_v13 = vmul.f32 %v1326_v8, %v760_v17  ;;  %v1768_v20 = vadd.f32 %v1327_v4, %v775_v15 }
 0x189   : > { %1480 = vrsqrt.f32 %v749_v10  ;;  %v748_v6 = vadd.f32 1e-05, %v732_v11 }
 0x18a   : > { %v1475_v14 = vpop.eup %1474  ;;  %v1770_v26 = vadd.f32 %v1327_v4, %v772_v18  ;;  %v1774_v23 = vadd.f32 %v1327_v4, %v774_v13  ;;  %v1335_v18 = vld [vmem:[%s1977_s9] ss:$0 sm:$0xff] }
 0x18b   : > { %v759_v16 = vmul.f32 %v1475_v14, %v735_v21  ;;  %1482 = vrsqrt.f32 %v748_v6 }
 0x18c   : > { %v795_v28 = vpack.c.bf16 %v1768_v20, %v1774_v23 }
 0x18d   : > { %v773_v19 = vmul.f32 %v1326_v8, %v759_v16 }
 0x18f   : > { %v1772_v22 = vadd.f32 %v1327_v4, %v773_v19 }
 0x191   : > { %v794_v25 = vpack.c.bf16 %v1772_v22, %v1770_v26 }
 0x192   : > { %v1477_v27 = vpop.eup %1476 }
 0x193   : > { %1384 = vmatprep.mubr.msk.bf16.mxu1 %vm542_vm0, %v794_v25  ;;  %v763_v30 = vmul.f32 %v1477_v27, %v739_v24 }
 0x194   : > { %v1479_v31 = vpop.eup %1478  ;;  %1385 = vmatmul.mubr.msk.bf16.vlgmr.msra.gmra.mxu1 %vm542_vm0, %v795_v28 }
 0x195   : > { %v762_v33 = vmul.f32 %v1479_v31, %v738_v29  ;;  %v777_v50 = vmul.f32 %v1326_v8, %v763_v30  ;;  %1412 = vmatpush3.bf16.msra.mxu1 %v1735_v1 }
 0x196   : > { %v1481_v34 = vpop.eup %1480  ;;  %1409 = vmatprep.subr.bf16.mxu1 %v1465_v46 }
 0x197   : > { %v776_v36 = vmul.f32 %v1326_v8, %v762_v33  ;;  %v765_v37 = vmul.f32 %v1481_v34, %v741_v32  ;;  %v1791_v39 = vadd.f32 %v1327_v4, %v777_v50 }
 0x198   : > { %v1483_v52 = vpop.eup %1482 }
 0x199   : > { %v1789_v38 = vadd.f32 %v1327_v4, %v776_v36  ;;  %v764_v40 = vmul.f32 %v1483_v52, %v740_v35  ;;  %v779_v43 = vmul.f32 %v1326_v8, %v765_v37  ;;  %1413 = vmatpush3.bf16.msra.mxu1 %v1465_v46 }
 0x19a   : > { %1410 = vmatprep.subr.bf16.mxu1 %v1466_v47 }
 0x19b   : > { %v796_v41 = vpack.c.bf16 %v1791_v39, %v1789_v38  ;;  %v778_v42 = vmul.f32 %v1326_v8, %v764_v40  ;;  %v1798_v45 = vadd.f32 %v1327_v4, %v779_v43 }
 0x19d   : > { %1388 = vmatprep.mubr.msk.bf16.mxu1 %vm542_vm0, %v796_v41  ;;  %v1796_v1 = vadd.f32 %v1327_v4, %v778_v42  ;;  %1414 = vmatpush3.bf16.msra.mxu1 %v1466_v47 }
 0x19e   : > { %1411 = vmatprep.subr.bf16.mxu1 %v1467_v48 }
 0x19f   : > { %v797_v44 = vpack.c.bf16 %v1798_v45, %v1796_v1 }
 0x1a1   : > { %1389 = vmatmul.mubr.msk.bf16.gmra.mxu1 %vm542_vm0, %v797_v44 }
 0x1a2   : > { %1415 = vmatpush3.bf16.msra.mxu1 %v1467_v48 }
 0x254   : > { %v1386_v49 = vpop.f32.mrf.mxu1 }
 0x255   : > { %v876_v57 = vadd.f32 %v1386_v49, %v1328_v53 }
 0x256   : > { %v867_v51 = vpop.f32.mrf.mxu1 }
 0x257   : > { %v868_v55 = vadd.f32 %v1328_v53, %v867_v51  ;;  %v900_v63 = vmax.f32 %v876_v57, 0.0 }
 0x258   : > { %v1387_v54 = vpop.f32.mrf.mxu1 }
 0x259   : > { %v879_v56 = vadd.f32 %v1387_v54, %v1328_v53  ;;  %v898_v61 = vmax.f32 %v868_v55, 0.0 }
 0x25a   : > { %v870_v58 = vpop.f32.mrf.mxu1 }
 0x25b   : > { %v871_v59 = vadd.f32 %v1328_v53, %v870_v58  ;;  %v901_v60 = vmax.f32 %v879_v56, 0.0 }
 0x25d   : > { %v899_v62 = vmax.f32 %v871_v59, 0.0  ;;  %v907_v2 = vpack.c.bf16 %v901_v60, %v900_v63 }
 0x25f   : > { %v906_v0 = vpack.c.bf16 %v899_v62, %v898_v61 }
 0x261   : > { %v1390_v3 = vpop.f32.mrf.mxu1  ;;  %1400 = vmatprep.mubr.msk.bf16.mxu0 %vm949_vm1, %v906_v0 }
 0x262   : > { %1401 = vmatmul.mubr.msk.bf16.vlgmr.msra.gmra.mxu0 %vm949_vm1, %v907_v2  ;;  %v892_v11 = vadd.f32 %v1390_v3, %v1328_v53 }
 0x263   : > { %v883_v5 = vpop.f32.mrf.mxu1 }
 0x264   : > { %v884_v9 = vadd.f32 %v1328_v53, %v883_v5  ;;  %v904_v14 = vmax.f32 %v892_v11, 0.0 }
 0x265   : > { %v1391_v7 = vpop.f32.mrf.mxu1 }
 0x266   : > { %v895_v10 = vadd.f32 %v1391_v7, %v1328_v53  ;;  %v902_v6 = vmax.f32 %v884_v9, 0.0 }
 0x267   : > { %v886_v12 = vpop.f32.mrf.mxu1 }
 0x268   : > { %v887_v17 = vadd.f32 %v1328_v53, %v886_v12  ;;  %v905_v21 = vmax.f32 %v895_v10, 0.0 }
 0x26a   : > { %v903_v8 = vmax.f32 %v887_v17, 0.0  ;;  %v909_v16 = vpack.c.bf16 %v905_v21, %v904_v14 }
 0x26c   : > { %v908_v15 = vpack.c.bf16 %v903_v8, %v902_v6 }
 0x26e   : > { %1404 = vmatprep.mubr.msk.bf16.mxu1 %vm949_vm1, %v908_v15 }
 0x26f   : > { %1405 = vmatmul.mubr.msk.bf16.vlgmr.msra.gmra.mxu1 %vm949_vm1, %v909_v16 }
 0x322   : > { %v1402_v13 = vpop.f32.mrf.mxu0 }
 0x323   : > { %v1005_v4 = vadd.f32 %v1402_v13, %v1335_v18 }
 0x324   : > { %v996_v19 = vpop.f32.mrf.mxu0 }
 0x325   : > { %v1823_v24 = vadd.f32 %v1005_v4, %v1774_v23  ;;  %v997_v25 = vadd.f32 %v1335_v18, %v996_v19 }
 0x326   : > { %v1403_v27 = vpop.f32.mrf.mxu0 }
 0x327   : > { %v1826_v28 = vadd.f32 %v997_v25, %v1770_v26  ;;  %v1008_v29 = vadd.f32 %v1403_v27, %v1335_v18  ;;  %v1043_v30 = vsel %vm542_vm0, %v1823_v24, 0.0  ;;  %v1071_v34 = vmul.f32 %v1823_v24, %v1823_v24 }
 0x328   : > { %1044 = vadd.xlane.f32.xlu0 %v1043_v30  ;;  %v999_v31 = vpop.f32.mrf.mxu0 }
 0x329   : > { %v1831_v32 = vadd.f32 %v1008_v29, %v1768_v20  ;;  %v1000_v33 = vadd.f32 %v1335_v18, %v999_v31  ;;  %v1037_v26 = vsel %vm542_vm0, %v1826_v28, 0.0  ;;  %v1083_v36 = vsel %vm542_vm0, %v1071_v34, 0.0 }
 0x32a   : > { %v1069_v37 = vmul.f32 %v1826_v28, %v1826_v28 }
 0x32b   : > { %v1834_v50 = vadd.f32 %v1000_v33, %v1772_v22  ;;  %v1046_v23 = vsel %vm542_vm0, %v1831_v32, 0.0  ;;  %v1072_v22 = vmul.f32 %v1831_v32, %v1831_v32 }
 0x32c   : > { %1047 = vadd.xlane.f32.xlu1 %v1046_v23  ;;  %1038 = vadd.xlane.f32.xlu0 %v1037_v26  ;;  %v1077_v47 = vsel %vm542_vm0, %v1069_v37, 0.0 }
 0x32d   : > { %v1040_v20 = vsel %vm542_vm0, %v1834_v50, 0.0  ;;  %v1070_v43 = vmul.f32 %v1834_v50, %v1834_v50  ;;  %v1086_v46 = vsel %vm542_vm0, %v1072_v22, 0.0 }
 0x32f   : > { %v1406_v35 = vpop.f32.mrf.mxu1  ;;  %v1080_v51 = vsel %vm542_vm0, %v1070_v43, 0.0 }
 0x330   : > { %v1021_v52 = vadd.f32 %v1406_v35, %v1335_v18  ;;  %1041 = vadd.xlane.f32.xlu1 %v1040_v20  ;;  %1084 = vadd.xlane.f32.xlu0 %v1083_v36 }
 0x331   : > { %v1012_v40 = vpop.f32.mrf.mxu1 }
 0x332   : > { %v1852_v41 = vadd.f32 %v1021_v52, %v1796_v1  ;;  %v1013_v42 = vadd.f32 %v1335_v18, %v1012_v40 }
 0x333   : > { %v1407_v44 = vpop.f32.mrf.mxu1 }
 0x334   : > { %v1024_v48 = vadd.f32 %v1407_v44, %v1335_v18  ;;  %1087 = vadd.xlane.f32.xlu1 %v1086_v46  ;;  %1078 = vadd.xlane.f32.xlu0 %v1077_v47  ;;  %v1858_v53 = vadd.f32 %v1013_v42, %v1789_v38  ;;  %v1055_v55 = vsel %vm542_vm0, %v1852_v41, 0.0  ;;  %v1075_v60 = vmul.f32 %v1852_v41, %v1852_v41 }
 0x335   : > { %v1015_v49 = vpop.f32.mrf.mxu1 }
 0x336   : > { %v1861_v54 = vadd.f32 %v1024_v48, %v1798_v45  ;;  %v1016_v1 = vadd.f32 %v1335_v18, %v1015_v49  ;;  %v1049_v58 = vsel %vm542_vm0, %v1858_v53, 0.0  ;;  %v1073_v38 = vmul.f32 %v1858_v53, %v1858_v53  ;;  %v1904_v49 = vld [vmem:[%s1978_s10] ss:$0 sm:$0xff] }
 0x337   : > { %v1095_v62 = vsel %vm542_vm0, %v1075_v60, 0.0 }
 0x338   : > { %1081 = vadd.xlane.f32.xlu1 %v1080_v51  ;;  %1056 = vadd.xlane.f32.xlu0 %v1055_v55  ;;  %v1866_v56 = vadd.f32 %v1016_v1, %v1791_v39  ;;  %v1058_v57 = vsel %vm542_vm0, %v1861_v54, 0.0  ;;  %v1089_v59 = vsel %vm542_vm0, %v1073_v38, 0.0  ;;  %v1076_v63 = vmul.f32 %v1861_v54, %v1861_v54 }
 0x33a   : > { %v1052_v45 = vsel %vm542_vm0, %v1866_v56, 0.0  ;;  %v1074_v39 = vmul.f32 %v1866_v56, %v1866_v56  ;;  %v1098_v0 = vsel %vm542_vm0, %v1076_v63, 0.0 }
 0x33c   : > { %1059 = vadd.xlane.f32.xlu1 %v1058_v57  ;;  %1050 = vadd.xlane.f32.xlu0 %v1049_v58  ;;  %v1092_v61 = vsel %vm542_vm0, %v1074_v39, 0.0  ;;  %v1345_v39 = vld [vmem:[%s1979_s11] ss:$0 sm:$0xff] }
 0x340   : > { %1053 = vadd.xlane.f32.xlu1 %v1052_v45  ;;  %1090 = vadd.xlane.f32.xlu0 %v1089_v59 }
 0x344   : > { %1093 = vadd.xlane.f32.xlu1 %v1092_v61  ;;  %1096 = vadd.xlane.f32.xlu0 %v1095_v62 }
 0x348   : > { %1099 = vadd.xlane.f32.xlu1 %v1098_v0 }
 0x3b1   : > { %v1045_v2 = vpop.xlane.xlu0 %1044 }
 0x3b2   : > { %v1063_v7 = vmul.f32 0.03125, %v1045_v2 }
 0x3b4   : > { %v1111_v17 = vmul.f32 %v1063_v7, %v1063_v7  ;;  %v1127_v46 = vsub.f32 %v1823_v24, %v1063_v7 }
 0x3b5   : > { %v1048_v3 = vpop.xlane.xlu1 %1047  ;;  %v1039_v5 = vpop.xlane.xlu0 %1038 }
 0x3b6   : > { %v1886_v9 = vmul.f32 0.03125, %v1048_v3  ;;  %v1888_v10 = vmul.f32 0.03125, %v1039_v5 }
 0x3b8   : > { %v1112_v8 = vmul.f32 %v1886_v9, %v1886_v9  ;;  %v1109_v14 = vmul.f32 %v1888_v10, %v1888_v10  ;;  %v1128_v24 = vsub.f32 %v1831_v32, %v1886_v9  ;;  %v1125_v32 = vsub.f32 %v1826_v28, %v1888_v10 }
 0x3b9   : > { %v1042_v11 = vpop.xlane.xlu1 %1041  ;;  %v1085_v12 = vpop.xlane.xlu0 %1084 }
 0x3ba   : > { %v1103_v21 = vmul.f32 0.03125, %v1085_v12  ;;  %v1894_v18 = vmul.f32 0.03125, %v1042_v11 }
 0x3bc   : > { %v1119_v6 = vsub.f32 %v1103_v21, %v1111_v17  ;;  %v1110_v31 = vmul.f32 %v1894_v18, %v1894_v18 }
 0x3bd   : > { %v1088_v15 = vpop.xlane.xlu1 %1087  ;;  %v1079_v16 = vpop.xlane.xlu0 %1078 }
 0x3be   : > { %v1135_v13 = vadd.f32 1e-05, %v1119_v6  ;;  %v1104_v4 = vmul.f32 0.03125, %v1088_v15  ;;  %v1101_v19 = vmul.f32 0.03125, %v1079_v16  ;;  %v1126_v6 = vsub.f32 %v1834_v50, %v1894_v18 }
 0x3c0   : > { %1484 = vrsqrt.f32 %v1135_v13  ;;  %v1120_v25 = vsub.f32 %v1104_v4, %v1112_v8  ;;  %v1117_v27 = vsub.f32 %v1101_v19, %v1109_v14 }
 0x3c1   : > { %v1082_v29 = vpop.xlane.xlu1 %1081  ;;  %v1057_v30 = vpop.xlane.xlu0 %1056 }
 0x3c2   : > { %v1136_v33 = vadd.f32 1e-05, %v1120_v25  ;;  %v1133_v23 = vadd.f32 1e-05, %v1117_v27  ;;  %v1102_v26 = vmul.f32 0.03125, %v1082_v29  ;;  %v1898_v37 = vmul.f32 0.03125, %v1057_v30 }
 0x3c4   : > { %1486 = vrsqrt.f32 %v1136_v33  ;;  %v1118_v34 = vsub.f32 %v1102_v26, %v1110_v31  ;;  %v1115_v51 = vmul.f32 %v1898_v37, %v1898_v37  ;;  %v1131_v33 = vsub.f32 %v1852_v41, %v1898_v37 }
 0x3c5   : > { %1488 = vrsqrt.f32 %v1133_v23  ;;  %v1060_v35 = vpop.xlane.xlu1 %1059  ;;  %v1051_v20 = vpop.xlane.xlu0 %1050 }
 0x3c6   : > { %v1134_v36 = vadd.f32 1e-05, %v1118_v34  ;;  %v1065_v22 = vmul.f32 0.03125, %v1051_v20  ;;  %v1068_v60 = vmul.f32 0.03125, %v1060_v35 }
 0x3c8   : > { %1490 = vrsqrt.f32 %v1134_v36  ;;  %v1113_v43 = vmul.f32 %v1065_v22, %v1065_v22  ;;  %v1116_v17 = vmul.f32 %v1068_v60, %v1068_v60  ;;  %v1129_v18 = vsub.f32 %v1858_v53, %v1065_v22 }
 0x3c9   : > { %v1054_v52 = vpop.xlane.xlu1 %1053  ;;  %v1091_v40 = vpop.xlane.xlu0 %1090  ;;  %v1132_v20 = vsub.f32 %v1861_v54, %v1068_v60 }
 0x3ca   : > { %v1066_v42 = vmul.f32 0.03125, %v1054_v52  ;;  %v1105_v44 = vmul.f32 0.03125, %v1091_v40 }
 0x3cc   : > { %v1121_v47 = vsub.f32 %v1105_v44, %v1113_v43  ;;  %v1114_v1 = vmul.f32 %v1066_v42, %v1066_v42  ;;  %v1130_v29 = vsub.f32 %v1866_v56, %v1066_v42 }
 0x3cd   : > { %v1485_v48 = vpop.eup %1484  ;;  %v1094_v55 = vpop.xlane.xlu1 %1093 }
 0x3ce   : > { %v1097_v57 = vpop.xlane.xlu0 %1096  ;;  %v1151_v58 = vmul.f32 %v1485_v48, %v1127_v46  ;;  %v1137_v38 = vadd.f32 1e-05, %v1121_v47  ;;  %v1106_v45 = vmul.f32 0.03125, %v1094_v55 }
 0x3cf   : > { %v1107_v59 = vmul.f32 0.03125, %v1097_v57 }
 0x3d0   : > { %v1165_v61 = vmul.f32 %v1904_v49, %v1151_v58  ;;  %1492 = vrsqrt.f32 %v1137_v38  ;;  %v1122_v62 = vsub.f32 %v1106_v45, %v1114_v1 }
 0x3d1   : > { %v1123_v63 = vsub.f32 %v1107_v59, %v1115_v51  ;;  %v1487_v0 = vpop.eup %1486  ;;  %v1100_v2 = vpop.xlane.xlu1 %1099 }
 0x3d2   : > { %v1489_v3 = vpop.eup %1488  ;;  %v1179_v5 = vadd.f32 %v1345_v39, %v1165_v61  ;;  %v1152_v7 = vmul.f32 %v1487_v0, %v1128_v24  ;;  %v1138_v9 = vadd.f32 1e-05, %v1122_v62  ;;  %v1108_v21 = vmul.f32 0.03125, %v1100_v2 }
 0x3d3   : > { %v1139_v11 = vadd.f32 1e-05, %v1123_v63  ;;  %v1149_v12 = vmul.f32 %v1489_v3, %v1125_v32 }
 0x3d4   : > { %1187 = vst.msk [vmem:[%s1919_s19 + $0x10] sm:$0xff] %vm542_vm0, %v1179_v5  ;;  %v1166_v8 = vmul.f32 %v1904_v49, %v1152_v7  ;;  %1494 = vrsqrt.f32 %v1138_v9  ;;  %v1124_v14 = vsub.f32 %v1108_v21, %v1116_v17 }
 0x3d5   : > { %v1491_v28 = vpop.eup %1490  ;;  %v1163_v10 = vmul.f32 %v1904_v49, %v1149_v12  ;;  %1496 = vrsqrt.f32 %v1139_v11 }
 0x3d6   : > { %v1180_v15 = vadd.f32 %v1345_v39, %v1166_v8  ;;  %v1150_v16 = vmul.f32 %v1491_v28, %v1126_v6  ;;  %v1140_v4 = vadd.f32 1e-05, %v1124_v14 }
 0x3d7   : > { %v1177_v13 = vadd.f32 %v1345_v39, %v1163_v10 }
 0x3d8   : > { %1188 = vst.msk [vmem:[%s1919_s19 + $0x18] sm:$0xff] %vm542_vm0, %v1180_v15  ;;  %v1164_v19 = vmul.f32 %v1904_v49, %v1150_v16  ;;  %1498 = vrsqrt.f32 %v1140_v4 }
 0x3d9   : > { %1185 = vst.msk [vmem:[%s1919_s19] sm:$0xff] %vm542_vm0, %v1177_v13 }
 0x3da   : > { %v1178_v50 = vadd.f32 %v1345_v39, %v1164_v19 }
 0x3dc   : > { %1186 = vst.msk [vmem:[%s1919_s19 + $0x8] sm:$0xff] %vm542_vm0, %v1178_v50 }
 0x3dd   : > { %v1493_v25 = vpop.eup %1492 }
 0x3de   : > { %v1153_v27 = vmul.f32 %v1493_v25, %v1129_v18 }
 0x3e0   : > { %v1167_v30 = vmul.f32 %v1904_v49, %v1153_v27 }
 0x3e1   : > { %v1495_v31 = vpop.eup %1494 }
 0x3e2   : > { %v1497_v23 = vpop.eup %1496  ;;  %v1181_v26 = vadd.f32 %v1345_v39, %v1167_v30  ;;  %v1154_v34 = vmul.f32 %v1495_v31, %v1130_v29 }
 0x3e3   : > { %v1155_v35 = vmul.f32 %v1497_v23, %v1131_v33 }
 0x3e4   : > { %1189 = vst.msk [vmem:[%s1919_s19 + $0x20] sm:$0xff] %vm542_vm0, %v1181_v26  ;;  %v1168_v53 = vmul.f32 %v1904_v49, %v1154_v34 }
 0x3e5   : > { %v1169_v56 = vmul.f32 %v1904_v49, %v1155_v35  ;;  %v1499_v36 = vpop.eup %1498 }
 0x3e6   : > { %v1182_v22 = vadd.f32 %v1345_v39, %v1168_v53  ;;  %v1156_v40 = vmul.f32 %v1499_v36, %v1132_v20 }
 0x3e7   : > { %v1183_v52 = vadd.f32 %v1345_v39, %v1169_v56 }
 0x3e8   : > { %1190 = vst.msk [vmem:[%s1919_s19 + $0x28] sm:$0xff] %vm542_vm0, %v1182_v22  ;;  %v1170_v41 = vmul.f32 %v1904_v49, %v1156_v40 }
 0x3e9   : > { %1191 = vst.msk [vmem:[%s1919_s19 + $0x30] sm:$0xff] %vm542_vm0, %v1183_v52 }
 0x3ea   : > { %v1184_v37 = vadd.f32 %v1345_v39, %v1170_v41 }
 0x3ec   : > { %1192 = vst.msk [vmem:[%s1919_s19 + $0x38] sm:$0xff] %vm542_vm0, %v1184_v37 }
 0x3ed PF: > { %s22_s25 = sadd.s32 1, %s1538_s25   ;;  %s1981_s21 = smov %s1530_s23 }
 0x3ee   : > { %p19_p7 = scmp.ge.s32.totalorder %s22_s25, 6   ;;  %s1982_s22 = smov %s1534_s24 }
 0x3ef   : > { %s1983_s23 = smov %s1986_s26  ;;  %s1984_s24 = smov %s1990_s27 }
 0x3f0   :  { %21 = sbr.rel (!%p19_p7) target bundleno = 3 (0x3), region = 101 }

</bundles_post_ra>
